<compile_context>
chip_gen: v7x
topology: tpu7x:2x2x1
jax: 0.10.0
libtpu: 0.0.40
codegen_flags: <defaults>
</compile_context>

<pallas_src>
import functools

import jax
import jax.numpy as jnp
from jax import lax
from jax.experimental import pallas as pl
from jax.experimental.pallas import tpu as pltpu

SELU_LAMBDA = 1.0507009873554805
SELU_ALPHA = 1.6732632423543772
DENOISE = 0.93                       # cfg.denoise (TRACER default)
BRANCH_DILATIONS = (None, 1, 3, 5)   # branch 0 is the kernel=1 DWConv (center tap only)


def _selu(x):
    # exp(min(x, 0)) keeps the discarded branch finite (robust to select->mul rewrites).
    return SELU_LAMBDA * jnp.where(
        x > 0, x, SELU_ALPHA * (jnp.exp(jnp.minimum(x, 0.0)) - 1.0))


def _depthwise3x3(x, taps, bias, tap_masks, d, W, N):
    """Depthwise 3x3 conv (stride 1, 'same' zero padding, dilation d) + bias + SELU.

    x:         (Cc, N)  channel-major activations, N = TB*H*W (images concatenated)
    taps:      (Cc, 9)  per-channel taps, row-major over (ky, kx); BN scale folded
    bias:      (Cc, 1)  folded BatchNorm bias
    tap_masks: length-9 tuple of (1, N) validity masks (index 4 = center, unused)
    """
    row = W * d
    # Two row-shifted bases, each reused by the three kx taps of that row (2 "big"
    # rolls), then +/-d lane rolls for kx = +/-1 (6 small rolls).  pltpu.roll follows
    # jnp.roll semantics: roll(x, s)[:, i] = x[:, (i - s) % N]; any pixel that wrapped
    # (around the tile or across images) is zeroed by the per-image-position mask.
    rowm = pltpu.roll(x, row % N, 1)        # reads input row r - d   (ky = -1)
    rowp = pltpu.roll(x, (-row) % N, 1)     # reads input row r + d   (ky = +1)
    bases = (rowm, x, rowp)
    acc = x * taps[:, 4:5]                  # center tap: no shift, no mask
    for t in range(9):
        if t == 4:
            continue
        ky, kx = t // 3 - 1, t % 3 - 1
        base = bases[ky + 1]
        shifted = base if kx == 0 else pltpu.roll(base, (-kx * d) % N, 1)
        acc = acc + jnp.where(tap_masks[t], shifted, 0.0) * taps[:, t:t + 1]
    return _selu(acc + bias)


def _pointwise(x, w, bias):
    """1x1 conv as a channel matmul.  Weights arrive in bf16 (BN scale folded);
    activations are cast to bf16 at the MXU boundary, accumulation stays f32."""
    y = jnp.dot(w, x.astype(w.dtype), preferred_element_type=jnp.float32)  # (Cout, N)
    return _selu(y + bias)


def object_attention_kernel(dec_ref, enc_ref,
                            dws_dw_w_ref, dws_dw_b_ref,
                            dws_pw_w_ref, dws_pw_b_ref,
                            br_dw_w_ref, br_dw_b_ref,
                            br_pw_w_ref, br_pw_b_ref,
                            c1_skip_w_ref, c1_br_w_ref, c1_b_ref,
                            out_ref, *, H, W):
    HW = H * W
    N = out_ref.shape[1]                          # TB * HW (TB images per grid step)
    dec = dec_ref[...]                            # (1, N)
    enc = enc_ref[...]                            # (C, N)

    # ---- object / background masking, factored into one (1, N) coefficient ----
    sig = 1.0 / (1.0 + jnp.exp(-dec))
    bg = 1.0 - sig
    coeff = sig + jnp.where(bg > DENOISE, 0.0, bg)        # sigmoid + denoised background
    x = coeff * enc                                       # (C, N)

    # ---- per-tap validity masks, precomputed once per dilation (corners included) ----
    pos = lax.broadcasted_iota(jnp.int32, (1, N), 1) % HW  # per-image pixel position
    col = pos % W

    def _tap_masks(d):
        rlo, rhi = pos >= d * W, pos < (H - d) * W
        clo, chi = col >= d, col < W - d
        return (rlo & clo, rlo, rlo & chi,
                clo, None, chi,
                rhi & clo, rhi, rhi & chi)

    masks = {d: _tap_masks(d) for d in (1, 3, 5)}          # d=1 set reused twice

    # ---- DWSConv: depthwise 3x3 -> (BN) -> SELU -> 1x1 -> (BN) -> SELU ----
    x = _depthwise3x3(x, dws_dw_w_ref[...], dws_dw_b_ref[...], masks[1], 1, W, N)
    x = _pointwise(x, dws_pw_w_ref[...], dws_pw_b_ref[...])          # (C2, N)
    skip = x

    # ---- 4 branches, fused with conv1 (1x1) by linearity of the 1x1 conv ----
    # M=1 "matmuls" are done as VPU multiply + XLU sublane reduce (no tiny MXU passes).
    pre = jnp.sum(c1_skip_w_ref[...] * skip, axis=0, keepdims=True)  # conv1(skip): (1, N)
    for i, d in enumerate(BRANCH_DILATIONS):
        taps = br_dw_w_ref[i]                     # (C2, 9)
        dw_b = br_dw_b_ref[i]                     # (C2, 1)
        if d is None:                             # kernel=1 DWConv: per-channel scale
            b = _selu(x * taps[:, 4:5] + dw_b)
        else:
            b = _depthwise3x3(x, taps, dw_b, masks[d], d, W, N)
        b = _pointwise(b, br_pw_w_ref[i], br_pw_b_ref[i])            # (C8, N)
        pre = pre + jnp.sum(c1_br_w_ref[i] * b, axis=0, keepdims=True)

    # conv1 BN bias -> SELU -> ReLU -> residual with the decoder map
    y = _selu(pre + c1_b_ref[...])
    y = jnp.maximum(y, 0.0)
    out_ref[...] = y + dec


def _pick_tile_images(B, HW, C, budget_bytes=16 << 20):
    """Largest divisor of B whose rough f32 working set fits the budget.  Blocks
    smaller than the full batch keep the lane dimension 128-aligned."""
    per_image = (10 * C + 24) * HW * 4
    cap = max(1, budget_bytes // max(per_image, 1))
    for tb in range(min(B, cap), 0, -1):
        if B % tb:
            continue
        if tb == B or (tb * HW) % 128 == 0:
            return tb
    return B


def object_attention(decoder_map, encoder_map, params):
    """decoder_map: (B, 1, H, W), encoder_map: (B, C, H, W)  ->  (B, 1, H, W)."""
    B, C, H, W = encoder_map.shape
    HW = H * W
    TB = _pick_tile_images(B, HW, C)
    NB = TB * HW

    # Channel-major, batch-flattened host layout (one encoder transpose per call).
    dec = decoder_map.reshape(1, B * HW)
    enc = jnp.transpose(encoder_map.reshape(B, C, HW), (1, 0, 2)).reshape(C, B * HW)

    p = dict(params)
    # bf16 weights for the MXU 1x1 convs; accumulation stays f32 in-kernel.
    p["dws_pw_w"] = p["dws_pw_w"].astype(jnp.bfloat16)
    p["br_pw_w"] = p["br_pw_w"].astype(jnp.bfloat16)

    def rep(arr):                                 # full, untiled, replicated param block
        zeros = (0,) * arr.ndim
        return pl.BlockSpec(arr.shape, lambda g, _z=zeros: _z)

    # Explicit scoped-VMEM limit sized from the per-step working set (double-buffered
    # input blocks + live activations), clamped to [32, 64] MiB.
    per_step = (10 * C + 24) * NB * 4
    vmem_limit = int(min(64 << 20, max(32 << 20, 2 * per_step)))

    kernel = functools.partial(object_attention_kernel, H=H, W=W)
    out = pl.pallas_call(
        kernel,
        out_shape=jax.ShapeDtypeStruct((1, B * HW), jnp.float32),
        grid=(B // TB,),
        in_specs=[
            pl.BlockSpec((1, NB), lambda g: (0, g)),     # decoder map
            pl.BlockSpec((C, NB), lambda g: (0, g)),     # encoder map
            rep(p["dws_dw_w"]), rep(p["dws_dw_b"]),
            rep(p["dws_pw_w"]), rep(p["dws_pw_b"]),
            rep(p["br_dw_w"]), rep(p["br_dw_b"]),
            rep(p["br_pw_w"]), rep(p["br_pw_b"]),
            rep(p["c1_w_skip"]), rep(p["c1_w_br"]), rep(p["c1_b"]),
        ],
        out_specs=pl.BlockSpec((1, NB), lambda g: (0, g)),
        compiler_params=pltpu.CompilerParams(
            dimension_semantics=("parallel",),    # independent batch blocks
            vmem_limit_bytes=vmem_limit),
    )(dec, enc,
      p["dws_dw_w"], p["dws_dw_b"],
      p["dws_pw_w"], p["dws_pw_b"],
      p["br_dw_w"], p["br_dw_b"],
      p["br_pw_w"], p["br_pw_b"],
      p["c1_w_skip"], p["c1_w_br"], p["c1_b"])
    return out.reshape(B, 1, H, W)


def init_params(key, C):
    """Deterministic synthetic parameters, channel-major, with eval-mode BatchNorm
    scales folded into the conv weights (bias kept separate)."""
    assert C % 8 == 0
    C2, C8 = C // 2, C // 8
    ks = jax.random.split(key, 22)

    def w(k, shape, scale=0.2):
        return scale * jax.random.normal(k, shape, jnp.float32)

    def bn(k, c):
        k1, k2, k3, k4 = jax.random.split(k, 4)
        gamma = 1.0 + 0.1 * jax.random.normal(k1, (c,), jnp.float32)
        beta = 0.1 * jax.random.normal(k2, (c,), jnp.float32)
        mean = 0.1 * jax.random.normal(k3, (c,), jnp.float32)
        var = 0.5 + jax.random.uniform(k4, (c,), jnp.float32)
        scale = gamma / jnp.sqrt(var + 1e-5)
        bias = beta - mean * scale
        return scale, bias

    # DWSConv: depthwise 3x3 (C -> C) + BN + SELU, then 1x1 (C -> C/2) + BN + SELU.
    s, b = bn(ks[0], C)
    dws_dw_w = w(ks[1], (C, 9)) * s[:, None]          # fold BN scale into the taps
    dws_dw_b = b[:, None]
    s, b = bn(ks[2], C2)
    dws_pw_w = w(ks[3], (C2, C)) * s[:, None]         # fold BN scale into output rows
    dws_pw_b = b[:, None]

    # Four branches: DWConv (depthwise, kernels 1/3/3/3) + BN + SELU,
    # then BasicConv2d 1x1 (C/2 -> C/8) + BN + SELU.
    center_only = jnp.zeros((1, 9), jnp.float32).at[0, 4].set(1.0)
    br_dw_w, br_dw_b, br_pw_w, br_pw_b = [], [], [], []
    for i in range(4):
        s, b = bn(ks[4 + i], C2)
        taps = w(ks[8 + i], (C2, 9))
        if i == 0:                                    # kernel=1 DWConv: center tap only
            taps = taps * center_only
        br_dw_w.append(taps * s[:, None])
        br_dw_b.append(b[:, None])
        s, b = bn(ks[12 + i], C8)
        br_pw_w.append(w(ks[16 + i], (C8, C2)) * s[:, None])
        br_pw_b.append(b[:, None])

    # conv1: BasicConv2d(C/2 -> 1, 1x1) + BN + SELU.  Stored as a (C2, 1) column for
    # the skip path and (4, C8, 1) chunks for the linearity-fused branch paths.
    s, b = bn(ks[20], 1)
    c1_col = (w(ks[21], (1, C2)) * s[:, None]).reshape(C2, 1)   # BN scale folded
    c1_b = b.reshape(1, 1)

    return {
        "dws_dw_w": dws_dw_w, "dws_dw_b": dws_dw_b,
        "dws_pw_w": dws_pw_w, "dws_pw_b": dws_pw_b,
        "br_dw_w": jnp.stack(br_dw_w), "br_dw_b": jnp.stack(br_dw_b),
        "br_pw_w": jnp.stack(br_pw_w), "br_pw_b": jnp.stack(br_pw_b),
        "c1_w_skip": c1_col, "c1_w_br": c1_col.reshape(4, C8, 1), "c1_b": c1_b,
    }


if __name__ == "__main__":
    key = jax.random.PRNGKey(0)
    k1, k2, k3 = jax.random.split(key, 3)
    B, C, H, W = 2, 16, 16, 16          # channel must be divisible by 8
    decoder_map = jax.random.normal(k1, (B, 1, H, W), jnp.float32)
    encoder_map = jax.random.normal(k2, (B, C, H, W), jnp.float32)
    params = init_params(k3, C)

    out = object_attention(decoder_map, encoder_map, params)
    jax.block_until_ready(out)
    assert out.shape == (B, 1, H, W)
    assert bool(jnp.all(jnp.isfinite(out)))
    print("KERNEL_OK")
</pallas_src>

<mosaic_0001>
module attributes {stable_mosaic.version = 11 : i64} {
  func.func @object_attention_kernel(%arg0: i32, %arg1: memref<1x512xf32, #tpu.memory_space<vmem>>, %arg2: memref<16x512xf32, #tpu.memory_space<vmem>>, %arg3: memref<16x9xf32, #tpu.memory_space<vmem>>, %arg4: memref<16x1xf32, #tpu.memory_space<vmem>>, %arg5: memref<8x16xbf16, #tpu.memory_space<vmem>>, %arg6: memref<8x1xf32, #tpu.memory_space<vmem>>, %arg7: memref<4x8x9xf32, #tpu.memory_space<vmem>>, %arg8: memref<4x8x1xf32, #tpu.memory_space<vmem>>, %arg9: memref<4x2x8xbf16, #tpu.memory_space<vmem>>, %arg10: memref<4x2x1xf32, #tpu.memory_space<vmem>>, %arg11: memref<8x1xf32, #tpu.memory_space<vmem>>, %arg12: memref<4x2x1xf32, #tpu.memory_space<vmem>>, %arg13: memref<1x1xf32, #tpu.memory_space<vmem>>, %arg14: memref<1x512xf32, #tpu.memory_space<vmem>>) attributes {dimension_semantics = [#tpu.dimension_semantics<parallel>], iteration_bounds = array<i64: 1>, scalar_prefetch = 0 : i64, scratch_operands = 0 : i64, tpu.core_type = #tpu.core_type<tc>, window_params = [{transform_indices = @transform_0, window_bounds = array<i64: 1, 512>}, {transform_indices = @transform_1, window_bounds = array<i64: 16, 512>}, {pipeline_mode = #tpu.pipeline_mode<synchronous>, transform_indices = @transform_2, window_bounds = array<i64: 16, 9>}, {pipeline_mode = #tpu.pipeline_mode<synchronous>, transform_indices = @transform_3, window_bounds = array<i64: 16, 1>}, {pipeline_mode = #tpu.pipeline_mode<synchronous>, transform_indices = @transform_4, window_bounds = array<i64: 8, 16>}, {pipeline_mode = #tpu.pipeline_mode<synchronous>, transform_indices = @transform_5, window_bounds = array<i64: 8, 1>}, {pipeline_mode = #tpu.pipeline_mode<synchronous>, transform_indices = @transform_6, window_bounds = array<i64: 4, 8, 9>}, {pipeline_mode = #tpu.pipeline_mode<synchronous>, transform_indices = @transform_7, window_bounds = array<i64: 4, 8, 1>}, {pipeline_mode = #tpu.pipeline_mode<synchronous>, transform_indices = @transform_8, window_bounds = array<i64: 4, 2, 8>}, {pipeline_mode = #tpu.pipeline_mode<synchronous>, transform_indices = @transform_9, window_bounds = array<i64: 4, 2, 1>}, {pipeline_mode = #tpu.pipeline_mode<synchronous>, transform_indices = @transform_10, window_bounds = array<i64: 8, 1>}, {pipeline_mode = #tpu.pipeline_mode<synchronous>, transform_indices = @transform_11, window_bounds = array<i64: 4, 2, 1>}, {pipeline_mode = #tpu.pipeline_mode<synchronous>, transform_indices = @transform_12, window_bounds = array<i64: 1, 1>}, {transform_indices = @transform_13, window_bounds = array<i64: 1, 512>}]} {
    %c0 = arith.constant 0 : index
    %c0_0 = arith.constant 0 : index
    %0 = vector.load %arg1[%c0, %c0_0] : memref<1x512xf32, #tpu.memory_space<vmem>>, vector<1x512xf32>
    %c0_1 = arith.constant 0 : index
    %c0_2 = arith.constant 0 : index
    %1 = vector.load %arg2[%c0_1, %c0_2] : memref<16x512xf32, #tpu.memory_space<vmem>>, vector<16x512xf32>
    %cst = arith.constant 0.000000e+00 : f32
    %2 = vector.broadcast %cst : f32 to vector<1x512xf32>
    %3 = arith.subf %2, %0 : vector<1x512xf32>
    %4 = math.exp %3 : vector<1x512xf32>
    %cst_3 = arith.constant 1.000000e+00 : f32
    %5 = vector.broadcast %cst_3 : f32 to vector<1x512xf32>
    %6 = arith.addf %5, %4 : vector<1x512xf32>
    %cst_4 = arith.constant 1.000000e+00 : f32
    %7 = vector.broadcast %cst_4 : f32 to vector<1x512xf32>
    %8 = arith.divf %7, %6 : vector<1x512xf32>
    %cst_5 = arith.constant 1.000000e+00 : f32
    %9 = vector.broadcast %cst_5 : f32 to vector<1x512xf32>
    %10 = arith.subf %9, %8 : vector<1x512xf32>
    %cst_6 = arith.constant 9.300000e-01 : f32
    %11 = vector.broadcast %cst_6 : f32 to vector<1x512xf32>
    %12 = arith.cmpf ogt, %10, %11 : vector<1x512xf32>
    %cst_7 = arith.constant 0.000000e+00 : f32
    %13 = vector.broadcast %cst_7 : f32 to vector<1x512xf32>
    %14 = arith.select %12, %13, %10 : vector<1x512xi1>, vector<1x512xf32>
    %15 = arith.addf %8, %14 : vector<1x512xf32>
    %16 = vector.broadcast %15 : vector<1x512xf32> to vector<16x512xf32>
    %17 = arith.mulf %16, %1 : vector<16x512xf32>
    %18 = tpu.iota {dimensions = array<i32: 1>} : vector<1x512xi32>
    %c256_i32 = arith.constant 256 : i32
    %c0_i32 = arith.constant 0 : i32
    %19 = arith.cmpi eq, %c256_i32, %c0_i32 : i32
    %c1_i32 = arith.constant 1 : i32
    %20 = arith.select %19, %c1_i32, %c256_i32 : i32
    %21 = vector.broadcast %20 : i32 to vector<1x512xi32>
    %22 = arith.remsi %18, %21 : vector<1x512xi32>
    %c0_i32_8 = arith.constant 0 : i32
    %23 = vector.broadcast %c0_i32_8 : i32 to vector<1x512xi32>
    %24 = arith.cmpi ne, %22, %23 : vector<1x512xi32>
    %c0_i32_9 = arith.constant 0 : i32
    %25 = vector.broadcast %c0_i32_9 : i32 to vector<1x512xi32>
    %26 = arith.cmpi slt, %22, %25 : vector<1x512xi32>
    %c0_i32_10 = arith.constant 0 : i32
    %27 = arith.cmpi slt, %20, %c0_i32_10 : i32
    %28 = vector.broadcast %27 : i1 to vector<1x512xi1>
    %29 = vector.broadcast %28 : vector<1x512xi1> to vector<1x512xi1>
    %30 = arith.xori %26, %29 : vector<1x512xi1>
    %31 = arith.andi %30, %24 : vector<1x512xi1>
    %32 = vector.broadcast %20 : i32 to vector<1x512xi32>
    %33 = arith.addi %22, %32 : vector<1x512xi32>
    %34 = arith.select %31, %33, %22 : vector<1x512xi1>, vector<1x512xi32>
    %c16_i32 = arith.constant 16 : i32
    %c0_i32_11 = arith.constant 0 : i32
    %35 = arith.cmpi eq, %c16_i32, %c0_i32_11 : i32
    %c1_i32_12 = arith.constant 1 : i32
    %36 = arith.select %35, %c1_i32_12, %c16_i32 : i32
    %37 = vector.broadcast %36 : i32 to vector<1x512xi32>
    %38 = arith.remsi %34, %37 : vector<1x512xi32>
    %c0_i32_13 = arith.constant 0 : i32
    %39 = vector.broadcast %c0_i32_13 : i32 to vector<1x512xi32>
    %40 = arith.cmpi ne, %38, %39 : vector<1x512xi32>
    %c0_i32_14 = arith.constant 0 : i32
    %41 = vector.broadcast %c0_i32_14 : i32 to vector<1x512xi32>
    %42 = arith.cmpi slt, %38, %41 : vector<1x512xi32>
    %c0_i32_15 = arith.constant 0 : i32
    %43 = arith.cmpi slt, %36, %c0_i32_15 : i32
    %44 = vector.broadcast %43 : i1 to vector<1x512xi1>
    %45 = vector.broadcast %44 : vector<1x512xi1> to vector<1x512xi1>
    %46 = arith.xori %42, %45 : vector<1x512xi1>
    %47 = arith.andi %46, %40 : vector<1x512xi1>
    %48 = vector.broadcast %36 : i32 to vector<1x512xi32>
    %49 = arith.addi %38, %48 : vector<1x512xi32>
    %50 = arith.select %47, %49, %38 : vector<1x512xi1>, vector<1x512xi32>
    %c16_i32_16 = arith.constant 16 : i32
    %51 = vector.broadcast %c16_i32_16 : i32 to vector<1x512xi32>
    %52 = arith.cmpi sge, %34, %51 : vector<1x512xi32>
    %c240_i32 = arith.constant 240 : i32
    %53 = vector.broadcast %c240_i32 : i32 to vector<1x512xi32>
    %54 = arith.cmpi slt, %34, %53 : vector<1x512xi32>
    %c1_i32_17 = arith.constant 1 : i32
    %55 = vector.broadcast %c1_i32_17 : i32 to vector<1x512xi32>
    %56 = arith.cmpi sge, %50, %55 : vector<1x512xi32>
    %c15_i32 = arith.constant 15 : i32
    %57 = vector.broadcast %c15_i32 : i32 to vector<1x512xi32>
    %58 = arith.cmpi slt, %50, %57 : vector<1x512xi32>
    %59 = arith.andi %52, %56 : vector<1x512xi1>
    %60 = arith.andi %52, %58 : vector<1x512xi1>
    %61 = arith.andi %54, %56 : vector<1x512xi1>
    %62 = arith.andi %54, %58 : vector<1x512xi1>
    %c48_i32 = arith.constant 48 : i32
    %63 = vector.broadcast %c48_i32 : i32 to vector<1x512xi32>
    %64 = arith.cmpi sge, %34, %63 : vector<1x512xi32>
    %c208_i32 = arith.constant 208 : i32
    %65 = vector.broadcast %c208_i32 : i32 to vector<1x512xi32>
    %66 = arith.cmpi slt, %34, %65 : vector<1x512xi32>
    %c3_i32 = arith.constant 3 : i32
    %67 = vector.broadcast %c3_i32 : i32 to vector<1x512xi32>
    %68 = arith.cmpi sge, %50, %67 : vector<1x512xi32>
    %c13_i32 = arith.constant 13 : i32
    %69 = vector.broadcast %c13_i32 : i32 to vector<1x512xi32>
    %70 = arith.cmpi slt, %50, %69 : vector<1x512xi32>
    %71 = arith.andi %64, %68 : vector<1x512xi1>
    %72 = arith.andi %64, %70 : vector<1x512xi1>
    %73 = arith.andi %66, %68 : vector<1x512xi1>
    %74 = arith.andi %66, %70 : vector<1x512xi1>
    %c80_i32 = arith.constant 80 : i32
    %75 = vector.broadcast %c80_i32 : i32 to vector<1x512xi32>
    %76 = arith.cmpi sge, %34, %75 : vector<1x512xi32>
    %c176_i32 = arith.constant 176 : i32
    %77 = vector.broadcast %c176_i32 : i32 to vector<1x512xi32>
    %78 = arith.cmpi slt, %34, %77 : vector<1x512xi32>
    %c5_i32 = arith.constant 5 : i32
    %79 = vector.broadcast %c5_i32 : i32 to vector<1x512xi32>
    %80 = arith.cmpi sge, %50, %79 : vector<1x512xi32>
    %c11_i32 = arith.constant 11 : i32
    %81 = vector.broadcast %c11_i32 : i32 to vector<1x512xi32>
    %82 = arith.cmpi slt, %50, %81 : vector<1x512xi32>
    %83 = arith.andi %76, %80 : vector<1x512xi1>
    %84 = arith.andi %76, %82 : vector<1x512xi1>
    %85 = arith.andi %78, %80 : vector<1x512xi1>
    %86 = arith.andi %78, %82 : vector<1x512xi1>
    %c0_18 = arith.constant 0 : index
    %c0_19 = arith.constant 0 : index
    %87 = vector.load %arg3[%c0_18, %c0_19] : memref<16x9xf32, #tpu.memory_space<vmem>>, vector<16x9xf32>
    %c0_20 = arith.constant 0 : index
    %c0_21 = arith.constant 0 : index
    %88 = vector.load %arg4[%c0_20, %c0_21] : memref<16x1xf32, #tpu.memory_space<vmem>>, vector<16x1xf32>
    %c16_i32_22 = arith.constant 16 : i32
    %89 = tpu.dynamic_rotate %17 by %c16_i32_22 dim 1 : vector<16x512xf32>, i32 -> vector<16x512xf32>
    %c496_i32 = arith.constant 496 : i32
    %90 = tpu.dynamic_rotate %17 by %c496_i32 dim 1 : vector<16x512xf32>, i32 -> vector<16x512xf32>
    %91 = vector.extract_strided_slice %87 {offsets = [0, 4], sizes = [16, 1], strides = [1, 1]} : vector<16x9xf32> to vector<16x1xf32>
    %92 = vector.broadcast %91 : vector<16x1xf32> to vector<16x512xf32>
    %93 = arith.mulf %17, %92 : vector<16x512xf32>
    %c1_i32_23 = arith.constant 1 : i32
    %94 = tpu.dynamic_rotate %89 by %c1_i32_23 dim 1 : vector<16x512xf32>, i32 -> vector<16x512xf32>
    %cst_24 = arith.constant 0.000000e+00 : f32
    %95 = vector.shape_cast %59 : vector<1x512xi1> to vector<1x512xi1>
    %96 = vector.broadcast %95 : vector<1x512xi1> to vector<16x512xi1>
    %97 = vector.broadcast %cst_24 : f32 to vector<16x512xf32>
    %98 = arith.select %96, %94, %97 : vector<16x512xi1>, vector<16x512xf32>
    %99 = vector.extract_strided_slice %87 {offsets = [0, 0], sizes = [16, 1], strides = [1, 1]} : vector<16x9xf32> to vector<16x1xf32>
    %100 = vector.broadcast %99 : vector<16x1xf32> to vector<16x512xf32>
    %101 = arith.mulf %98, %100 : vector<16x512xf32>
    %102 = arith.addf %93, %101 : vector<16x512xf32>
    %cst_25 = arith.constant 0.000000e+00 : f32
    %103 = vector.shape_cast %52 : vector<1x512xi1> to vector<1x512xi1>
    %104 = vector.broadcast %103 : vector<1x512xi1> to vector<16x512xi1>
    %105 = vector.broadcast %cst_25 : f32 to vector<16x512xf32>
    %106 = arith.select %104, %89, %105 : vector<16x512xi1>, vector<16x512xf32>
    %107 = vector.extract_strided_slice %87 {offsets = [0, 1], sizes = [16, 1], strides = [1, 1]} : vector<16x9xf32> to vector<16x1xf32>
    %108 = vector.broadcast %107 : vector<16x1xf32> to vector<16x512xf32>
    %109 = arith.mulf %106, %108 : vector<16x512xf32>
    %110 = arith.addf %102, %109 : vector<16x512xf32>
    %c511_i32 = arith.constant 511 : i32
    %111 = tpu.dynamic_rotate %89 by %c511_i32 dim 1 : vector<16x512xf32>, i32 -> vector<16x512xf32>
    %cst_26 = arith.constant 0.000000e+00 : f32
    %112 = vector.shape_cast %60 : vector<1x512xi1> to vector<1x512xi1>
    %113 = vector.broadcast %112 : vector<1x512xi1> to vector<16x512xi1>
    %114 = vector.broadcast %cst_26 : f32 to vector<16x512xf32>
    %115 = arith.select %113, %111, %114 : vector<16x512xi1>, vector<16x512xf32>
    %116 = vector.extract_strided_slice %87 {offsets = [0, 2], sizes = [16, 1], strides = [1, 1]} : vector<16x9xf32> to vector<16x1xf32>
    %117 = vector.broadcast %116 : vector<16x1xf32> to vector<16x512xf32>
    %118 = arith.mulf %115, %117 : vector<16x512xf32>
    %119 = arith.addf %110, %118 : vector<16x512xf32>
    %c1_i32_27 = arith.constant 1 : i32
    %120 = tpu.dynamic_rotate %17 by %c1_i32_27 dim 1 : vector<16x512xf32>, i32 -> vector<16x512xf32>
    %cst_28 = arith.constant 0.000000e+00 : f32
    %121 = vector.shape_cast %56 : vector<1x512xi1> to vector<1x512xi1>
    %122 = vector.broadcast %121 : vector<1x512xi1> to vector<16x512xi1>
    %123 = vector.broadcast %cst_28 : f32 to vector<16x512xf32>
    %124 = arith.select %122, %120, %123 : vector<16x512xi1>, vector<16x512xf32>
    %125 = vector.extract_strided_slice %87 {offsets = [0, 3], sizes = [16, 1], strides = [1, 1]} : vector<16x9xf32> to vector<16x1xf32>
    %126 = vector.broadcast %125 : vector<16x1xf32> to vector<16x512xf32>
    %127 = arith.mulf %124, %126 : vector<16x512xf32>
    %128 = arith.addf %119, %127 : vector<16x512xf32>
    %c511_i32_29 = arith.constant 511 : i32
    %129 = tpu.dynamic_rotate %17 by %c511_i32_29 dim 1 : vector<16x512xf32>, i32 -> vector<16x512xf32>
    %cst_30 = arith.constant 0.000000e+00 : f32
    %130 = vector.shape_cast %58 : vector<1x512xi1> to vector<1x512xi1>
    %131 = vector.broadcast %130 : vector<1x512xi1> to vector<16x512xi1>
    %132 = vector.broadcast %cst_30 : f32 to vector<16x512xf32>
    %133 = arith.select %131, %129, %132 : vector<16x512xi1>, vector<16x512xf32>
    %134 = vector.extract_strided_slice %87 {offsets = [0, 5], sizes = [16, 1], strides = [1, 1]} : vector<16x9xf32> to vector<16x1xf32>
    %135 = vector.broadcast %134 : vector<16x1xf32> to vector<16x512xf32>
    %136 = arith.mulf %133, %135 : vector<16x512xf32>
    %137 = arith.addf %128, %136 : vector<16x512xf32>
    %c1_i32_31 = arith.constant 1 : i32
    %138 = tpu.dynamic_rotate %90 by %c1_i32_31 dim 1 : vector<16x512xf32>, i32 -> vector<16x512xf32>
    %cst_32 = arith.constant 0.000000e+00 : f32
    %139 = vector.shape_cast %61 : vector<1x512xi1> to vector<1x512xi1>
    %140 = vector.broadcast %139 : vector<1x512xi1> to vector<16x512xi1>
    %141 = vector.broadcast %cst_32 : f32 to vector<16x512xf32>
    %142 = arith.select %140, %138, %141 : vector<16x512xi1>, vector<16x512xf32>
    %143 = vector.extract_strided_slice %87 {offsets = [0, 6], sizes = [16, 1], strides = [1, 1]} : vector<16x9xf32> to vector<16x1xf32>
    %144 = vector.broadcast %143 : vector<16x1xf32> to vector<16x512xf32>
    %145 = arith.mulf %142, %144 : vector<16x512xf32>
    %146 = arith.addf %137, %145 : vector<16x512xf32>
    %cst_33 = arith.constant 0.000000e+00 : f32
    %147 = vector.shape_cast %54 : vector<1x512xi1> to vector<1x512xi1>
    %148 = vector.broadcast %147 : vector<1x512xi1> to vector<16x512xi1>
    %149 = vector.broadcast %cst_33 : f32 to vector<16x512xf32>
    %150 = arith.select %148, %90, %149 : vector<16x512xi1>, vector<16x512xf32>
    %151 = vector.extract_strided_slice %87 {offsets = [0, 7], sizes = [16, 1], strides = [1, 1]} : vector<16x9xf32> to vector<16x1xf32>
    %152 = vector.broadcast %151 : vector<16x1xf32> to vector<16x512xf32>
    %153 = arith.mulf %150, %152 : vector<16x512xf32>
    %154 = arith.addf %146, %153 : vector<16x512xf32>
    %c511_i32_34 = arith.constant 511 : i32
    %155 = tpu.dynamic_rotate %90 by %c511_i32_34 dim 1 : vector<16x512xf32>, i32 -> vector<16x512xf32>
    %cst_35 = arith.constant 0.000000e+00 : f32
    %156 = vector.shape_cast %62 : vector<1x512xi1> to vector<1x512xi1>
    %157 = vector.broadcast %156 : vector<1x512xi1> to vector<16x512xi1>
    %158 = vector.broadcast %cst_35 : f32 to vector<16x512xf32>
    %159 = arith.select %157, %155, %158 : vector<16x512xi1>, vector<16x512xf32>
    %160 = vector.extract_strided_slice %87 {offsets = [0, 8], sizes = [16, 1], strides = [1, 1]} : vector<16x9xf32> to vector<16x1xf32>
    %161 = vector.broadcast %160 : vector<16x1xf32> to vector<16x512xf32>
    %162 = arith.mulf %159, %161 : vector<16x512xf32>
    %163 = arith.addf %154, %162 : vector<16x512xf32>
    %164 = vector.broadcast %88 : vector<16x1xf32> to vector<16x512xf32>
    %165 = arith.addf %163, %164 : vector<16x512xf32>
    %cst_36 = arith.constant 0.000000e+00 : f32
    %166 = vector.broadcast %cst_36 : f32 to vector<16x512xf32>
    %167 = arith.cmpf ogt, %165, %166 : vector<16x512xf32>
    %cst_37 = arith.constant 0.000000e+00 : f32
    %168 = vector.broadcast %cst_37 : f32 to vector<16x512xf32>
    %169 = arith.minimumf %165, %168 : vector<16x512xf32>
    %170 = math.exp %169 : vector<16x512xf32>
    %cst_38 = arith.constant 1.000000e+00 : f32
    %171 = vector.broadcast %cst_38 : f32 to vector<16x512xf32>
    %172 = arith.subf %170, %171 : vector<16x512xf32>
    %cst_39 = arith.constant 1.67326319 : f32
    %173 = vector.broadcast %cst_39 : f32 to vector<16x512xf32>
    %174 = arith.mulf %173, %172 : vector<16x512xf32>
    %175 = arith.select %167, %165, %174 : vector<16x512xi1>, vector<16x512xf32>
    %cst_40 = arith.constant 1.05070102 : f32
    %176 = vector.broadcast %cst_40 : f32 to vector<16x512xf32>
    %177 = arith.mulf %176, %175 : vector<16x512xf32>
    %c0_41 = arith.constant 0 : index
    %c0_42 = arith.constant 0 : index
    %178 = vector.load %arg5[%c0_41, %c0_42] : memref<8x16xbf16, #tpu.memory_space<vmem>>, vector<8x16xbf16>
    %c0_43 = arith.constant 0 : index
    %c0_44 = arith.constant 0 : index
    %179 = vector.load %arg6[%c0_43, %c0_44] : memref<8x1xf32, #tpu.memory_space<vmem>>, vector<8x1xf32>
    %180 = arith.truncf %177 : vector<16x512xf32> to vector<16x512xbf16>
    %cst_45 = arith.constant dense<0.000000e+00> : vector<8x512xf32>
    %181 = tpu.matmul %178, %180, %cst_45 {dimension_numbers = #tpu.dot_dimension_numbers<[1], [0], [0], [1], [0, 0, 1, 1], [], []>} : vector<8x16xbf16>, vector<16x512xbf16>, vector<8x512xf32> -> vector<8x512xf32>
    %182 = vector.broadcast %179 : vector<8x1xf32> to vector<8x512xf32>
    %183 = arith.addf %181, %182 : vector<8x512xf32>
    %cst_46 = arith.constant 0.000000e+00 : f32
    %184 = vector.broadcast %cst_46 : f32 to vector<8x512xf32>
    %185 = arith.cmpf ogt, %183, %184 : vector<8x512xf32>
    %cst_47 = arith.constant 0.000000e+00 : f32
    %186 = vector.broadcast %cst_47 : f32 to vector<8x512xf32>
    %187 = arith.minimumf %183, %186 : vector<8x512xf32>
    %188 = math.exp %187 : vector<8x512xf32>
    %cst_48 = arith.constant 1.000000e+00 : f32
    %189 = vector.broadcast %cst_48 : f32 to vector<8x512xf32>
    %190 = arith.subf %188, %189 : vector<8x512xf32>
    %cst_49 = arith.constant 1.67326319 : f32
    %191 = vector.broadcast %cst_49 : f32 to vector<8x512xf32>
    %192 = arith.mulf %191, %190 : vector<8x512xf32>
    %193 = arith.select %185, %183, %192 : vector<8x512xi1>, vector<8x512xf32>
    %cst_50 = arith.constant 1.05070102 : f32
    %194 = vector.broadcast %cst_50 : f32 to vector<8x512xf32>
    %195 = arith.mulf %194, %193 : vector<8x512xf32>
    %c0_51 = arith.constant 0 : index
    %c0_52 = arith.constant 0 : index
    %196 = vector.load %arg11[%c0_51, %c0_52] : memref<8x1xf32, #tpu.memory_space<vmem>>, vector<8x1xf32>
    %197 = vector.broadcast %196 : vector<8x1xf32> to vector<8x512xf32>
    %198 = arith.mulf %197, %195 : vector<8x512xf32>
    %cst_53 = arith.constant dense<0.000000e+00> : vector<512xf32>
    %199 = vector.multi_reduction <add>, %198, %cst_53 [0] : vector<8x512xf32> to vector<512xf32>
    %200 = vector.shape_cast %199 : vector<512xf32> to vector<1x512xf32>
    %c0_54 = arith.constant 0 : index
    %c0_55 = arith.constant 0 : index
    %c0_56 = arith.constant 0 : index
    %201 = vector.load %arg7[%c0_54, %c0_55, %c0_56] : memref<4x8x9xf32, #tpu.memory_space<vmem>>, vector<1x8x9xf32>
    %202 = vector.shape_cast %201 : vector<1x8x9xf32> to vector<8x9xf32>
    %c0_57 = arith.constant 0 : index
    %c0_58 = arith.constant 0 : index
    %c0_59 = arith.constant 0 : index
    %203 = vector.load %arg8[%c0_57, %c0_58, %c0_59] : memref<4x8x1xf32, #tpu.memory_space<vmem>>, vector<1x8x1xf32>
    %204 = vector.shape_cast %203 : vector<1x8x1xf32> to vector<8x1xf32>
    %205 = vector.extract_strided_slice %202 {offsets = [0, 4], sizes = [8, 1], strides = [1, 1]} : vector<8x9xf32> to vector<8x1xf32>
    %206 = vector.broadcast %205 : vector<8x1xf32> to vector<8x512xf32>
    %207 = arith.mulf %195, %206 : vector<8x512xf32>
    %208 = vector.broadcast %204 : vector<8x1xf32> to vector<8x512xf32>
    %209 = arith.addf %207, %208 : vector<8x512xf32>
    %cst_60 = arith.constant 0.000000e+00 : f32
    %210 = vector.broadcast %cst_60 : f32 to vector<8x512xf32>
    %211 = arith.cmpf ogt, %209, %210 : vector<8x512xf32>
    %cst_61 = arith.constant 0.000000e+00 : f32
    %212 = vector.broadcast %cst_61 : f32 to vector<8x512xf32>
    %213 = arith.minimumf %209, %212 : vector<8x512xf32>
    %214 = math.exp %213 : vector<8x512xf32>
    %cst_62 = arith.constant 1.000000e+00 : f32
    %215 = vector.broadcast %cst_62 : f32 to vector<8x512xf32>
    %216 = arith.subf %214, %215 : vector<8x512xf32>
    %cst_63 = arith.constant 1.67326319 : f32
    %217 = vector.broadcast %cst_63 : f32 to vector<8x512xf32>
    %218 = arith.mulf %217, %216 : vector<8x512xf32>
    %219 = arith.select %211, %209, %218 : vector<8x512xi1>, vector<8x512xf32>
    %cst_64 = arith.constant 1.05070102 : f32
    %220 = vector.broadcast %cst_64 : f32 to vector<8x512xf32>
    %221 = arith.mulf %220, %219 : vector<8x512xf32>
    %c0_65 = arith.constant 0 : index
    %c0_66 = arith.constant 0 : index
    %c0_67 = arith.constant 0 : index
    %222 = vector.load %arg9[%c0_65, %c0_66, %c0_67] : memref<4x2x8xbf16, #tpu.memory_space<vmem>>, vector<1x2x8xbf16>
    %223 = vector.shape_cast %222 : vector<1x2x8xbf16> to vector<2x8xbf16>
    %c0_68 = arith.constant 0 : index
    %c0_69 = arith.constant 0 : index
    %c0_70 = arith.constant 0 : index
    %224 = vector.load %arg10[%c0_68, %c0_69, %c0_70] : memref<4x2x1xf32, #tpu.memory_space<vmem>>, vector<1x2x1xf32>
    %225 = vector.shape_cast %224 : vector<1x2x1xf32> to vector<2x1xf32>
    %226 = arith.truncf %221 : vector<8x512xf32> to vector<8x512xbf16>
    %cst_71 = arith.constant dense<0.000000e+00> : vector<2x512xf32>
    %227 = tpu.matmul %223, %226, %cst_71 {dimension_numbers = #tpu.dot_dimension_numbers<[1], [0], [0], [1], [0, 0, 1, 1], [], []>} : vector<2x8xbf16>, vector<8x512xbf16>, vector<2x512xf32> -> vector<2x512xf32>
    %228 = vector.broadcast %225 : vector<2x1xf32> to vector<2x512xf32>
    %229 = arith.addf %227, %228 : vector<2x512xf32>
    %cst_72 = arith.constant 0.000000e+00 : f32
    %230 = vector.broadcast %cst_72 : f32 to vector<2x512xf32>
    %231 = arith.cmpf ogt, %229, %230 : vector<2x512xf32>
    %cst_73 = arith.constant 0.000000e+00 : f32
    %232 = vector.broadcast %cst_73 : f32 to vector<2x512xf32>
    %233 = arith.minimumf %229, %232 : vector<2x512xf32>
    %234 = math.exp %233 : vector<2x512xf32>
    %cst_74 = arith.constant 1.000000e+00 : f32
    %235 = vector.broadcast %cst_74 : f32 to vector<2x512xf32>
    %236 = arith.subf %234, %235 : vector<2x512xf32>
    %cst_75 = arith.constant 1.67326319 : f32
    %237 = vector.broadcast %cst_75 : f32 to vector<2x512xf32>
    %238 = arith.mulf %237, %236 : vector<2x512xf32>
    %239 = arith.select %231, %229, %238 : vector<2x512xi1>, vector<2x512xf32>
    %cst_76 = arith.constant 1.05070102 : f32
    %240 = vector.broadcast %cst_76 : f32 to vector<2x512xf32>
    %241 = arith.mulf %240, %239 : vector<2x512xf32>
    %c0_77 = arith.constant 0 : index
    %c0_78 = arith.constant 0 : index
    %c0_79 = arith.constant 0 : index
    %242 = vector.load %arg12[%c0_77, %c0_78, %c0_79] : memref<4x2x1xf32, #tpu.memory_space<vmem>>, vector<1x2x1xf32>
    %243 = vector.shape_cast %242 : vector<1x2x1xf32> to vector<2x1xf32>
    %244 = vector.broadcast %243 : vector<2x1xf32> to vector<2x512xf32>
    %245 = arith.mulf %244, %241 : vector<2x512xf32>
    %cst_80 = arith.constant dense<0.000000e+00> : vector<512xf32>
    %246 = vector.multi_reduction <add>, %245, %cst_80 [0] : vector<2x512xf32> to vector<512xf32>
    %247 = vector.shape_cast %246 : vector<512xf32> to vector<1x512xf32>
    %248 = arith.addf %200, %247 : vector<1x512xf32>
    %c1 = arith.constant 1 : index
    %c0_81 = arith.constant 0 : index
    %c0_82 = arith.constant 0 : index
    %249 = vector.load %arg7[%c1, %c0_81, %c0_82] : memref<4x8x9xf32, #tpu.memory_space<vmem>>, vector<1x8x9xf32>
    %250 = vector.shape_cast %249 : vector<1x8x9xf32> to vector<8x9xf32>
    %c1_83 = arith.constant 1 : index
    %c0_84 = arith.constant 0 : index
    %c0_85 = arith.constant 0 : index
    %251 = vector.load %arg8[%c1_83, %c0_84, %c0_85] : memref<4x8x1xf32, #tpu.memory_space<vmem>>, vector<1x8x1xf32>
    %252 = vector.shape_cast %251 : vector<1x8x1xf32> to vector<8x1xf32>
    %c16_i32_86 = arith.constant 16 : i32
    %253 = tpu.dynamic_rotate %195 by %c16_i32_86 dim 1 : vector<8x512xf32>, i32 -> vector<8x512xf32>
    %c496_i32_87 = arith.constant 496 : i32
    %254 = tpu.dynamic_rotate %195 by %c496_i32_87 dim 1 : vector<8x512xf32>, i32 -> vector<8x512xf32>
    %255 = vector.extract_strided_slice %250 {offsets = [0, 4], sizes = [8, 1], strides = [1, 1]} : vector<8x9xf32> to vector<8x1xf32>
    %256 = vector.broadcast %255 : vector<8x1xf32> to vector<8x512xf32>
    %257 = arith.mulf %195, %256 : vector<8x512xf32>
    %c1_i32_88 = arith.constant 1 : i32
    %258 = tpu.dynamic_rotate %253 by %c1_i32_88 dim 1 : vector<8x512xf32>, i32 -> vector<8x512xf32>
    %cst_89 = arith.constant 0.000000e+00 : f32
    %259 = vector.shape_cast %59 : vector<1x512xi1> to vector<1x512xi1>
    %260 = vector.broadcast %259 : vector<1x512xi1> to vector<8x512xi1>
    %261 = vector.broadcast %cst_89 : f32 to vector<8x512xf32>
    %262 = arith.select %260, %258, %261 : vector<8x512xi1>, vector<8x512xf32>
    %263 = vector.extract_strided_slice %250 {offsets = [0, 0], sizes = [8, 1], strides = [1, 1]} : vector<8x9xf32> to vector<8x1xf32>
    %264 = vector.broadcast %263 : vector<8x1xf32> to vector<8x512xf32>
    %265 = arith.mulf %262, %264 : vector<8x512xf32>
    %266 = arith.addf %257, %265 : vector<8x512xf32>
    %cst_90 = arith.constant 0.000000e+00 : f32
    %267 = vector.shape_cast %52 : vector<1x512xi1> to vector<1x512xi1>
    %268 = vector.broadcast %267 : vector<1x512xi1> to vector<8x512xi1>
    %269 = vector.broadcast %cst_90 : f32 to vector<8x512xf32>
    %270 = arith.select %268, %253, %269 : vector<8x512xi1>, vector<8x512xf32>
    %271 = vector.extract_strided_slice %250 {offsets = [0, 1], sizes = [8, 1], strides = [1, 1]} : vector<8x9xf32> to vector<8x1xf32>
    %272 = vector.broadcast %271 : vector<8x1xf32> to vector<8x512xf32>
    %273 = arith.mulf %270, %272 : vector<8x512xf32>
    %274 = arith.addf %266, %273 : vector<8x512xf32>
    %c511_i32_91 = arith.constant 511 : i32
    %275 = tpu.dynamic_rotate %253 by %c511_i32_91 dim 1 : vector<8x512xf32>, i32 -> vector<8x512xf32>
    %cst_92 = arith.constant 0.000000e+00 : f32
    %276 = vector.shape_cast %60 : vector<1x512xi1> to vector<1x512xi1>
    %277 = vector.broadcast %276 : vector<1x512xi1> to vector<8x512xi1>
    %278 = vector.broadcast %cst_92 : f32 to vector<8x512xf32>
    %279 = arith.select %277, %275, %278 : vector<8x512xi1>, vector<8x512xf32>
    %280 = vector.extract_strided_slice %250 {offsets = [0, 2], sizes = [8, 1], strides = [1, 1]} : vector<8x9xf32> to vector<8x1xf32>
    %281 = vector.broadcast %280 : vector<8x1xf32> to vector<8x512xf32>
    %282 = arith.mulf %279, %281 : vector<8x512xf32>
    %283 = arith.addf %274, %282 : vector<8x512xf32>
    %c1_i32_93 = arith.constant 1 : i32
    %284 = tpu.dynamic_rotate %195 by %c1_i32_93 dim 1 : vector<8x512xf32>, i32 -> vector<8x512xf32>
    %cst_94 = arith.constant 0.000000e+00 : f32
    %285 = vector.shape_cast %56 : vector<1x512xi1> to vector<1x512xi1>
    %286 = vector.broadcast %285 : vector<1x512xi1> to vector<8x512xi1>
    %287 = vector.broadcast %cst_94 : f32 to vector<8x512xf32>
    %288 = arith.select %286, %284, %287 : vector<8x512xi1>, vector<8x512xf32>
    %289 = vector.extract_strided_slice %250 {offsets = [0, 3], sizes = [8, 1], strides = [1, 1]} : vector<8x9xf32> to vector<8x1xf32>
    %290 = vector.broadcast %289 : vector<8x1xf32> to vector<8x512xf32>
    %291 = arith.mulf %288, %290 : vector<8x512xf32>
    %292 = arith.addf %283, %291 : vector<8x512xf32>
    %c511_i32_95 = arith.constant 511 : i32
    %293 = tpu.dynamic_rotate %195 by %c511_i32_95 dim 1 : vector<8x512xf32>, i32 -> vector<8x512xf32>
    %cst_96 = arith.constant 0.000000e+00 : f32
    %294 = vector.shape_cast %58 : vector<1x512xi1> to vector<1x512xi1>
    %295 = vector.broadcast %294 : vector<1x512xi1> to vector<8x512xi1>
    %296 = vector.broadcast %cst_96 : f32 to vector<8x512xf32>
    %297 = arith.select %295, %293, %296 : vector<8x512xi1>, vector<8x512xf32>
    %298 = vector.extract_strided_slice %250 {offsets = [0, 5], sizes = [8, 1], strides = [1, 1]} : vector<8x9xf32> to vector<8x1xf32>
    %299 = vector.broadcast %298 : vector<8x1xf32> to vector<8x512xf32>
    %300 = arith.mulf %297, %299 : vector<8x512xf32>
    %301 = arith.addf %292, %300 : vector<8x512xf32>
    %c1_i32_97 = arith.constant 1 : i32
    %302 = tpu.dynamic_rotate %254 by %c1_i32_97 dim 1 : vector<8x512xf32>, i32 -> vector<8x512xf32>
    %cst_98 = arith.constant 0.000000e+00 : f32
    %303 = vector.shape_cast %61 : vector<1x512xi1> to vector<1x512xi1>
    %304 = vector.broadcast %303 : vector<1x512xi1> to vector<8x512xi1>
    %305 = vector.broadcast %cst_98 : f32 to vector<8x512xf32>
    %306 = arith.select %304, %302, %305 : vector<8x512xi1>, vector<8x512xf32>
    %307 = vector.extract_strided_slice %250 {offsets = [0, 6], sizes = [8, 1], strides = [1, 1]} : vector<8x9xf32> to vector<8x1xf32>
    %308 = vector.broadcast %307 : vector<8x1xf32> to vector<8x512xf32>
    %309 = arith.mulf %306, %308 : vector<8x512xf32>
    %310 = arith.addf %301, %309 : vector<8x512xf32>
    %cst_99 = arith.constant 0.000000e+00 : f32
    %311 = vector.shape_cast %54 : vector<1x512xi1> to vector<1x512xi1>
    %312 = vector.broadcast %311 : vector<1x512xi1> to vector<8x512xi1>
    %313 = vector.broadcast %cst_99 : f32 to vector<8x512xf32>
    %314 = arith.select %312, %254, %313 : vector<8x512xi1>, vector<8x512xf32>
    %315 = vector.extract_strided_slice %250 {offsets = [0, 7], sizes = [8, 1], strides = [1, 1]} : vector<8x9xf32> to vector<8x1xf32>
    %316 = vector.broadcast %315 : vector<8x1xf32> to vector<8x512xf32>
    %317 = arith.mulf %314, %316 : vector<8x512xf32>
    %318 = arith.addf %310, %317 : vector<8x512xf32>
    %c511_i32_100 = arith.constant 511 : i32
    %319 = tpu.dynamic_rotate %254 by %c511_i32_100 dim 1 : vector<8x512xf32>, i32 -> vector<8x512xf32>
    %cst_101 = arith.constant 0.000000e+00 : f32
    %320 = vector.shape_cast %62 : vector<1x512xi1> to vector<1x512xi1>
    %321 = vector.broadcast %320 : vector<1x512xi1> to vector<8x512xi1>
    %322 = vector.broadcast %cst_101 : f32 to vector<8x512xf32>
    %323 = arith.select %321, %319, %322 : vector<8x512xi1>, vector<8x512xf32>
    %324 = vector.extract_strided_slice %250 {offsets = [0, 8], sizes = [8, 1], strides = [1, 1]} : vector<8x9xf32> to vector<8x1xf32>
    %325 = vector.broadcast %324 : vector<8x1xf32> to vector<8x512xf32>
    %326 = arith.mulf %323, %325 : vector<8x512xf32>
    %327 = arith.addf %318, %326 : vector<8x512xf32>
    %328 = vector.broadcast %252 : vector<8x1xf32> to vector<8x512xf32>
    %329 = arith.addf %327, %328 : vector<8x512xf32>
    %cst_102 = arith.constant 0.000000e+00 : f32
    %330 = vector.broadcast %cst_102 : f32 to vector<8x512xf32>
    %331 = arith.cmpf ogt, %329, %330 : vector<8x512xf32>
    %cst_103 = arith.constant 0.000000e+00 : f32
    %332 = vector.broadcast %cst_103 : f32 to vector<8x512xf32>
    %333 = arith.minimumf %329, %332 : vector<8x512xf32>
    %334 = math.exp %333 : vector<8x512xf32>
    %cst_104 = arith.constant 1.000000e+00 : f32
    %335 = vector.broadcast %cst_104 : f32 to vector<8x512xf32>
    %336 = arith.subf %334, %335 : vector<8x512xf32>
    %cst_105 = arith.constant 1.67326319 : f32
    %337 = vector.broadcast %cst_105 : f32 to vector<8x512xf32>
    %338 = arith.mulf %337, %336 : vector<8x512xf32>
    %339 = arith.select %331, %329, %338 : vector<8x512xi1>, vector<8x512xf32>
    %cst_106 = arith.constant 1.05070102 : f32
    %340 = vector.broadcast %cst_106 : f32 to vector<8x512xf32>
    %341 = arith.mulf %340, %339 : vector<8x512xf32>
    %c1_107 = arith.constant 1 : index
    %c0_108 = arith.constant 0 : index
    %c0_109 = arith.constant 0 : index
    %342 = vector.load %arg9[%c1_107, %c0_108, %c0_109] : memref<4x2x8xbf16, #tpu.memory_space<vmem>>, vector<1x2x8xbf16>
    %343 = vector.shape_cast %342 : vector<1x2x8xbf16> to vector<2x8xbf16>
    %c1_110 = arith.constant 1 : index
    %c0_111 = arith.constant 0 : index
    %c0_112 = arith.constant 0 : index
    %344 = vector.load %arg10[%c1_110, %c0_111, %c0_112] : memref<4x2x1xf32, #tpu.memory_space<vmem>>, vector<1x2x1xf32>
    %345 = vector.shape_cast %344 : vector<1x2x1xf32> to vector<2x1xf32>
    %346 = arith.truncf %341 : vector<8x512xf32> to vector<8x512xbf16>
    %cst_113 = arith.constant dense<0.000000e+00> : vector<2x512xf32>
    %347 = tpu.matmul %343, %346, %cst_113 {dimension_numbers = #tpu.dot_dimension_numbers<[1], [0], [0], [1], [0, 0, 1, 1], [], []>} : vector<2x8xbf16>, vector<8x512xbf16>, vector<2x512xf32> -> vector<2x512xf32>
    %348 = vector.broadcast %345 : vector<2x1xf32> to vector<2x512xf32>
    %349 = arith.addf %347, %348 : vector<2x512xf32>
    %cst_114 = arith.constant 0.000000e+00 : f32
    %350 = vector.broadcast %cst_114 : f32 to vector<2x512xf32>
    %351 = arith.cmpf ogt, %349, %350 : vector<2x512xf32>
    %cst_115 = arith.constant 0.000000e+00 : f32
    %352 = vector.broadcast %cst_115 : f32 to vector<2x512xf32>
    %353 = arith.minimumf %349, %352 : vector<2x512xf32>
    %354 = math.exp %353 : vector<2x512xf32>
    %cst_116 = arith.constant 1.000000e+00 : f32
    %355 = vector.broadcast %cst_116 : f32 to vector<2x512xf32>
    %356 = arith.subf %354, %355 : vector<2x512xf32>
    %cst_117 = arith.constant 1.67326319 : f32
    %357 = vector.broadcast %cst_117 : f32 to vector<2x512xf32>
    %358 = arith.mulf %357, %356 : vector<2x512xf32>
    %359 = arith.select %351, %349, %358 : vector<2x512xi1>, vector<2x512xf32>
    %cst_118 = arith.constant 1.05070102 : f32
    %360 = vector.broadcast %cst_118 : f32 to vector<2x512xf32>
    %361 = arith.mulf %360, %359 : vector<2x512xf32>
    %c1_119 = arith.constant 1 : index
    %c0_120 = arith.constant 0 : index
    %c0_121 = arith.constant 0 : index
    %362 = vector.load %arg12[%c1_119, %c0_120, %c0_121] : memref<4x2x1xf32, #tpu.memory_space<vmem>>, vector<1x2x1xf32>
    %363 = vector.shape_cast %362 : vector<1x2x1xf32> to vector<2x1xf32>
    %364 = vector.broadcast %363 : vector<2x1xf32> to vector<2x512xf32>
    %365 = arith.mulf %364, %361 : vector<2x512xf32>
    %cst_122 = arith.constant dense<0.000000e+00> : vector<512xf32>
    %366 = vector.multi_reduction <add>, %365, %cst_122 [0] : vector<2x512xf32> to vector<512xf32>
    %367 = vector.shape_cast %366 : vector<512xf32> to vector<1x512xf32>
    %368 = arith.addf %248, %367 : vector<1x512xf32>
    %c2 = arith.constant 2 : index
    %c0_123 = arith.constant 0 : index
    %c0_124 = arith.constant 0 : index
    %369 = vector.load %arg7[%c2, %c0_123, %c0_124] : memref<4x8x9xf32, #tpu.memory_space<vmem>>, vector<1x8x9xf32>
    %370 = vector.shape_cast %369 : vector<1x8x9xf32> to vector<8x9xf32>
    %c2_125 = arith.constant 2 : index
    %c0_126 = arith.constant 0 : index
    %c0_127 = arith.constant 0 : index
    %371 = vector.load %arg8[%c2_125, %c0_126, %c0_127] : memref<4x8x1xf32, #tpu.memory_space<vmem>>, vector<1x8x1xf32>
    %372 = vector.shape_cast %371 : vector<1x8x1xf32> to vector<8x1xf32>
    %c48_i32_128 = arith.constant 48 : i32
    %373 = tpu.dynamic_rotate %195 by %c48_i32_128 dim 1 : vector<8x512xf32>, i32 -> vector<8x512xf32>
    %c464_i32 = arith.constant 464 : i32
    %374 = tpu.dynamic_rotate %195 by %c464_i32 dim 1 : vector<8x512xf32>, i32 -> vector<8x512xf32>
    %375 = vector.extract_strided_slice %370 {offsets = [0, 4], sizes = [8, 1], strides = [1, 1]} : vector<8x9xf32> to vector<8x1xf32>
    %376 = vector.broadcast %375 : vector<8x1xf32> to vector<8x512xf32>
    %377 = arith.mulf %195, %376 : vector<8x512xf32>
    %c3_i32_129 = arith.constant 3 : i32
    %378 = tpu.dynamic_rotate %373 by %c3_i32_129 dim 1 : vector<8x512xf32>, i32 -> vector<8x512xf32>
    %cst_130 = arith.constant 0.000000e+00 : f32
    %379 = vector.shape_cast %71 : vector<1x512xi1> to vector<1x512xi1>
    %380 = vector.broadcast %379 : vector<1x512xi1> to vector<8x512xi1>
    %381 = vector.broadcast %cst_130 : f32 to vector<8x512xf32>
    %382 = arith.select %380, %378, %381 : vector<8x512xi1>, vector<8x512xf32>
    %383 = vector.extract_strided_slice %370 {offsets = [0, 0], sizes = [8, 1], strides = [1, 1]} : vector<8x9xf32> to vector<8x1xf32>
    %384 = vector.broadcast %383 : vector<8x1xf32> to vector<8x512xf32>
    %385 = arith.mulf %382, %384 : vector<8x512xf32>
    %386 = arith.addf %377, %385 : vector<8x512xf32>
    %cst_131 = arith.constant 0.000000e+00 : f32
    %387 = vector.shape_cast %64 : vector<1x512xi1> to vector<1x512xi1>
    %388 = vector.broadcast %387 : vector<1x512xi1> to vector<8x512xi1>
    %389 = vector.broadcast %cst_131 : f32 to vector<8x512xf32>
    %390 = arith.select %388, %373, %389 : vector<8x512xi1>, vector<8x512xf32>
    %391 = vector.extract_strided_slice %370 {offsets = [0, 1], sizes = [8, 1], strides = [1, 1]} : vector<8x9xf32> to vector<8x1xf32>
    %392 = vector.broadcast %391 : vector<8x1xf32> to vector<8x512xf32>
    %393 = arith.mulf %390, %392 : vector<8x512xf32>
    %394 = arith.addf %386, %393 : vector<8x512xf32>
    %c509_i32 = arith.constant 509 : i32
    %395 = tpu.dynamic_rotate %373 by %c509_i32 dim 1 : vector<8x512xf32>, i32 -> vector<8x512xf32>
    %cst_132 = arith.constant 0.000000e+00 : f32
    %396 = vector.shape_cast %72 : vector<1x512xi1> to vector<1x512xi1>
    %397 = vector.broadcast %396 : vector<1x512xi1> to vector<8x512xi1>
    %398 = vector.broadcast %cst_132 : f32 to vector<8x512xf32>
    %399 = arith.select %397, %395, %398 : vector<8x512xi1>, vector<8x512xf32>
    %400 = vector.extract_strided_slice %370 {offsets = [0, 2], sizes = [8, 1], strides = [1, 1]} : vector<8x9xf32> to vector<8x1xf32>
    %401 = vector.broadcast %400 : vector<8x1xf32> to vector<8x512xf32>
    %402 = arith.mulf %399, %401 : vector<8x512xf32>
    %403 = arith.addf %394, %402 : vector<8x512xf32>
    %c3_i32_133 = arith.constant 3 : i32
    %404 = tpu.dynamic_rotate %195 by %c3_i32_133 dim 1 : vector<8x512xf32>, i32 -> vector<8x512xf32>
    %cst_134 = arith.constant 0.000000e+00 : f32
    %405 = vector.shape_cast %68 : vector<1x512xi1> to vector<1x512xi1>
    %406 = vector.broadcast %405 : vector<1x512xi1> to vector<8x512xi1>
    %407 = vector.broadcast %cst_134 : f32 to vector<8x512xf32>
    %408 = arith.select %406, %404, %407 : vector<8x512xi1>, vector<8x512xf32>
    %409 = vector.extract_strided_slice %370 {offsets = [0, 3], sizes = [8, 1], strides = [1, 1]} : vector<8x9xf32> to vector<8x1xf32>
    %410 = vector.broadcast %409 : vector<8x1xf32> to vector<8x512xf32>
    %411 = arith.mulf %408, %410 : vector<8x512xf32>
    %412 = arith.addf %403, %411 : vector<8x512xf32>
    %c509_i32_135 = arith.constant 509 : i32
    %413 = tpu.dynamic_rotate %195 by %c509_i32_135 dim 1 : vector<8x512xf32>, i32 -> vector<8x512xf32>
    %cst_136 = arith.constant 0.000000e+00 : f32
    %414 = vector.shape_cast %70 : vector<1x512xi1> to vector<1x512xi1>
    %415 = vector.broadcast %414 : vector<1x512xi1> to vector<8x512xi1>
    %416 = vector.broadcast %cst_136 : f32 to vector<8x512xf32>
    %417 = arith.select %415, %413, %416 : vector<8x512xi1>, vector<8x512xf32>
    %418 = vector.extract_strided_slice %370 {offsets = [0, 5], sizes = [8, 1], strides = [1, 1]} : vector<8x9xf32> to vector<8x1xf32>
    %419 = vector.broadcast %418 : vector<8x1xf32> to vector<8x512xf32>
    %420 = arith.mulf %417, %419 : vector<8x512xf32>
    %421 = arith.addf %412, %420 : vector<8x512xf32>
    %c3_i32_137 = arith.constant 3 : i32
    %422 = tpu.dynamic_rotate %374 by %c3_i32_137 dim 1 : vector<8x512xf32>, i32 -> vector<8x512xf32>
    %cst_138 = arith.constant 0.000000e+00 : f32
    %423 = vector.shape_cast %73 : vector<1x512xi1> to vector<1x512xi1>
    %424 = vector.broadcast %423 : vector<1x512xi1> to vector<8x512xi1>
    %425 = vector.broadcast %cst_138 : f32 to vector<8x512xf32>
    %426 = arith.select %424, %422, %425 : vector<8x512xi1>, vector<8x512xf32>
    %427 = vector.extract_strided_slice %370 {offsets = [0, 6], sizes = [8, 1], strides = [1, 1]} : vector<8x9xf32> to vector<8x1xf32>
    %428 = vector.broadcast %427 : vector<8x1xf32> to vector<8x512xf32>
    %429 = arith.mulf %426, %428 : vector<8x512xf32>
    %430 = arith.addf %421, %429 : vector<8x512xf32>
    %cst_139 = arith.constant 0.000000e+00 : f32
    %431 = vector.shape_cast %66 : vector<1x512xi1> to vector<1x512xi1>
    %432 = vector.broadcast %431 : vector<1x512xi1> to vector<8x512xi1>
    %433 = vector.broadcast %cst_139 : f32 to vector<8x512xf32>
    %434 = arith.select %432, %374, %433 : vector<8x512xi1>, vector<8x512xf32>
    %435 = vector.extract_strided_slice %370 {offsets = [0, 7], sizes = [8, 1], strides = [1, 1]} : vector<8x9xf32> to vector<8x1xf32>
    %436 = vector.broadcast %435 : vector<8x1xf32> to vector<8x512xf32>
    %437 = arith.mulf %434, %436 : vector<8x512xf32>
    %438 = arith.addf %430, %437 : vector<8x512xf32>
    %c509_i32_140 = arith.constant 509 : i32
    %439 = tpu.dynamic_rotate %374 by %c509_i32_140 dim 1 : vector<8x512xf32>, i32 -> vector<8x512xf32>
    %cst_141 = arith.constant 0.000000e+00 : f32
    %440 = vector.shape_cast %74 : vector<1x512xi1> to vector<1x512xi1>
    %441 = vector.broadcast %440 : vector<1x512xi1> to vector<8x512xi1>
    %442 = vector.broadcast %cst_141 : f32 to vector<8x512xf32>
    %443 = arith.select %441, %439, %442 : vector<8x512xi1>, vector<8x512xf32>
    %444 = vector.extract_strided_slice %370 {offsets = [0, 8], sizes = [8, 1], strides = [1, 1]} : vector<8x9xf32> to vector<8x1xf32>
    %445 = vector.broadcast %444 : vector<8x1xf32> to vector<8x512xf32>
    %446 = arith.mulf %443, %445 : vector<8x512xf32>
    %447 = arith.addf %438, %446 : vector<8x512xf32>
    %448 = vector.broadcast %372 : vector<8x1xf32> to vector<8x512xf32>
    %449 = arith.addf %447, %448 : vector<8x512xf32>
    %cst_142 = arith.constant 0.000000e+00 : f32
    %450 = vector.broadcast %cst_142 : f32 to vector<8x512xf32>
    %451 = arith.cmpf ogt, %449, %450 : vector<8x512xf32>
    %cst_143 = arith.constant 0.000000e+00 : f32
    %452 = vector.broadcast %cst_143 : f32 to vector<8x512xf32>
    %453 = arith.minimumf %449, %452 : vector<8x512xf32>
    %454 = math.exp %453 : vector<8x512xf32>
    %cst_144 = arith.constant 1.000000e+00 : f32
    %455 = vector.broadcast %cst_144 : f32 to vector<8x512xf32>
    %456 = arith.subf %454, %455 : vector<8x512xf32>
    %cst_145 = arith.constant 1.67326319 : f32
    %457 = vector.broadcast %cst_145 : f32 to vector<8x512xf32>
    %458 = arith.mulf %457, %456 : vector<8x512xf32>
    %459 = arith.select %451, %449, %458 : vector<8x512xi1>, vector<8x512xf32>
    %cst_146 = arith.constant 1.05070102 : f32
    %460 = vector.broadcast %cst_146 : f32 to vector<8x512xf32>
    %461 = arith.mulf %460, %459 : vector<8x512xf32>
    %c2_147 = arith.constant 2 : index
    %c0_148 = arith.constant 0 : index
    %c0_149 = arith.constant 0 : index
    %462 = vector.load %arg9[%c2_147, %c0_148, %c0_149] : memref<4x2x8xbf16, #tpu.memory_space<vmem>>, vector<1x2x8xbf16>
    %463 = vector.shape_cast %462 : vector<1x2x8xbf16> to vector<2x8xbf16>
    %c2_150 = arith.constant 2 : index
    %c0_151 = arith.constant 0 : index
    %c0_152 = arith.constant 0 : index
    %464 = vector.load %arg10[%c2_150, %c0_151, %c0_152] : memref<4x2x1xf32, #tpu.memory_space<vmem>>, vector<1x2x1xf32>
    %465 = vector.shape_cast %464 : vector<1x2x1xf32> to vector<2x1xf32>
    %466 = arith.truncf %461 : vector<8x512xf32> to vector<8x512xbf16>
    %cst_153 = arith.constant dense<0.000000e+00> : vector<2x512xf32>
    %467 = tpu.matmul %463, %466, %cst_153 {dimension_numbers = #tpu.dot_dimension_numbers<[1], [0], [0], [1], [0, 0, 1, 1], [], []>} : vector<2x8xbf16>, vector<8x512xbf16>, vector<2x512xf32> -> vector<2x512xf32>
    %468 = vector.broadcast %465 : vector<2x1xf32> to vector<2x512xf32>
    %469 = arith.addf %467, %468 : vector<2x512xf32>
    %cst_154 = arith.constant 0.000000e+00 : f32
    %470 = vector.broadcast %cst_154 : f32 to vector<2x512xf32>
    %471 = arith.cmpf ogt, %469, %470 : vector<2x512xf32>
    %cst_155 = arith.constant 0.000000e+00 : f32
    %472 = vector.broadcast %cst_155 : f32 to vector<2x512xf32>
    %473 = arith.minimumf %469, %472 : vector<2x512xf32>
    %474 = math.exp %473 : vector<2x512xf32>
    %cst_156 = arith.constant 1.000000e+00 : f32
    %475 = vector.broadcast %cst_156 : f32 to vector<2x512xf32>
    %476 = arith.subf %474, %475 : vector<2x512xf32>
    %cst_157 = arith.constant 1.67326319 : f32
    %477 = vector.broadcast %cst_157 : f32 to vector<2x512xf32>
    %478 = arith.mulf %477, %476 : vector<2x512xf32>
    %479 = arith.select %471, %469, %478 : vector<2x512xi1>, vector<2x512xf32>
    %cst_158 = arith.constant 1.05070102 : f32
    %480 = vector.broadcast %cst_158 : f32 to vector<2x512xf32>
    %481 = arith.mulf %480, %479 : vector<2x512xf32>
    %c2_159 = arith.constant 2 : index
    %c0_160 = arith.constant 0 : index
    %c0_161 = arith.constant 0 : index
    %482 = vector.load %arg12[%c2_159, %c0_160, %c0_161] : memref<4x2x1xf32, #tpu.memory_space<vmem>>, vector<1x2x1xf32>
    %483 = vector.shape_cast %482 : vector<1x2x1xf32> to vector<2x1xf32>
    %484 = vector.broadcast %483 : vector<2x1xf32> to vector<2x512xf32>
    %485 = arith.mulf %484, %481 : vector<2x512xf32>
    %cst_162 = arith.constant dense<0.000000e+00> : vector<512xf32>
    %486 = vector.multi_reduction <add>, %485, %cst_162 [0] : vector<2x512xf32> to vector<512xf32>
    %487 = vector.shape_cast %486 : vector<512xf32> to vector<1x512xf32>
    %488 = arith.addf %368, %487 : vector<1x512xf32>
    %c3 = arith.constant 3 : index
    %c0_163 = arith.constant 0 : index
    %c0_164 = arith.constant 0 : index
    %489 = vector.load %arg7[%c3, %c0_163, %c0_164] : memref<4x8x9xf32, #tpu.memory_space<vmem>>, vector<1x8x9xf32>
    %490 = vector.shape_cast %489 : vector<1x8x9xf32> to vector<8x9xf32>
    %c3_165 = arith.constant 3 : index
    %c0_166 = arith.constant 0 : index
    %c0_167 = arith.constant 0 : index
    %491 = vector.load %arg8[%c3_165, %c0_166, %c0_167] : memref<4x8x1xf32, #tpu.memory_space<vmem>>, vector<1x8x1xf32>
    %492 = vector.shape_cast %491 : vector<1x8x1xf32> to vector<8x1xf32>
    %c80_i32_168 = arith.constant 80 : i32
    %493 = tpu.dynamic_rotate %195 by %c80_i32_168 dim 1 : vector<8x512xf32>, i32 -> vector<8x512xf32>
    %c432_i32 = arith.constant 432 : i32
    %494 = tpu.dynamic_rotate %195 by %c432_i32 dim 1 : vector<8x512xf32>, i32 -> vector<8x512xf32>
    %495 = vector.extract_strided_slice %490 {offsets = [0, 4], sizes = [8, 1], strides = [1, 1]} : vector<8x9xf32> to vector<8x1xf32>
    %496 = vector.broadcast %495 : vector<8x1xf32> to vector<8x512xf32>
    %497 = arith.mulf %195, %496 : vector<8x512xf32>
    %c5_i32_169 = arith.constant 5 : i32
    %498 = tpu.dynamic_rotate %493 by %c5_i32_169 dim 1 : vector<8x512xf32>, i32 -> vector<8x512xf32>
    %cst_170 = arith.constant 0.000000e+00 : f32
    %499 = vector.shape_cast %83 : vector<1x512xi1> to vector<1x512xi1>
    %500 = vector.broadcast %499 : vector<1x512xi1> to vector<8x512xi1>
    %501 = vector.broadcast %cst_170 : f32 to vector<8x512xf32>
    %502 = arith.select %500, %498, %501 : vector<8x512xi1>, vector<8x512xf32>
    %503 = vector.extract_strided_slice %490 {offsets = [0, 0], sizes = [8, 1], strides = [1, 1]} : vector<8x9xf32> to vector<8x1xf32>
    %504 = vector.broadcast %503 : vector<8x1xf32> to vector<8x512xf32>
    %505 = arith.mulf %502, %504 : vector<8x512xf32>
    %506 = arith.addf %497, %505 : vector<8x512xf32>
    %cst_171 = arith.constant 0.000000e+00 : f32
    %507 = vector.shape_cast %76 : vector<1x512xi1> to vector<1x512xi1>
    %508 = vector.broadcast %507 : vector<1x512xi1> to vector<8x512xi1>
    %509 = vector.broadcast %cst_171 : f32 to vector<8x512xf32>
    %510 = arith.select %508, %493, %509 : vector<8x512xi1>, vector<8x512xf32>
    %511 = vector.extract_strided_slice %490 {offsets = [0, 1], sizes = [8, 1], strides = [1, 1]} : vector<8x9xf32> to vector<8x1xf32>
    %512 = vector.broadcast %511 : vector<8x1xf32> to vector<8x512xf32>
    %513 = arith.mulf %510, %512 : vector<8x512xf32>
    %514 = arith.addf %506, %513 : vector<8x512xf32>
    %c507_i32 = arith.constant 507 : i32
    %515 = tpu.dynamic_rotate %493 by %c507_i32 dim 1 : vector<8x512xf32>, i32 -> vector<8x512xf32>
    %cst_172 = arith.constant 0.000000e+00 : f32
    %516 = vector.shape_cast %84 : vector<1x512xi1> to vector<1x512xi1>
    %517 = vector.broadcast %516 : vector<1x512xi1> to vector<8x512xi1>
    %518 = vector.broadcast %cst_172 : f32 to vector<8x512xf32>
    %519 = arith.select %517, %515, %518 : vector<8x512xi1>, vector<8x512xf32>
    %520 = vector.extract_strided_slice %490 {offsets = [0, 2], sizes = [8, 1], strides = [1, 1]} : vector<8x9xf32> to vector<8x1xf32>
    %521 = vector.broadcast %520 : vector<8x1xf32> to vector<8x512xf32>
    %522 = arith.mulf %519, %521 : vector<8x512xf32>
    %523 = arith.addf %514, %522 : vector<8x512xf32>
    %c5_i32_173 = arith.constant 5 : i32
    %524 = tpu.dynamic_rotate %195 by %c5_i32_173 dim 1 : vector<8x512xf32>, i32 -> vector<8x512xf32>
    %cst_174 = arith.constant 0.000000e+00 : f32
    %525 = vector.shape_cast %80 : vector<1x512xi1> to vector<1x512xi1>
    %526 = vector.broadcast %525 : vector<1x512xi1> to vector<8x512xi1>
    %527 = vector.broadcast %cst_174 : f32 to vector<8x512xf32>
    %528 = arith.select %526, %524, %527 : vector<8x512xi1>, vector<8x512xf32>
    %529 = vector.extract_strided_slice %490 {offsets = [0, 3], sizes = [8, 1], strides = [1, 1]} : vector<8x9xf32> to vector<8x1xf32>
    %530 = vector.broadcast %529 : vector<8x1xf32> to vector<8x512xf32>
    %531 = arith.mulf %528, %530 : vector<8x512xf32>
    %532 = arith.addf %523, %531 : vector<8x512xf32>
    %c507_i32_175 = arith.constant 507 : i32
    %533 = tpu.dynamic_rotate %195 by %c507_i32_175 dim 1 : vector<8x512xf32>, i32 -> vector<8x512xf32>
    %cst_176 = arith.constant 0.000000e+00 : f32
    %534 = vector.shape_cast %82 : vector<1x512xi1> to vector<1x512xi1>
    %535 = vector.broadcast %534 : vector<1x512xi1> to vector<8x512xi1>
    %536 = vector.broadcast %cst_176 : f32 to vector<8x512xf32>
    %537 = arith.select %535, %533, %536 : vector<8x512xi1>, vector<8x512xf32>
    %538 = vector.extract_strided_slice %490 {offsets = [0, 5], sizes = [8, 1], strides = [1, 1]} : vector<8x9xf32> to vector<8x1xf32>
    %539 = vector.broadcast %538 : vector<8x1xf32> to vector<8x512xf32>
    %540 = arith.mulf %537, %539 : vector<8x512xf32>
    %541 = arith.addf %532, %540 : vector<8x512xf32>
    %c5_i32_177 = arith.constant 5 : i32
    %542 = tpu.dynamic_rotate %494 by %c5_i32_177 dim 1 : vector<8x512xf32>, i32 -> vector<8x512xf32>
    %cst_178 = arith.constant 0.000000e+00 : f32
    %543 = vector.shape_cast %85 : vector<1x512xi1> to vector<1x512xi1>
    %544 = vector.broadcast %543 : vector<1x512xi1> to vector<8x512xi1>
    %545 = vector.broadcast %cst_178 : f32 to vector<8x512xf32>
    %546 = arith.select %544, %542, %545 : vector<8x512xi1>, vector<8x512xf32>
    %547 = vector.extract_strided_slice %490 {offsets = [0, 6], sizes = [8, 1], strides = [1, 1]} : vector<8x9xf32> to vector<8x1xf32>
    %548 = vector.broadcast %547 : vector<8x1xf32> to vector<8x512xf32>
    %549 = arith.mulf %546, %548 : vector<8x512xf32>
    %550 = arith.addf %541, %549 : vector<8x512xf32>
    %cst_179 = arith.constant 0.000000e+00 : f32
    %551 = vector.shape_cast %78 : vector<1x512xi1> to vector<1x512xi1>
    %552 = vector.broadcast %551 : vector<1x512xi1> to vector<8x512xi1>
    %553 = vector.broadcast %cst_179 : f32 to vector<8x512xf32>
    %554 = arith.select %552, %494, %553 : vector<8x512xi1>, vector<8x512xf32>
    %555 = vector.extract_strided_slice %490 {offsets = [0, 7], sizes = [8, 1], strides = [1, 1]} : vector<8x9xf32> to vector<8x1xf32>
    %556 = vector.broadcast %555 : vector<8x1xf32> to vector<8x512xf32>
    %557 = arith.mulf %554, %556 : vector<8x512xf32>
    %558 = arith.addf %550, %557 : vector<8x512xf32>
    %c507_i32_180 = arith.constant 507 : i32
    %559 = tpu.dynamic_rotate %494 by %c507_i32_180 dim 1 : vector<8x512xf32>, i32 -> vector<8x512xf32>
    %cst_181 = arith.constant 0.000000e+00 : f32
    %560 = vector.shape_cast %86 : vector<1x512xi1> to vector<1x512xi1>
    %561 = vector.broadcast %560 : vector<1x512xi1> to vector<8x512xi1>
    %562 = vector.broadcast %cst_181 : f32 to vector<8x512xf32>
    %563 = arith.select %561, %559, %562 : vector<8x512xi1>, vector<8x512xf32>
    %564 = vector.extract_strided_slice %490 {offsets = [0, 8], sizes = [8, 1], strides = [1, 1]} : vector<8x9xf32> to vector<8x1xf32>
    %565 = vector.broadcast %564 : vector<8x1xf32> to vector<8x512xf32>
    %566 = arith.mulf %563, %565 : vector<8x512xf32>
    %567 = arith.addf %558, %566 : vector<8x512xf32>
    %568 = vector.broadcast %492 : vector<8x1xf32> to vector<8x512xf32>
    %569 = arith.addf %567, %568 : vector<8x512xf32>
    %cst_182 = arith.constant 0.000000e+00 : f32
    %570 = vector.broadcast %cst_182 : f32 to vector<8x512xf32>
    %571 = arith.cmpf ogt, %569, %570 : vector<8x512xf32>
    %cst_183 = arith.constant 0.000000e+00 : f32
    %572 = vector.broadcast %cst_183 : f32 to vector<8x512xf32>
    %573 = arith.minimumf %569, %572 : vector<8x512xf32>
    %574 = math.exp %573 : vector<8x512xf32>
    %cst_184 = arith.constant 1.000000e+00 : f32
    %575 = vector.broadcast %cst_184 : f32 to vector<8x512xf32>
    %576 = arith.subf %574, %575 : vector<8x512xf32>
    %cst_185 = arith.constant 1.67326319 : f32
    %577 = vector.broadcast %cst_185 : f32 to vector<8x512xf32>
    %578 = arith.mulf %577, %576 : vector<8x512xf32>
    %579 = arith.select %571, %569, %578 : vector<8x512xi1>, vector<8x512xf32>
    %cst_186 = arith.constant 1.05070102 : f32
    %580 = vector.broadcast %cst_186 : f32 to vector<8x512xf32>
    %581 = arith.mulf %580, %579 : vector<8x512xf32>
    %c3_187 = arith.constant 3 : index
    %c0_188 = arith.constant 0 : index
    %c0_189 = arith.constant 0 : index
    %582 = vector.load %arg9[%c3_187, %c0_188, %c0_189] : memref<4x2x8xbf16, #tpu.memory_space<vmem>>, vector<1x2x8xbf16>
    %583 = vector.shape_cast %582 : vector<1x2x8xbf16> to vector<2x8xbf16>
    %c3_190 = arith.constant 3 : index
    %c0_191 = arith.constant 0 : index
    %c0_192 = arith.constant 0 : index
    %584 = vector.load %arg10[%c3_190, %c0_191, %c0_192] : memref<4x2x1xf32, #tpu.memory_space<vmem>>, vector<1x2x1xf32>
    %585 = vector.shape_cast %584 : vector<1x2x1xf32> to vector<2x1xf32>
    %586 = arith.truncf %581 : vector<8x512xf32> to vector<8x512xbf16>
    %cst_193 = arith.constant dense<0.000000e+00> : vector<2x512xf32>
    %587 = tpu.matmul %583, %586, %cst_193 {dimension_numbers = #tpu.dot_dimension_numbers<[1], [0], [0], [1], [0, 0, 1, 1], [], []>} : vector<2x8xbf16>, vector<8x512xbf16>, vector<2x512xf32> -> vector<2x512xf32>
    %588 = vector.broadcast %585 : vector<2x1xf32> to vector<2x512xf32>
    %589 = arith.addf %587, %588 : vector<2x512xf32>
    %cst_194 = arith.constant 0.000000e+00 : f32
    %590 = vector.broadcast %cst_194 : f32 to vector<2x512xf32>
    %591 = arith.cmpf ogt, %589, %590 : vector<2x512xf32>
    %cst_195 = arith.constant 0.000000e+00 : f32
    %592 = vector.broadcast %cst_195 : f32 to vector<2x512xf32>
    %593 = arith.minimumf %589, %592 : vector<2x512xf32>
    %594 = math.exp %593 : vector<2x512xf32>
    %cst_196 = arith.constant 1.000000e+00 : f32
    %595 = vector.broadcast %cst_196 : f32 to vector<2x512xf32>
    %596 = arith.subf %594, %595 : vector<2x512xf32>
    %cst_197 = arith.constant 1.67326319 : f32
    %597 = vector.broadcast %cst_197 : f32 to vector<2x512xf32>
    %598 = arith.mulf %597, %596 : vector<2x512xf32>
    %599 = arith.select %591, %589, %598 : vector<2x512xi1>, vector<2x512xf32>
    %cst_198 = arith.constant 1.05070102 : f32
    %600 = vector.broadcast %cst_198 : f32 to vector<2x512xf32>
    %601 = arith.mulf %600, %599 : vector<2x512xf32>
    %c3_199 = arith.constant 3 : index
    %c0_200 = arith.constant 0 : index
    %c0_201 = arith.constant 0 : index
    %602 = vector.load %arg12[%c3_199, %c0_200, %c0_201] : memref<4x2x1xf32, #tpu.memory_space<vmem>>, vector<1x2x1xf32>
    %603 = vector.shape_cast %602 : vector<1x2x1xf32> to vector<2x1xf32>
    %604 = vector.broadcast %603 : vector<2x1xf32> to vector<2x512xf32>
    %605 = arith.mulf %604, %601 : vector<2x512xf32>
    %cst_202 = arith.constant dense<0.000000e+00> : vector<512xf32>
    %606 = vector.multi_reduction <add>, %605, %cst_202 [0] : vector<2x512xf32> to vector<512xf32>
    %607 = vector.shape_cast %606 : vector<512xf32> to vector<1x512xf32>
    %608 = arith.addf %488, %607 : vector<1x512xf32>
    %c0_203 = arith.constant 0 : index
    %c0_204 = arith.constant 0 : index
    %609 = vector.load %arg13[%c0_203, %c0_204] : memref<1x1xf32, #tpu.memory_space<vmem>>, vector<1x1xf32>
    %610 = vector.broadcast %609 : vector<1x1xf32> to vector<1x512xf32>
    %611 = arith.addf %608, %610 : vector<1x512xf32>
    %cst_205 = arith.constant 0.000000e+00 : f32
    %612 = vector.broadcast %cst_205 : f32 to vector<1x512xf32>
    %613 = arith.cmpf ogt, %611, %612 : vector<1x512xf32>
    %cst_206 = arith.constant 0.000000e+00 : f32
    %614 = vector.broadcast %cst_206 : f32 to vector<1x512xf32>
    %615 = arith.minimumf %611, %614 : vector<1x512xf32>
    %616 = math.exp %615 : vector<1x512xf32>
    %cst_207 = arith.constant 1.000000e+00 : f32
    %617 = vector.broadcast %cst_207 : f32 to vector<1x512xf32>
    %618 = arith.subf %616, %617 : vector<1x512xf32>
    %cst_208 = arith.constant 1.67326319 : f32
    %619 = vector.broadcast %cst_208 : f32 to vector<1x512xf32>
    %620 = arith.mulf %619, %618 : vector<1x512xf32>
    %621 = arith.select %613, %611, %620 : vector<1x512xi1>, vector<1x512xf32>
    %cst_209 = arith.constant 1.05070102 : f32
    %622 = vector.broadcast %cst_209 : f32 to vector<1x512xf32>
    %623 = arith.mulf %622, %621 : vector<1x512xf32>
    %cst_210 = arith.constant 0.000000e+00 : f32
    %624 = vector.broadcast %cst_210 : f32 to vector<1x512xf32>
    %625 = arith.maximumf %623, %624 : vector<1x512xf32>
    %626 = arith.addf %625, %0 : vector<1x512xf32>
    %c0_211 = arith.constant 0 : index
    %c0_212 = arith.constant 0 : index
    %627 = vector.load %arg14[%c0_211, %c0_212] : memref<1x512xf32, #tpu.memory_space<vmem>>, vector<1x512xf32>
    tpu.vector_store %arg14[%c0_211, %c0_212], %626 {strides = array<i32>} : memref<1x512xf32, #tpu.memory_space<vmem>>, vector<1x512xf32>,
    return
  }
  func.func @transform_0(%arg0: i32) -> (i32, i32) {
    %c0_i32 = arith.constant 0 : i32
    %c0_i32_0 = arith.constant 0 : i32
    return %c0_i32, %arg0 : i32, i32
  }
  func.func @transform_1(%arg0: i32) -> (i32, i32) {
    %c0_i32 = arith.constant 0 : i32
    %c0_i32_0 = arith.constant 0 : i32
    return %c0_i32, %arg0 : i32, i32
  }
  func.func @transform_2(%arg0: i32) -> (i32, i32) {
    %c0_i32 = arith.constant 0 : i32
    %c0_i32_0 = arith.constant 0 : i32
    %c0_i32_1 = arith.constant 0 : i32
    return %c0_i32, %c0_i32_0 : i32, i32
  }
  func.func @transform_3(%arg0: i32) -> (i32, i32) {
    %c0_i32 = arith.constant 0 : i32
    %c0_i32_0 = arith.constant 0 : i32
    %c0_i32_1 = arith.constant 0 : i32
    return %c0_i32, %c0_i32_0 : i32, i32
  }
  func.func @transform_4(%arg0: i32) -> (i32, i32) {
    %c0_i32 = arith.constant 0 : i32
    %c0_i32_0 = arith.constant 0 : i32
    %c0_i32_1 = arith.constant 0 : i32
    return %c0_i32, %c0_i32_0 : i32, i32
  }
  func.func @transform_5(%arg0: i32) -> (i32, i32) {
    %c0_i32 = arith.constant 0 : i32
    %c0_i32_0 = arith.constant 0 : i32
    %c0_i32_1 = arith.constant 0 : i32
    return %c0_i32, %c0_i32_0 : i32, i32
  }
  func.func @transform_6(%arg0: i32) -> (i32, i32, i32) {
    %c0_i32 = arith.constant 0 : i32
    %c0_i32_0 = arith.constant 0 : i32
    %c0_i32_1 = arith.constant 0 : i32
    %c0_i32_2 = arith.constant 0 : i32
    return %c0_i32, %c0_i32_0, %c0_i32_1 : i32, i32, i32
  }
  func.func @transform_7(%arg0: i32) -> (i32, i32, i32) {
    %c0_i32 = arith.constant 0 : i32
    %c0_i32_0 = arith.constant 0 : i32
    %c0_i32_1 = arith.constant 0 : i32
    %c0_i32_2 = arith.constant 0 : i32
    return %c0_i32, %c0_i32_0, %c0_i32_1 : i32, i32, i32
  }
  func.func @transform_8(%arg0: i32) -> (i32, i32, i32) {
    %c0_i32 = arith.constant 0 : i32
    %c0_i32_0 = arith.constant 0 : i32
    %c0_i32_1 = arith.constant 0 : i32
    %c0_i32_2 = arith.constant 0 : i32
    return %c0_i32, %c0_i32_0, %c0_i32_1 : i32, i32, i32
  }
  func.func @transform_9(%arg0: i32) -> (i32, i32, i32) {
    %c0_i32 = arith.constant 0 : i32
    %c0_i32_0 = arith.constant 0 : i32
    %c0_i32_1 = arith.constant 0 : i32
    %c0_i32_2 = arith.constant 0 : i32
    return %c0_i32, %c0_i32_0, %c0_i32_1 : i32, i32, i32
  }
  func.func @transform_10(%arg0: i32) -> (i32, i32) {
    %c0_i32 = arith.constant 0 : i32
    %c0_i32_0 = arith.constant 0 : i32
    %c0_i32_1 = arith.constant 0 : i32
    return %c0_i32, %c0_i32_0 : i32, i32
  }
  func.func @transform_11(%arg0: i32) -> (i32, i32, i32) {
    %c0_i32 = arith.constant 0 : i32
    %c0_i32_0 = arith.constant 0 : i32
    %c0_i32_1 = arith.constant 0 : i32
    %c0_i32_2 = arith.constant 0 : i32
    return %c0_i32, %c0_i32_0, %c0_i32_1 : i32, i32, i32
  }
  func.func @transform_12(%arg0: i32) -> (i32, i32) {
    %c0_i32 = arith.constant 0 : i32
    %c0_i32_0 = arith.constant 0 : i32
    %c0_i32_1 = arith.constant 0 : i32
    return %c0_i32, %c0_i32_0 : i32, i32
  }
  func.func @transform_13(%arg0: i32) -> (i32, i32) {
    %c0_i32 = arith.constant 0 : i32
    %c0_i32_0 = arith.constant 0 : i32
    return %c0_i32, %arg0 : i32, i32
  }
}

</mosaic_0001>

<bundles_post_ra>
// kernel: tpu_custom_call.1
= control target key start
LH: loop header
LB: loop body
LE: loop exit
PB: predicated region body
PF: predicated region fallthrough
CT: control target
= control target key end

     0   :  { %s6005_s0 = inlined_call_operand.hbm [shape: f32[1,512], index: 0, kind: input, shape index: {}]   ;;  %s6006_s1 = inlined_call_operand.vmem [shape: f32[16,512], index: 1, kind: input, shape index: {}]   ;;  %s6007_s2 = inlined_call_operand.hbm [shape: f32[16,9], index: 2, kind: input, shape index: {}]   ;;  %s6008_s3 = inlined_call_operand.vmem [shape: f32[16,1], index: 3, kind: input, shape index: {}]   ;;  %s6009_s4 = inlined_call_operand.vmem [shape: bf16[8,16], index: 4, kind: input, shape index: {}]   ;;  %s6010_s5 = inlined_call_operand.vmem [shape: f32[8,1], index: 5, kind: input, shape index: {}]   ;;  %s6011_s6 = inlined_call_operand.vmem [shape: f32[4,8,9], index: 6, kind: input, shape index: {}]   ;;  %s6012_s7 = inlined_call_operand.vmem [shape: f32[4,8,1], index: 7, kind: input, shape index: {}]   ;;  %s6013_s8 = inlined_call_operand.vmem [shape: bf16[4,2,8], index: 8, kind: input, shape index: {}]   ;;  %s6014_s9 = inlined_call_operand.vmem [shape: f32[4,2,1], index: 9, kind: input, shape index: {}]   ;;  %s6015_s10 = inlined_call_operand.vmem [shape: f32[8,1], index: 10, kind: input, shape index: {}]   ;;  %s6016_s11 = inlined_call_operand.vmem [shape: f32[4,2,1], index: 11, kind: input, shape index: {}]   ;;  %s6017_s12 = inlined_call_operand.<no memory space> [shape: f32[1,1], index: 12, kind: input, shape index: {}]   ;;  %s6018_s13 = inlined_call_operand.hbm [shape: f32[1,512], index: 13, kind: output, shape index: {}]  }
   0x1   :  { %v18_v0 = vstv %s6017_s12 }
   0x2   :  { %19 = vst [vmem:[#allocation2] sm:$0x1] %v18_v0 }
   0x3   :  { %20 = vsyncpa [#allocation4], 0 }
   0x4   :  { %21 = vsyncpa [#allocation7], 0 }
   0x5   :  { %22 = vsyncpa [#allocation5], 0  ;;  %s3282_s27 = smov [#allocation3]   ;;  %s3283_s29 = smov [#allocation6]  }
   0x6   :  { %s29_s28 = sshll.u32 %s3282_s27, 4  ;;  %s40_s30 = sshll.u32 %s3283_s29, 4  ;;  %s30_s28 = int_to_ptr.vmem [resolvable:$true] %s29_s28  ;;  %s3380_s30 = int_to_ptr.vmem [resolvable:$true] %s40_s30 }
   0x7   :  { %s3210_s16 = scalar_lea.hbm %s6005_s0, 64 }
   0x8   :  { %p3211_p0 = scmp.ne.s32.totalorder %s6005_s0, %s3210_s16  ;;  %p3214_p1 = scmp.lt.u32.totalorder %s3210_s16, %s6005_s0 }
   0xa   :  { %p3216_p2 = pnand %p3214_p1, %p3211_p0 }
   0xc   :  { %3219 = shalt.err (!%p3216_p2)
}
   0xd   :  { %s3220_s20 = scalar_lea.vmem %s30_s28, 64  ;;  %p3225_p4 = scmp.lt.s32.totalorder %s30_s28, %s30_s28 }
   0xe   :  { %p3221_p3 = scmp.ne.s32.totalorder %s30_s28, %s3220_s20  ;;  %p3226_p5 = scmp.lt.s32.totalorder %s3220_s20, %s3220_s20 }
  0x10   :  { %p3227_p6 = por %p3226_p5, %p3225_p4 }
  0x12   :  { %p3228_p7 = pnand %p3227_p6, %p3221_p3 }
  0x14   :  { %3231 = shalt.err (!%p3228_p7)
}
  0x15   :  { %32 = dma.hbm_to_vmem [thread:$0]  %s6005_s0, 64, %s30_s28, [#allocation4]  }
  0x16   :  { %s3232_s25 = scalar_lea.hbm %s6007_s2, 256 }
  0x17   :  { %p3233_p8 = scmp.ne.s32.totalorder %s6007_s2, %s3232_s25  ;;  %p3236_p9 = scmp.lt.u32.totalorder %s3232_s25, %s6007_s2 }
  0x19   :  { %p3238_p10 = pnand %p3236_p9, %p3233_p8 }
  0x1b   :  { %3241 = shalt.err (!%p3238_p10)
}
  0x1c   :  { %s3242_s15 = scalar_lea.vmem %s3380_s30, 256  ;;  %p3247_p12 = scmp.lt.s32.totalorder %s3380_s30, %s3380_s30 }
  0x1d   :  { %p3243_p11 = scmp.ne.s32.totalorder %s3380_s30, %s3242_s15  ;;  %p3248_p13 = scmp.lt.s32.totalorder %s3242_s15, %s3242_s15 }
  0x1f   :  { %p3249_p0 = por %p3248_p13, %p3247_p12 }
  0x21   :  { %p3250_p1 = pnand %p3249_p0, %p3243_p11 }
  0x23   :  { %3253 = shalt.err (!%p3250_p1)
}
  0x24   :  { %s3284_s0 = smov 128   ;;  %s3285_s28 = smov 8  }
  0x25   :  { %46 = dma.hbm_to_vmem [thread:$0]  %s6007_s2, 256, %s3380_s30, [#allocation7], %s3284_s0, %s3284_s0, %s3285_s28  }
  0x26   :  { %3276 = dma.done.wait [#allocation4], 64  }
  0x27   :  { %3277 = vsyncadd [#allocation4], 4294967232 }
  0x28   :  { %3278 = dma.done.wait [#allocation7], 256  }
  0x29   :  { %3279 = vsyncadd [#allocation7], 4294967040  ;;  %v6042_v1 = vmov 4   ;;  %v6029_v2 = vmov 0   ;;  %v3415_v3 = vld [vmem:[#allocation6 + $0x8] sm:$0xff]  ;;  %v3417_v4 = vld [vmem:[#allocation6] sm:$0xff]  ;;  %v6019_v13 = vlaneseq }
  0x2a   :  { %3070 = vset.pattern.permute.xlu1 %v6042_v1  ;;  %3069 = vset.pattern.permute.xlu0 %v6042_v1  ;;  %v74_v5 = vld [vmem:[#allocation3] sm:$0xf]  ;;  %v6028_v8 = vmov 2   ;;  %v6040_v9 = vmov 1   ;;  %v6024_v10 = vmov 3   ;;  %v76_v21 = vld [vmem:[%s6006_s1 + $0x8] sm:$0xff] }
  0x2b   :  { %986 = vmatprep.mubr.bf16.mxu0 %v6029_v2  ;;  %1027 = vmatprep.mubr.bf16.mxu1 %v6029_v2  ;;  %v83_v6 = vsub.f32 0.0, %v74_v5  ;;  %v3431_v14 = vshrl.u32 %v6019_v13, 7  ;;  %v75_v22 = vld [vmem:[%s6006_s1] sm:$0xff]  ;;  %v80_v26 = vld [vmem:[%s6006_s1 + $0x28] sm:$0xff]  ;;  %s3291_s23 = smov 16   ;;  %v81_v34 = vld [vmem:[%s6006_s1 + $0x30] sm:$0xff] }
  0x2c   :  { %380 = vperm.xlu1 %3070, %v3415_v3   ;;  %375 = vperm.xlu0 %3069, %v3417_v4   ;;  %v79_v27 = vld [vmem:[%s6006_s1 + $0x20] sm:$0xff]  ;;  %v77_v35 = vld [vmem:[%s6006_s1 + $0x10] sm:$0xff]  ;;  %v82_v39 = vld [vmem:[%s6006_s1 + $0x38] sm:$0xff]  ;;  %s3292_s28 = smov 112   ;;  %v6033_v43 = vmov 6   ;;  %v6031_v44 = vmov 5  }
  0x2d   :  { %v84_v7 = vmul.f32 1.442695, %v83_v6  ;;  %6138 = vst [vmem:[#allocation12_spill] sm:$0xff] %v3431_v14  ;;  %v6022_v17 = vsub.s32 1, %v3431_v14  ;;  %v3435_v18 = vsub.s32 0, %v3431_v14  ;;  %v6021_v25 = vsub.s32 2, %v3431_v14 }
  0x2e   :  { %v6020_v33 = vsub.s32 3, %v3431_v14  ;;  %v78_v40 = vld [vmem:[%s6006_s1 + $0x18] sm:$0xff]  ;;  %s3295_s1 = smov 1   ;;  %v6026_v45 = vmov 7   ;;  %s3297_s16 = smov 127   ;;  %v6023_v46 = vmov 8  }
  0x2f   :  { %3109 = vpow2.f32 %v84_v7  ;;  %6139 = vst [vmem:[#allocation13_spill] sm:$0xff] %v3435_v18  ;;  %v321_v48 = vld [vmem:[%s6008_s3] sm:$0xff]  ;;  %v3589_v58 = vand.u32 127, %v6019_v13  ;;  %s3302_s12 = smov 80   ;;  %s3303_s19 = smov 3  }
  0x30   :  { %3071 = vset.pattern.permute.xlu1 %v6029_v2  ;;  %3073 = vset.pattern.permute.xlu0 %v6028_v8 }
  0x31   :  { %433 = vperm.xlu1 %3071, %v3417_v4   ;;  %538 = vperm.xlu0 %3073, %v3417_v4   ;;  %vm6060_vm1 = vcmp.lt.s32.totalorder %v3589_v58, 16  ;;  %vm6055_vm2 = vcmp.lt.s32.totalorder %v3589_v58, 112  ;;  %vm6127_vm8 = vcmp.lt.s32.totalorder %v3589_v58, 1  ;;  %vm6129_vm12 = vcmp.lt.s32.totalorder %v3589_v58, 127 }
  0x35   :  { %3072 = vset.pattern.permute.xlu1 %v6040_v9  ;;  %3076 = vset.pattern.permute.xlu0 %v6024_v10 }
  0x36   :  { %473 = vperm.xlu1 %3072, %v3417_v4  }
  0x39   :  { %v3110_v11 = vpop.eup %3109 }
  0x3a   :  { %477 = vperm.xlu1 %3072, %v3415_v3   ;;  %v86_v12 = vadd.f32 1.0, %v3110_v11 }
  0x3c   :  { %3111 = vrcp.f32 %v86_v12 }
  0x3e   :  { %3074 = vset.pattern.permute.xlu1 %v6028_v8 }
  0x46   :  { %v3112_v15 = vpop.eup %3111 }
  0x47   :  { %v89_v16 = vsub.f32 1.0, %v3112_v15 }
  0x49   :  { %vm90_vm0 = vcmp.gt.f32.partialorder %v89_v16, 0.93 }
  0x4a   :  { %v91_v19 = vsel %vm90_vm0, 0.0, %v89_v16 }
  0x4b   :  { %v92_v20 = vadd.f32 %v3112_v15, %v91_v19 }
  0x4d   :  { %v101_v23 = vrot.slane %v92_v20, %v6022_v17  ;;  %v97_v24 = vrot.slane %v92_v20, %v3435_v18  ;;  %v105_v32 = vrot.slane %v92_v20, %v6021_v25  ;;  %v109_v38 = vrot.slane %v92_v20, %v6020_v33 }
  0x4e   :  { %v125_v18 = vadd.s32 256, %v3589_v58 }
  0x4f   :  { %v3453_v28 = vmul.f32 %v101_v23, %v76_v21  ;;  %v3455_v29 = vmul.f32 %v97_v24, %v75_v22  ;;  %v3461_v30 = vmul.f32 %v101_v23, %v80_v26  ;;  %v3463_v31 = vmul.f32 %v97_v24, %v79_v27 }
  0x50   :  { %v3478_v36 = vmul.f32 %v105_v32, %v81_v34  ;;  %v3480_v37 = vmul.f32 %v105_v32, %v77_v35  ;;  %v3494_v41 = vmul.f32 %v109_v38, %v82_v39  ;;  %v3496_v42 = vmul.f32 %v109_v38, %v78_v40 }
  0x51   :  { %327 = vrot.lane.b32.xlu1 %v3453_v28, %s3291_s23  ;;  %323 = vrot.lane.b32.xlu0 %v3455_v29, %s3291_s23 }
  0x55   :  { %329 = vrot.lane.b32.xlu1 %v3461_v30, %s3291_s23  ;;  %325 = vrot.lane.b32.xlu0 %v3463_v31, %s3291_s23 }
  0x59   :  { %333 = vrot.lane.b32.xlu1 %v3478_v36, %s3291_s23  ;;  %331 = vrot.lane.b32.xlu0 %v3480_v37, %s3291_s23 }
  0x5d   :  { %337 = vrot.lane.b32.xlu1 %v3494_v41, %s3291_s23  ;;  %335 = vrot.lane.b32.xlu0 %v3496_v42, %s3291_s23 }
  0x61   :  { %350 = vrot.lane.b32.xlu1 %v3463_v31, %s3292_s28  ;;  %348 = vrot.lane.b32.xlu0 %v3455_v29, %s3292_s28 }
  0x65   :  { %354 = vrot.lane.b32.xlu1 %v3461_v30, %s3292_s28  ;;  %352 = vrot.lane.b32.xlu0 %v3453_v28, %s3292_s28 }
  0x69   :  { %358 = vrot.lane.b32.xlu1 %v3478_v36, %s3292_s28  ;;  %356 = vrot.lane.b32.xlu0 %v3480_v37, %s3292_s28 }
  0x6d   :  { %362 = vrot.lane.b32.xlu1 %v3494_v41, %s3292_s28  ;;  %360 = vrot.lane.b32.xlu0 %v3496_v42, %s3292_s28 }
  0x71   :  { %542 = vperm.xlu1 %3074, %v3415_v3   ;;  %606 = vperm.xlu0 %3076, %v3415_v3  }
  0x75   :  { %3075 = vset.pattern.permute.xlu1 %v6024_v10  ;;  %3078 = vset.pattern.permute.xlu0 %v6033_v43 }
  0x76   :  { %602 = vperm.xlu1 %3075, %v3417_v4   ;;  %730 = vperm.xlu0 %3078, %v3417_v4  }
  0x7a   :  { %3077 = vset.pattern.permute.xlu1 %v6031_v44  ;;  %563 = vrot.lane.b32.xlu0 %v3463_v31, %s3295_s1  ;;  %v124_v44 = vadd.s32 128, %v3589_v58 }
  0x7b   :  { %666 = vperm.xlu1 %3077, %v3417_v4   ;;  %3081 = vset.pattern.permute.xlu0 %v6026_v45 }
  0x7e   :  { %567 = vrot.lane.b32.xlu0 %v3461_v30, %s3295_s1 }
  0x7f   :  { %670 = vperm.xlu1 %3077, %v3415_v3  }
  0x82   :  { %571 = vrot.lane.b32.xlu0 %v3478_v36, %s3295_s1 }
  0x83   :  { %3079 = vset.pattern.permute.xlu1 %v6033_v43 }
  0x84   :  { %734 = vperm.xlu1 %3079, %v3415_v3  }
  0x86   :  { %575 = vrot.lane.b32.xlu0 %v3494_v41, %s3295_s1 }
  0x88   :  { %561 = vrot.lane.b32.xlu1 %v3455_v29, %s3295_s1 }
  0x89   :  { %3080 = vset.pattern.permute.xlu1 %v6026_v45 }
  0x8a   :  { %774 = vperm.xlu0 %3081, %v3415_v3  }
  0x8c   :  { %565 = vrot.lane.b32.xlu1 %v3453_v28, %s3295_s1 }
  0x8e   :  { %629 = vrot.lane.b32.xlu0 %v3453_v28, %s3297_s16 }
  0x8f   :  { %3082 = vset.pattern.permute.xlu0 %v6023_v46 }
  0x90   :  { %569 = vrot.lane.b32.xlu1 %v3480_v37, %s3295_s1 }
  0x92   :  { %633 = vrot.lane.b32.xlu0 %v3480_v37, %s3297_s16 }
  0x94   :  { %573 = vrot.lane.b32.xlu1 %v3496_v42, %s3295_s1 }
  0x96   :  { %637 = vrot.lane.b32.xlu0 %v3496_v42, %s3297_s16 }
  0x98   :  { %770 = vperm.xlu1 %3080, %v3417_v4  }
  0x9a   :  { %834 = vperm.xlu0 %3082, %v3417_v4  }
  0x9c   :  { %625 = vrot.lane.b32.xlu1 %v3455_v29, %s3297_s16 }
  0x9d   :  { %3084 = vset.pattern.permute.xlu1 %v6023_v46 }
  0x9e   :  { %3083 = vset.pattern.permute.xlu0 %v6029_v2 }
  0x9f   :  { %437 = vperm.xlu0 %3083, %v3415_v3  }
  0xa0   :  { %627 = vrot.lane.b32.xlu1 %v3463_v31, %s3297_s16 }
  0xa4   :  { %631 = vrot.lane.b32.xlu1 %v3461_v30, %s3297_s16 }
  0xa8   :  { %635 = vrot.lane.b32.xlu1 %v3478_v36, %s3297_s16 }
  0xab   :  { %v3570_v47 = vpop.permute.xlu1 %380  ;;  %v3579_v50 = vpop.permute.xlu0 %375 }
  0xac   :  { %639 = vrot.lane.b32.xlu1 %v3494_v41, %s3297_s16 }
  0xb0   :  { %838 = vperm.xlu1 %3084, %v3415_v3   ;;  %v3576_v49 = vpop.permute.xlu1 %433  ;;  %v3584_v52 = vpop.permute.xlu0 %538 }
  0xb1   :  { %6140 = vst [vmem:[#allocation14_spill] sm:$0xff] %v3576_v49  ;;  %6141 = vst [vmem:[#allocation15_spill] sm:$0xff] %v3584_v52 }
  0xb4   :  { %3085 = vset.pattern.permute.xlu1 %v6029_v2  ;;  %v3788_v2 = vld [vmem:[%s6011_s6 + $0x10] sm:$0xff] }
  0xb5   :  { %859 = vperm.xlu1 %3085, %v321_v48   ;;  %v3581_v51 = vpop.permute.xlu1 %473 }
  0xb9   :  { %3086 = vset.pattern.permute.xlu1 %v6042_v1  ;;  %v3586_v53 = vpop.permute.xlu1 %477 }
  0xc3   :  { %v328_v54 = vpop.permute.xlu1 %327  ;;  %v324_v55 = vpop.permute.xlu0 %323 }
  0xc4   :  { %v3610_v4 = vsel %vm6060_vm1, %v324_v55, %v328_v54 }
  0xc7   :  { %v330_v56 = vpop.permute.xlu1 %329  ;;  %v326_v57 = vpop.permute.xlu0 %325 }
  0xc8   :  { %v3606_v3 = vsel %vm6060_vm1, %v326_v57, %v330_v56 }
  0xcb   :  { %v334_v59 = vpop.permute.xlu1 %333  ;;  %v332_v60 = vpop.permute.xlu0 %331 }
  0xcc   :  { %v3618_v5 = vsel %vm6060_vm1, %v330_v56, %v334_v59  ;;  %v3622_v6 = vsel %vm6060_vm1, %v328_v54, %v332_v60 }
  0xcf   :  { %v338_v61 = vpop.permute.xlu1 %337  ;;  %v336_v62 = vpop.permute.xlu0 %335 }
  0xd0   :  { %v3594_v63 = vsel %vm6060_vm1, %v338_v61, %v326_v57  ;;  %v3598_v0 = vsel %vm6060_vm1, %v336_v62, %v324_v55  ;;  %v3630_v11 = vsel %vm6060_vm1, %v334_v59, %v338_v61  ;;  %v3634_v12 = vsel %vm6060_vm1, %v332_v60, %v336_v62  ;;  %v322_v57 = vld [vmem:[%s6008_s3 + $0x8] sm:$0xff]  ;;  %s3301_s3 = smov 123  }
  0xd1   :  { %393 = vrot.lane.b32.xlu0 %v3594_v63, %s3295_s1  ;;  %391 = vrot.lane.b32.xlu1 %v3598_v0, %s3295_s1 }
  0xd3   :  { %v351_v7 = vpop.permute.xlu1 %350  ;;  %v349_v16 = vpop.permute.xlu0 %348 }
  0xd5   :  { %397 = vrot.lane.b32.xlu0 %v3606_v3, %s3295_s1  ;;  %395 = vrot.lane.b32.xlu1 %v3610_v4, %s3295_s1 }
  0xd7   :  { %v355_v15 = vpop.permute.xlu1 %354  ;;  %v353_v20 = vpop.permute.xlu0 %352 }
  0xd8   :  { %v3659_v22 = vsel %vm6055_vm2, %v349_v16, %v353_v20  ;;  %v3663_v24 = vsel %vm6055_vm2, %v351_v7, %v355_v15 }
  0xd9   :  { %401 = vrot.lane.b32.xlu0 %v3618_v5, %s3295_s1  ;;  %399 = vrot.lane.b32.xlu1 %v3622_v6, %s3295_s1  ;;  %6142 = vst [vmem:[#allocation16_spill] sm:$0xff] %v3659_v22  ;;  %6143 = vst [vmem:[#allocation17_spill] sm:$0xff] %v3663_v24 }
  0xdb   :  { %v359_v19 = vpop.permute.xlu1 %358  ;;  %v357_v23 = vpop.permute.xlu0 %356 }
  0xdc   :  { %v3673_v27 = vsel %vm6055_vm2, %v353_v20, %v357_v23  ;;  %v3677_v32 = vsel %vm6055_vm2, %v355_v15, %v359_v19  ;;  %v940_v15 = vld [vmem:[%s6010_s5] sm:$0xff] }
  0xdd   :  { %405 = vrot.lane.b32.xlu0 %v3630_v11, %s3295_s1  ;;  %403 = vrot.lane.b32.xlu1 %v3634_v12, %s3295_s1 }
  0xdf   :  { %v363_v21 = vpop.permute.xlu1 %362  ;;  %v361_v34 = vpop.permute.xlu0 %360 }
  0xe0   :  { %v3687_v38 = vsel %vm6055_vm2, %v357_v23, %v361_v34  ;;  %v3691_v39 = vsel %vm6055_vm2, %v359_v19, %v363_v21  ;;  %v3701_v48 = vsel %vm6055_vm2, %v363_v21, %v351_v7  ;;  %v3705_v54 = vsel %vm6055_vm2, %v361_v34, %v349_v16 }
  0xe1   :  { %496 = vrot.lane.b32.xlu0 %v3598_v0, %s3297_s16  ;;  %498 = vrot.lane.b32.xlu1 %v3594_v63, %s3297_s16 }
  0xe5   :  { %500 = vrot.lane.b32.xlu0 %v3610_v4, %s3297_s16  ;;  %502 = vrot.lane.b32.xlu1 %v3606_v3, %s3297_s16 }
  0xe9   :  { %504 = vrot.lane.b32.xlu0 %v3622_v6, %s3297_s16  ;;  %506 = vrot.lane.b32.xlu1 %v3618_v5, %s3297_s16 }
  0xed   :  { %508 = vrot.lane.b32.xlu0 %v3634_v12, %s3297_s16  ;;  %510 = vrot.lane.b32.xlu1 %v3630_v11, %s3297_s16 }
  0xf0   :  { %v3665_v26 = vpop.permute.xlu1 %542  ;;  %v3707_v55 = vpop.permute.xlu0 %606 }
  0xf1   :  { %6144 = vst [vmem:[#allocation18_spill] sm:$0xff] %v3665_v26  ;;  %691 = vrot.lane.b32.xlu0 %v3663_v24, %s3295_s1  ;;  %689 = vrot.lane.b32.xlu1 %v3659_v22, %s3295_s1 }
  0xf5   :  { %695 = vrot.lane.b32.xlu0 %v3677_v32, %s3295_s1  ;;  %693 = vrot.lane.b32.xlu1 %v3673_v27, %s3295_s1  ;;  %v3683_v35 = vpop.permute.xlu1 %602  ;;  %v3720_v59 = vpop.permute.xlu0 %730 }
  0xf6   :  { %6146 = vst [vmem:[#allocation20_spill] sm:$0xff] %v3720_v59 }
  0xf9   :  { %699 = vrot.lane.b32.xlu0 %v3691_v39, %s3295_s1  ;;  %697 = vrot.lane.b32.xlu1 %v3687_v38, %s3295_s1  ;;  %v3730_v62 = vpop.permute.xlu0 %563 }
  0xfa   :  { %v3697_v40 = vpop.permute.xlu1 %666 }
  0xfd   :  { %703 = vrot.lane.b32.xlu0 %v3701_v48, %s3295_s1  ;;  %701 = vrot.lane.b32.xlu1 %v3705_v54, %s3295_s1  ;;  %v3745_v16 = vpop.permute.xlu0 %567 }
  0xfe   :  { %v3713_v56 = vpop.permute.xlu1 %670 }
  0xff   :  { %6145 = vst [vmem:[#allocation19_spill] sm:$0xff] %v3713_v56 }
 0x101   :  { %864 = vperm.xlu0 %3083, %v322_v57   ;;  %793 = vrot.lane.b32.xlu1 %v3659_v22, %s3297_s16  ;;  %v3753_v21 = vpop.permute.xlu0 %571  ;;  %v3814_v22 = vand.u32 255, %v3589_v58 }
 0x103   :  { %v3722_v60 = vpop.permute.xlu1 %734  ;;  %6156 = vst [vmem:[#allocation29_spill] sm:$0xff] %v3814_v22  ;;  %vm6066_vm3 = vcmp.ge.s32.totalorder %v3814_v22, 16 }
 0x104   :  { %6147 = vst [vmem:[#allocation21_spill] sm:$0xff] %v3722_v60  ;;  %v3816_v60 = vand.u32 255, %v125_v18  ;;  %v6160_v18 = vmov 6  }
 0x105   :  { %797 = vrot.lane.b32.xlu0 %v3673_v27, %s3297_s16  ;;  %795 = vrot.lane.b32.xlu1 %v3663_v24, %s3297_s16  ;;  %v3758_v34 = vpop.permute.xlu0 %575  ;;  %v126_v24 = vadd.s32 384, %v3589_v58 }
 0x106   :  { %6157 = vst [vmem:[#allocation30_spill] sm:$0xff] %v3816_v60  ;;  %vm6071_vm4 = vcmp.ge.s32.totalorder %v3816_v60, 16 }
 0x107   :  { %v3728_v61 = vpop.permute.xlu1 %561  ;;  %v3818_v59 = vand.u32 255, %v126_v24  ;;  %v3852_v24 = vmul.f32 %v3570_v47, %v3463_v31  ;;  %v3873_v31 = vmul.f32 %v3579_v50, %v3455_v29  ;;  %v3889_v29 = vmul.f32 %v3579_v50, %v3480_v37 }
 0x108   :  { %v464_v37 = vsel %vm6066_vm3, %v3598_v0, 0.0 }
 0x109   :  { %801 = vrot.lane.b32.xlu0 %v3687_v38, %s3297_s16  ;;  %799 = vrot.lane.b32.xlu1 %v3677_v32, %s3297_s16  ;;  %v3762_v13 = vpop.permute.xlu0 %774  ;;  %6158 = vst [vmem:[#allocation31_spill] sm:$0xff] %v3818_v59  ;;  %vm6079_vm6 = vcmp.lt.s32.totalorder %v3818_v59, 240  ;;  %6162 = vst [vmem:[#allocation33_spill] sm:$0xff] %v3852_v24  ;;  %v3954_v24 = vmul.f32 %v3581_v51, %v464_v37 }
 0x10a   :  { %6149 = vst [vmem:[#allocation23_spill] sm:$0xff] %v3762_v13 }
 0x10b   :  { %v3736_v7 = vpop.permute.xlu1 %565 }
 0x10d   :  { %805 = vrot.lane.b32.xlu0 %v3705_v54, %s3297_s16  ;;  %803 = vrot.lane.b32.xlu1 %v3691_v39, %s3297_s16 }
 0x10f   :  { %v3747_v19 = vpop.permute.xlu1 %569 }
 0x110   :  { %v579_v37 = vsel %vm6127_vm8, %v3736_v7, %v3747_v19 }
 0x111   :  { %947 = vperm.xlu0 %3083, %v940_v15   ;;  %807 = vrot.lane.b32.xlu1 %v3701_v48, %s3297_s16  ;;  %v3766_v15 = vpop.permute.xlu0 %629 }
 0x113   :  { %v3751_v20 = vpop.permute.xlu1 %573 }
 0x115   :  { %3088 = vset.pattern.permute.xlu0 %v6024_v10  ;;  %v3770_v17 = vpop.permute.xlu0 %633  ;;  %v3777_v10 = vld [vmem:[%s6011_s6 + $0x8] sm:$0xff] }
 0x116   :  { %1369 = vperm.xlu1 %3086, %v3777_v10   ;;  %1465 = vperm.xlu0 %3088, %v3777_v10  }
 0x117   :  { %v3756_v23 = vpop.permute.xlu1 %770 }
 0x118   :  { %6148 = vst [vmem:[#allocation22_spill] sm:$0xff] %v3756_v23 }
 0x119   :  { %v3781_v45 = vpop.permute.xlu0 %637 }
 0x11a   :  { %3087 = vset.pattern.permute.xlu1 %v6040_v9  ;;  %3091 = vset.pattern.permute.xlu0 %v6042_v1  ;;  %v3804_v9 = vld [vmem:[%s6011_s6 + $0x18] sm:$0xff]  ;;  %v1102_v1 = vld [vmem:[%s6011_s6] sm:$0xff] }
 0x11b   :  { %v3760_v57 = vpop.permute.xlu1 %625  ;;  %1409 = vperm.xlu1 %3087, %v3777_v10   ;;  %1834 = vperm.xlu0 %3091, %v3788_v2  }
 0x11d   :  { %v3795_v14 = vpop.permute.xlu0 %834 }
 0x11e   :  { %6153 = vst [vmem:[#allocation27_spill] sm:$0xff] %v3795_v14  ;;  %v6155_v14 = vmov 4  }
 0x11f   :  { %v3764_v33 = vpop.permute.xlu1 %627  ;;  %3089 = vset.pattern.permute.xlu1 %v6155_v14  ;;  %2339 = vperm.xlu0 %3091, %v3804_v9   ;;  %v3831_v14 = vand.u32 15, %v3816_v60 }
 0x120   :  { %1106 = vperm.xlu1 %3089, %v1102_v1   ;;  %v6161_v1 = vmov 5  }
 0x121   :  { %v3825_v56 = vpop.permute.xlu0 %437  ;;  %vm6073_vm9 = vcmp.ge.s32.totalorder %v3831_v14, 1  ;;  %vm6075_vm14 = vcmp.lt.s32.totalorder %v3831_v14, 15 }
 0x122   :  { %vm4058_vm2 = vmand %vm6071_vm4, %vm6073_vm9 }
 0x123   :  { %v3768_v25 = vpop.permute.xlu1 %631  ;;  %3097 = vset.pattern.permute.xlu0 %v6160_v18  ;;  %v3860_v18 = vmul.f32 %v3570_v47, %v3478_v36  ;;  %v470_v36 = vsel %vm6071_vm4, %v3618_v5, 0.0  ;;  %v582_v5 = vsel %vm6127_vm8, %v3730_v62, %v3745_v16 }
 0x124   :  { %3090 = vset.pattern.permute.xlu1 %v6161_v1  ;;  %1521 = vperm.xlu0 %3097, %v3777_v10   ;;  %v3864_v1 = vmul.f32 %v3570_v47, %v3494_v41  ;;  %v466_v41 = vsel %vm6071_vm4, %v3622_v6, 0.0  ;;  %v6164_v6 = vmov 0  }
 0x125   :  { %1493 = vperm.xlu1 %3090, %v3777_v10   ;;  %v3924_v0 = vmul.f32 %v3581_v51, %v466_v41 }
 0x126   :  { %6163 = vst [vmem:[#allocation34_spill] sm:$0xff] %v3864_v1  ;;  %v3908_v1 = vmul.f32 %v3586_v53, %v3606_v3  ;;  %v578_v3 = vsel %vm6127_vm8, %v3753_v21, %v3758_v34 }
 0x127   :  { %v3772_v46 = vpop.permute.xlu1 %635  ;;  %6165 = vst [vmem:[#allocation35_spill] sm:$0xff] %v3924_v0  ;;  %v3944_v0 = vmul.f32 %v3586_v53, %v3630_v11 }
 0x128   :  { %6150 = vst [vmem:[#allocation24_spill] sm:$0xff] %v3772_v46  ;;  %2036 = vperm.xlu0 %3097, %v3788_v2  }
 0x129   :  { %3092 = vset.pattern.permute.xlu1 %v6164_v6 }
 0x12a   :  { %1867 = vperm.xlu1 %3092, %v3788_v2  }
 0x12b   :  { %v3783_v8 = vpop.permute.xlu1 %639 }
 0x12c   :  { %6151 = vst [vmem:[#allocation25_spill] sm:$0xff] %v3783_v8  ;;  %v3834_v8 = vand.u32 15, %v3818_v59 }
 0x12e   :  { %vm6074_vm11 = vcmp.ge.s32.totalorder %v3834_v8, 1  ;;  %vm6078_vm0 = vcmp.lt.s32.totalorder %v3834_v8, 15 }
 0x12f   :  { %v3793_v43 = vpop.permute.xlu1 %838 }
 0x130   :  { %6152 = vst [vmem:[#allocation26_spill] sm:$0xff] %v3793_v43  ;;  %v3809_v43 = vand.u32 255, %v124_v44  ;;  %v3828_v44 = vand.u32 15, %v3814_v22  ;;  %v6197_v22 = vld [vmem:[#allocation34_spill] sm:$0xff] }
 0x132   :  { %6154 = vst [vmem:[#allocation28_spill] sm:$0xff] %v3809_v43  ;;  %v3821_v52 = vand.u32 15, %v3809_v43  ;;  %vm228_vm5 = vcmp.lt.s32.totalorder %v3809_v43, 240  ;;  %vm6064_vm10 = vcmp.ge.s32.totalorder %v3828_v44, 1  ;;  %vm6077_vm15 = vcmp.lt.s32.totalorder %v3828_v44, 15 }
 0x133   :  { %vm4121_vm1 = vmand %vm6066_vm3, %vm6064_vm10 }
 0x134   :  { %v3823_v26 = vpop.permute.xlu1 %859  ;;  %vm6072_vm7 = vcmp.ge.s32.totalorder %v3821_v52, 1  ;;  %vm6076_vm13 = vcmp.lt.s32.totalorder %v3821_v52, 15 }
 0x135   :  { %6159 = vst [vmem:[#allocation32_spill] sm:$0xff] %v3823_v26  ;;  %v3856_v26 = vmul.f32 %v3570_v47, %v3461_v30  ;;  %v3877_v30 = vmul.f32 %v3579_v50, %v3453_v28  ;;  %v3893_v28 = vmul.f32 %v3579_v50, %v3496_v42  ;;  %v468_v47 = vsel %vm6066_vm3, %v3594_v63, 0.0 }
 0x136   :  { %v3912_v42 = vmul.f32 %v3581_v51, %v3610_v4  ;;  %v580_v50 = vsel %vm6127_vm8, %v3745_v16, %v3753_v21  ;;  %v3921_v63 = vmul.f32 %v3586_v53, %v470_v36  ;;  %v584_v4 = vsel %vm6127_vm8, %v3758_v34, %v3730_v62  ;;  %v1103_v36 = vld [vmem:[%s6012_s7] sm:$0xff] }
 0x137   :  { %v3940_v41 = vmul.f32 %v3586_v53, %v468_v47  ;;  %v3948_v21 = vmul.f32 %v3581_v51, %v3634_v12  ;;  %v598_v62 = vsel %vm6072_vm7, %v582_v5, 0.0  ;;  %v6166_v34 = vmov 2   ;;  %1115 = vperm.xlu1 %3092, %v1103_v36  }
 0x138   :  { %3099 = vset.pattern.permute.xlu0 %v6166_v34  ;;  %v766_v47 = vsel %vm228_vm5, %v3677_v32, 0.0  ;;  %v762_v53 = vsel %vm228_vm5, %v3673_v27, 0.0  ;;  %v599_v11 = vsel %vm6073_vm9, %v580_v50, 0.0  ;;  %v3969_v51 = vsel %vm6079_vm6, %v3701_v48, 0.0 }
 0x139   :  { %1437 = vperm.xlu0 %3099, %v3777_v10   ;;  %6167 = vst [vmem:[#allocation36_spill] sm:$0xff] %v3969_v51  ;;  %v597_v12 = vsel %vm6064_vm10, %v584_v4, 0.0  ;;  %v600_v32 = vsel %vm6074_vm11, %v578_v3, 0.0  ;;  %v581_v27 = vsel %vm6127_vm8, %v3728_v61, %v3736_v7  ;;  %v3982_v5 = vsel %vm6079_vm6, %v3705_v54, 0.0 }
 0x13a   :  { %6168 = vst [vmem:[#allocation37_spill] sm:$0xff] %v3982_v5  ;;  %v3985_v48 = vmul.f32 %v3707_v55, %v598_v62  ;;  %v643_v50 = vsel %vm6129_vm12, %v3766_v15, %v3770_v17  ;;  %v3996_v36 = vmul.f32 %v3707_v55, %v599_v11  ;;  %v577_v54 = vsel %vm6127_vm8, %v3747_v19, %v3751_v20 }
 0x13b   :  { %v583_v7 = vsel %vm6127_vm8, %v3751_v20, %v3728_v61  ;;  %v641_v62 = vsel %vm6129_vm12, %v3770_v17, %v3781_v45  ;;  %v4011_v34 = vmul.f32 %v3707_v55, %v597_v12  ;;  %v4014_v11 = vmul.f32 %v3707_v55, %v600_v32 }
 0x13c   :  { %v594_v51 = vsel %vm6072_vm7, %v581_v27, 0.0  ;;  %v4023_v61 = vmul.f32 %v3762_v13, %v766_v47  ;;  %v595_v17 = vsel %vm6073_vm9, %v579_v37, 0.0  ;;  %v658_v20 = vsel %vm6076_vm13, %v643_v50, 0.0 }
 0x13d   :  { %1928 = vperm.xlu0 %3099, %v3788_v2   ;;  %v645_v55 = vsel %vm6129_vm12, %v3760_v57, %v3766_v15  ;;  %v6170_v12 = vmov 1   ;;  %v593_v32 = vsel %vm6064_vm10, %v583_v7, 0.0  ;;  %v596_v47 = vsel %vm6074_vm11, %v577_v54, 0.0  ;;  %vm4196_vm10 = vmand %vm6066_vm3, %vm6077_vm15 }
 0x13e   :  { %6169 = vst [vmem:[#allocation38_spill] sm:$0xff] %v4023_v61  ;;  %3093 = vset.pattern.permute.xlu1 %v6170_v12  ;;  %v659_v27 = vsel %vm6075_vm14, %v641_v62, 0.0  ;;  %v4047_v15 = vmul.f32 %v3762_v13, %v3691_v39  ;;  %v4050_v7 = vmul.f32 %v3683_v35, %v594_v51  ;;  %v6172_v62 = vmov 0  ;;  %vm4223_vm3 = vmand %vm6071_vm4, %vm6075_vm14 }
 0x13f   :  { %1891 = vperm.xlu1 %3093, %v3788_v2   ;;  %v6173_v62 = vsel %vm4058_vm2, 4294967295, %v6172_v62  ;;  %v4065_v39 = vmul.f32 %v3683_v35, %v595_v17  ;;  %v4068_v51 = vmul.f32 %v3697_v40, %v658_v20  ;;  %v657_v13 = vsel %vm6077_vm15, %v645_v55, 0.0  ;;  %vm4289_vm4 = vmand %vm228_vm5, %vm6072_vm7 }
 0x140   :  { %6171 = vst [vmem:[#allocation39_spill] sm:$0xff] %v4047_v15  ;;  %6174 = vst [vmem:[#allocation40_spill] sm:$0xff] %v6173_v62  ;;  %v4078_v15 = vmul.f32 %v3683_v35, %v593_v32  ;;  %v4084_v17 = vmul.f32 %v3697_v40, %v659_v27  ;;  %v4089_v59 = vmul.f32 %v3756_v23, %v762_v53 }
 0x141   :  { %2433 = vperm.xlu0 %3099, %v3804_v9   ;;  %v4105_v53 = vmul.f32 %v3756_v23, %v3687_v38  ;;  %v6181_v38 = vmov 0 }
 0x142   :  { %6175 = vst [vmem:[#allocation41_spill] sm:$0xff] %v4084_v17  ;;  %6176 = vst [vmem:[#allocation42_spill] sm:$0xff] %v4089_v59  ;;  %v6182_v38 = vsel %vm4121_vm1, 4294967295, %v6181_v38 }
 0x143   :  { %v3867_v46 = vpop.permute.xlu1 %391  ;;  %v3869_v49 = vpop.permute.xlu0 %393  ;;  %6178 = vst [vmem:[#allocation43_spill] sm:$0xff] %v4105_v53  ;;  %v6185_v53 = vld [vmem:[#allocation24_spill] sm:$0xff] }
 0x147   :  { %v3934_v16 = vpop.permute.xlu1 %395  ;;  %v398_v6 = vpop.permute.xlu0 %397 }
 0x148   :  { %v413_v19 = vsel %vm6127_vm8, %v3869_v49, %v398_v6  ;;  %v412_v37 = vsel %vm6127_vm8, %v3867_v46, %v3934_v16 }
 0x149   :  { %v429_v54 = vsel %vm6072_vm7, %v413_v19, 0.0  ;;  %v647_v19 = vsel %vm6129_vm12, %v3781_v45, %v3760_v57  ;;  %v425_v20 = vsel %vm6072_vm7, %v412_v37, 0.0  ;;  %v646_v45 = vsel %vm6129_vm12, %v3764_v33, %v3768_v25  ;;  %vm4333_vm7 = vmand %vm6079_vm6, %vm6074_vm11 }
 0x14a   :  { %v445_v57 = vmul.f32 %v3825_v56, %v429_v54  ;;  %v660_v27 = vsel %vm6078_vm0, %v647_v19, 0.0  ;;  %v4110_v37 = vmul.f32 %v3697_v40, %v657_v13  ;;  %v6180_v54 = vld [vmem:[#allocation14_spill] sm:$0xff]  ;;  %v661_v23 = vsel %vm6077_vm15, %v646_v45, 0.0 }
 0x14b   :  { %v400_v3 = vpop.permute.xlu1 %399  ;;  %v402_v4 = vpop.permute.xlu0 %401  ;;  %v441_v59 = vmul.f32 %v6180_v54, %v425_v20  ;;  %6183 = vst [vmem:[#allocation14_spill] sm:$0xff] %v6182_v38  ;;  %v6184_v20 = vmov 8  }
 0x14c   :  { %v411_v61 = vsel %vm6127_vm8, %v398_v6, %v402_v4  ;;  %v4081_v6 = vmul.f32 %v3683_v35, %v596_v47  ;;  %v6177_v47 = vmov 7   ;;  %6179 = vst [vmem:[#allocation44_spill] sm:$0xff] %v4110_v37  ;;  %3102 = vset.pattern.permute.xlu0 %v6184_v20  ;;  %v453_v45 = vadd.f32 %v445_v57, %v3856_v26  ;;  %v6188_v26 = vld [vmem:[#allocation19_spill] sm:$0xff] }
 0x14d   :  { %v430_v35 = vsel %vm4058_vm2, %v411_v61, 0.0  ;;  %3094 = vset.pattern.permute.xlu1 %v6177_v47  ;;  %v410_v61 = vsel %vm6127_vm8, %v3934_v16, %v400_v3  ;;  %v644_v47 = vsel %vm6129_vm12, %v3768_v25, %v6185_v53  ;;  %1565 = vperm.xlu0 %3102, %v3777_v10   ;;  %v4166_v57 = vmul.f32 %v6188_v26, %v661_v23 }
 0x14e   :  { %1537 = vperm.xlu1 %3094, %v3777_v10   ;;  %v426_v25 = vsel %vm4058_vm2, %v410_v61, 0.0  ;;  %v4170_v61 = vsel %vm6076_vm13, %v644_v47, 0.0 }
 0x14f   :  { %v404_v50 = vpop.permute.xlu1 %403  ;;  %v406_v5 = vpop.permute.xlu0 %405  ;;  %v442_v23 = vmul.f32 %v6180_v54, %v426_v25  ;;  %v6191_v25 = vmov 5  }
 0x150   :  { %v408_v13 = vsel %vm6127_vm8, %v400_v3, %v404_v50  ;;  %v414_v19 = vsel %vm6127_vm8, %v404_v50, %v3867_v46  ;;  %v415_v16 = vsel %vm6127_vm8, %v406_v5, %v3869_v49  ;;  %v446_v3 = vmul.f32 %v3825_v56, %v430_v35  ;;  %v6186_v46 = vld [vmem:[#allocation25_spill] sm:$0xff] }
 0x151   :  { %v409_v37 = vsel %vm6127_vm8, %v402_v4, %v406_v5  ;;  %v642_v49 = vsel %vm6129_vm12, %v6185_v53, %v6186_v46  ;;  %v648_v50 = vsel %vm6129_vm12, %v6186_v46, %v3764_v33  ;;  %v4156_v5 = vmul.f32 %v3697_v40, %v660_v27  ;;  %2096 = vperm.xlu0 %3102, %v3788_v2  }
 0x152   :  { %v424_v4 = vsel %vm4121_vm1, %v414_v19, 0.0  ;;  %v427_v53 = vsel %vm6074_vm11, %v408_v13, 0.0  ;;  %v428_v17 = vsel %vm4121_vm1, %v415_v16, 0.0  ;;  %v6187_v33 = vmov 3  }
 0x153   :  { %v4098_v55 = vpop.permute.xlu1 %498  ;;  %v4100_v32 = vpop.permute.xlu0 %496  ;;  %3095 = vset.pattern.permute.xlu1 %v6187_v33  ;;  %v449_v40 = vadd.f32 %v441_v59, %v3877_v30  ;;  %v431_v27 = vsel %vm6074_vm11, %v409_v37, 0.0  ;;  %v4178_v13 = vsel %vm6075_vm14, %v642_v49, 0.0  ;;  %v4182_v19 = vsel %vm6078_vm0, %v648_v50, 0.0 }
 0x154   :  { %1964 = vperm.xlu1 %3095, %v3788_v2   ;;  %v454_v47 = vadd.f32 %v446_v3, %v3860_v18  ;;  %v440_v59 = vmul.f32 %v6180_v54, %v424_v4  ;;  %v443_v30 = vmul.f32 %v6180_v54, %v427_v53  ;;  %v444_v37 = vmul.f32 %v3825_v56, %v428_v17 }
 0x155   :  { %v493_v46 = vadd.f32 %v3908_v1, %v453_v45  ;;  %v447_v38 = vmul.f32 %v3825_v56, %v431_v27  ;;  %v489_v50 = vadd.f32 %v3912_v42, %v449_v40  ;;  %v450_v4 = vadd.f32 %v442_v23, %v3889_v29  ;;  %v6193_v27 = vld [vmem:[#allocation15_spill] sm:$0xff]  ;;  %v6196_v23 = vld [vmem:[#allocation33_spill] sm:$0xff]  ;;  %2601 = vperm.xlu0 %3102, %v3804_v9  }
 0x156   :  { %v494_v42 = vadd.f32 %v3921_v63, %v454_v47  ;;  %v448_v40 = vadd.f32 %v440_v59, %v3873_v31  ;;  %v451_v29 = vadd.f32 %v443_v30, %v3893_v28 }
 0x157   :  { %v503_v35 = vpop.permute.xlu1 %502  ;;  %v501_v20 = vpop.permute.xlu0 %500  ;;  %v455_v60 = vadd.f32 %v447_v38, %v6197_v22 }
 0x158   :  { %v518_v54 = vsel %vm6129_vm12, %v4098_v55, %v503_v35  ;;  %v517_v56 = vsel %vm6129_vm12, %v4100_v32, %v501_v20  ;;  %3096 = vset.pattern.permute.xlu1 %v6191_v25 }
 0x159   :  { %2000 = vperm.xlu1 %3096, %v3788_v2   ;;  %v529_v63 = vsel %vm4196_vm10, %v517_v56, 0.0 }
 0x15a   :  { %v545_v56 = vmul.f32 %v6193_v27, %v529_v63  ;;  %v495_v63 = vadd.f32 %v3944_v0, %v455_v60 }
 0x15b   :  { %v507_v16 = vpop.permute.xlu1 %506  ;;  %v505_v49 = vpop.permute.xlu0 %504 }
 0x15c   :  { %v516_v17 = vsel %vm6129_vm12, %v503_v35, %v507_v16  ;;  %v515_v1 = vsel %vm6129_vm12, %v501_v20, %v505_v49  ;;  %v6192_v35 = vld [vmem:[#allocation18_spill] sm:$0xff] }
 0x15d   :  { %v534_v3 = vsel %vm6076_vm13, %v516_v17, 0.0  ;;  %v530_v45 = vsel %vm6076_vm13, %v515_v1, 0.0  ;;  %v452_v17 = vadd.f32 %v444_v37, %v6196_v23  ;;  %v533_v1 = vsel %vm4196_vm10, %v518_v54, 0.0 }
 0x15e   :  { %v550_v53 = vmul.f32 %v6192_v35, %v534_v3  ;;  %v546_v62 = vmul.f32 %v6193_v27, %v530_v45  ;;  %v549_v38 = vmul.f32 %v6192_v35, %v533_v1  ;;  %v2990_v1 = vld [vmem:[%s6012_s7 + $0x8] sm:$0xff] }
 0x15f   :  { %v511_v3 = vpop.permute.xlu1 %510  ;;  %v509_v45 = vpop.permute.xlu0 %508 }
 0x160   :  { %v514_v47 = vsel %vm6129_vm12, %v507_v16, %v511_v3  ;;  %v520_v31 = vsel %vm6129_vm12, %v511_v3, %v4098_v55  ;;  %v513_v30 = vsel %vm6129_vm12, %v505_v49, %v509_v45  ;;  %v519_v22 = vsel %vm6129_vm12, %v509_v45, %v4100_v32 }
 0x161   :  { %v535_v28 = vsel %vm4223_vm3, %v514_v47, 0.0  ;;  %v536_v59 = vsel %vm6078_vm0, %v520_v31, 0.0  ;;  %v558_v37 = vadd.f32 %v550_v53, %v493_v46  ;;  %v554_v16 = vadd.f32 %v546_v62, %v489_v50  ;;  %v6199_v46 = vld [vmem:[#allocation35_spill] sm:$0xff] }
 0x162   :  { %v551_v54 = vmul.f32 %v6192_v35, %v535_v28  ;;  %v6198_v55 = vmov 0   ;;  %v552_v23 = vmul.f32 %v6192_v35, %v536_v59  ;;  %v531_v3 = vsel %vm4223_vm3, %v513_v30, 0.0 }
 0x163   :  { %3098 = vset.pattern.permute.xlu1 %v6198_v55  ;;  %v532_v49 = vsel %vm6078_vm0, %v519_v22, 0.0  ;;  %v4261_v47 = vpop.permute.xlu1 %689  ;;  %v4263_v32 = vpop.permute.xlu0 %691  ;;  %3107 = vset.pattern.permute.xlu0 %v6198_v55  ;;  %v488_v62 = vadd.f32 %v3954_v24, %v448_v40  ;;  %v490_v50 = vadd.f32 %v6199_v46, %v450_v4  ;;  %v547_v35 = vmul.f32 %v6193_v27, %v531_v3  ;;  %v3007_v24 = vld [vmem:[%s6012_s7 + $0x10] sm:$0xff] }
 0x164   :  { %2372 = vperm.xlu1 %3098, %v3804_v9   ;;  %v548_v53 = vmul.f32 %v6193_v27, %v532_v49  ;;  %1393 = vperm.xlu0 %3107, %v3777_v10   ;;  %v492_v45 = vadd.f32 %v3940_v41, %v452_v17  ;;  %v559_v31 = vadd.f32 %v551_v54, %v494_v42  ;;  %v6200_v10 = vmov 0  ;;  %v6204_v54 = vld [vmem:[#allocation21_spill] sm:$0xff] }
 0x165   :  { %v491_v28 = vadd.f32 %v3948_v21, %v451_v29  ;;  %v678_v4 = vmul.f32 %v6188_v26, %v4170_v61  ;;  %v622_v27 = vadd.f32 %v3985_v48, %v558_v37  ;;  %v618_v40 = vadd.f32 %v4050_v7, %v554_v16 }
 0x166   :  { %v555_v59 = vadd.f32 %v547_v35, %v490_v50  ;;  %v6201_v10 = vsel %vm4289_vm4, 4294967295, %v6200_v10  ;;  %v557_v60 = vadd.f32 %v549_v38, %v492_v45  ;;  %v553_v0 = vadd.f32 %v545_v56, %v488_v62  ;;  %v6206_v45 = vld [vmem:[#allocation31_spill] sm:$0xff] }
 0x167   :  { %6202 = vst [vmem:[#allocation24_spill] sm:$0xff] %v6201_v10  ;;  %v560_v41 = vadd.f32 %v552_v23, %v495_v63  ;;  %v556_v21 = vadd.f32 %v548_v53, %v491_v28  ;;  %v694_v42 = vpop.permute.xlu1 %693  ;;  %v696_v29 = vpop.permute.xlu0 %695  ;;  %v679_v48 = vmul.f32 %v6188_v26, %v4178_v13  ;;  %v680_v7 = vmul.f32 %v6188_v26, %v4182_v19  ;;  %v6203_v19 = vld [vmem:[#allocation20_spill] sm:$0xff] }
 0x168   :  { %1578 = vperm.xlu1 %3098, %v2990_v1   ;;  %v709_v61 = vsel %vm6127_vm8, %v4261_v47, %v694_v42  ;;  %v710_v17 = vsel %vm6127_vm8, %v4263_v32, %v696_v29  ;;  %2109 = vperm.xlu0 %3107, %v3007_v24   ;;  %v623_v30 = vadd.f32 %v3996_v36, %v559_v31  ;;  %v6207_v63 = vmov 0  ;;  %v6210_v31 = vld [vmem:[#allocation38_spill] sm:$0xff] }
 0x169   :  { %v619_v22 = vadd.f32 %v4065_v39, %v555_v59  ;;  %v722_v38 = vsel %vm4289_vm4, %v709_v61, 0.0  ;;  %v726_v13 = vsel %vm4289_vm4, %v710_v17, 0.0  ;;  %v682_v26 = vadd.f32 %v4068_v51, %v618_v40  ;;  %v6211_v24 = vld [vmem:[#allocation42_spill] sm:$0xff]  ;;  %v6212_v40 = vld [vmem:[#allocation44_spill] sm:$0xff] }
 0x16a   :  { %v738_v37 = vmul.f32 %v6203_v19, %v722_v38  ;;  %v686_v16 = vadd.f32 %v678_v4, %v622_v27  ;;  %v742_v56 = vmul.f32 %v6204_v54, %v726_v13  ;;  %v621_v23 = vadd.f32 %v4011_v34, %v557_v60  ;;  %v6205_v34 = vld [vmem:[#allocation41_spill] sm:$0xff] }
 0x16b   :  { %v617_v3 = vadd.f32 %v4078_v15, %v553_v0  ;;  %v624_v36 = vadd.f32 %v4014_v11, %v560_v41  ;;  %v620_v39 = vadd.f32 %v4081_v6, %v556_v21  ;;  %v698_v49 = vpop.permute.xlu1 %697  ;;  %v700_v62 = vpop.permute.xlu0 %699  ;;  %v683_v15 = vadd.f32 %v6205_v34, %v619_v22  ;;  %v6223_v34 = vld [vmem:[#allocation36_spill] sm:$0xff] }
 0x16c   :  { %3100 = vset.pattern.permute.xlu1 %v6170_v12  ;;  %v746_v46 = vadd.f32 %v738_v37, %v682_v26  ;;  %v750_v50 = vadd.f32 %v742_v56, %v686_v16  ;;  %v707_v51 = vsel %vm6127_vm8, %v694_v42, %v698_v49  ;;  %v708_v35 = vsel %vm6127_vm8, %v696_v29, %v700_v62  ;;  %v6216_v56 = vld [vmem:[#allocation39_spill] sm:$0xff] }
 0x16d   :  { %2396 = vperm.xlu1 %3100, %v3804_v9   ;;  %v723_v11 = vsel %vm6073_vm9, %v707_v51, 0.0  ;;  %v687_v6 = vadd.f32 %v679_v48, %v623_v30  ;;  %v727_v53 = vsel %vm6073_vm9, %v708_v35, 0.0  ;;  %v6208_v63 = vsel %vm4333_vm7, 4294967295, %v6207_v63  ;;  %v6222_v51 = vld [vmem:[#allocation23_spill] sm:$0xff] }
 0x16e   :  { %v739_v12 = vmul.f32 %v6203_v19, %v723_v11  ;;  %v743_v1 = vmul.f32 %v6204_v54, %v727_v53  ;;  %6209 = vst [vmem:[#allocation25_spill] sm:$0xff] %v6208_v63  ;;  %v790_v28 = vadd.f32 %v6210_v31, %v750_v50  ;;  %v4339_v4 = vadd.f32 %v6211_v24, %v746_v46  ;;  %v6221_v50 = vld [vmem:[#allocation17_spill] sm:$0xff] }
 0x16f   :  { %v702_v27 = vpop.permute.xlu1 %701  ;;  %v681_v59 = vadd.f32 %v6212_v40, %v617_v3  ;;  %v684_v60 = vadd.f32 %v4156_v5, %v620_v39  ;;  %v685_v0 = vadd.f32 %v4166_v57, %v621_v23  ;;  %v688_v41 = vadd.f32 %v680_v7, %v624_v36  ;;  %v704_v21 = vpop.permute.xlu0 %703  ;;  %v6217_v23 = vld [vmem:[#allocation43_spill] sm:$0xff]  ;;  %v6218_v3 = vld [vmem:[#allocation16_spill] sm:$0xff]  ;;  %v6219_v36 = vld [vmem:[#allocation22_spill] sm:$0xff] }
 0x170   :  { %v747_v42 = vadd.f32 %v739_v12, %v683_v15  ;;  %v751_v29 = vadd.f32 %v743_v1, %v687_v6  ;;  %v705_v48 = vsel %vm6127_vm8, %v698_v49, %v702_v27  ;;  %v711_v61 = vsel %vm6127_vm8, %v702_v27, %v4261_v47  ;;  %v6220_v39 = vld [vmem:[#allocation37_spill] sm:$0xff] }
 0x171   :  { %v6213_v17 = vmov 7   ;;  %vm6214_vm9 = vcmp.ge.s32.totalorder %v3828_v44, 1  ;;  %v724_v5 = vsel %vm4333_vm7, %v705_v48, 0.0  ;;  %v706_v57 = vsel %vm6127_vm8, %v700_v62, %v704_v21 }
 0x172   :  { %3101 = vset.pattern.permute.xlu1 %v6213_v17  ;;  %v721_v30 = vsel %vm6214_vm9, %v711_v61, 0.0  ;;  %v712_v7 = vsel %vm6127_vm8, %v704_v21, %v4263_v32  ;;  %v740_v47 = vmul.f32 %v6203_v19, %v724_v5  ;;  %vm6215_vm11 = vmmov %vm6214_vm9  ;;  %v728_v13 = vsel %vm4333_vm7, %v706_v57, 0.0 }
 0x173   :  { %2060 = vperm.xlu1 %3101, %v3788_v2   ;;  %v737_v22 = vmul.f32 %v6203_v19, %v721_v30  ;;  %v725_v38 = vsel %vm6215_vm11, %v712_v7, 0.0  ;;  %v744_v37 = vmul.f32 %v6204_v54, %v728_v13  ;;  %v4368_v16 = vpop.permute.xlu1 %793  ;;  %v791_v32 = vadd.f32 %v6216_v56, %v751_v29  ;;  %vm4397_vm9 = vmand %vm228_vm5, %vm6076_vm13 }
 0x174   :  { %v741_v26 = vmul.f32 %v6204_v54, %v725_v38  ;;  %v4372_v2 = vadd.f32 %v6217_v23, %v747_v42  ;;  %v777_v19 = vmul.f32 %v6219_v36, %v6218_v3  ;;  %v780_v49 = vmul.f32 %v6219_v36, %v6220_v39  ;;  %vm4412_vm11 = vmand %vm6079_vm6, %vm6078_vm0  ;;  %v6232_v3 = vld [vmem:[#allocation27_spill] sm:$0xff] }
 0x175   :  { %v745_v62 = vadd.f32 %v737_v22, %v681_v59  ;;  %v748_v46 = vadd.f32 %v740_v47, %v684_v60  ;;  %v781_v35 = vmul.f32 %v6222_v51, %v6221_v50  ;;  %v784_v54 = vmul.f32 %v6222_v51, %v6223_v34 }
 0x176   :  { %v749_v15 = vadd.f32 %v741_v26, %v685_v0  ;;  %v752_v11 = vadd.f32 %v744_v37, %v688_v41  ;;  %v6225_v60 = vmov 0  ;;  %v6228_v0 = vmov 6  }
 0x177   :  { %3103 = vset.pattern.permute.xlu1 %v6187_v33  ;;  %v785_v6 = vadd.f32 %v777_v19, %v745_v62  ;;  %v4383_v53 = vadd.f32 %v780_v49, %v748_v46  ;;  %v796_v12 = vpop.permute.xlu1 %795  ;;  %v6224_v33 = vld [vmem:[#allocation26_spill] sm:$0xff]  ;;  %v6226_v60 = vsel %vm4397_vm9, 4294967295, %v6225_v60  ;;  %v6229_v61 = vmov 0 }
 0x178   :  { %2469 = vperm.xlu1 %3103, %v3804_v9   ;;  %v789_v1 = vadd.f32 %v781_v35, %v749_v15  ;;  %v792_v31 = vadd.f32 %v784_v54, %v752_v11  ;;  %6227 = vst [vmem:[#allocation19_spill] sm:$0xff] %v6226_v60  ;;  %v6230_v61 = vsel %vm4412_vm11, 4294967295, %v6229_v61 }
 0x179   :  { %6231 = vst [vmem:[#allocation18_spill] sm:$0xff] %v6230_v61 }
 0x17b   :  { %v800_v24 = vpop.permute.xlu1 %799 }
 0x17c   :  { %3104 = vset.pattern.permute.xlu1 %v6191_v25  ;;  %v814_v27 = vsel %vm6129_vm12, %v796_v12, %v800_v24 }
 0x17d   :  { %2505 = vperm.xlu1 %3104, %v3804_v9   ;;  %v829_v40 = vsel %vm6077_vm15, %v814_v27, 0.0 }
 0x17e   :  { %v845_v59 = vmul.f32 %v6224_v33, %v829_v40 }
 0x17f   :  { %v804_v25 = vpop.permute.xlu1 %803 }
 0x180   :  { %v853_v41 = vadd.f32 %v845_v59, %v789_v1  ;;  %v812_v21 = vsel %vm6129_vm12, %v800_v24, %v804_v25  ;;  %v865_v42 = vpop.permute.xlu0 %864 }
 0x181   :  { %3105 = vset.pattern.permute.xlu1 %v6228_v0  ;;  %v830_v29 = vsel %vm4397_vm9, %v812_v21, 0.0 }
 0x182   :  { %2541 = vperm.xlu1 %3105, %v3804_v9   ;;  %v846_v48 = vmul.f32 %v6224_v33, %v830_v29  ;;  %v4416_v30 = vadd.f32 %v865_v42, %v853_v41 }
 0x183   :  { %v808_v5 = vpop.permute.xlu1 %807 }
 0x184   :  { %v854_v57 = vadd.f32 %v846_v48, %v790_v28  ;;  %v810_v7 = vsel %vm6129_vm12, %v804_v25, %v808_v5  ;;  %v816_v22 = vsel %vm6129_vm12, %v808_v5, %v796_v12  ;;  %v798_v47 = vpop.permute.xlu0 %797  ;;  %v887_v28 = vmin.f32 %v4416_v30, 0.0 }
 0x185   :  { %v831_v38 = vsel %vm6075_vm14, %v810_v7, 0.0  ;;  %v832_v13 = vsel %vm4412_vm11, %v816_v22, 0.0  ;;  %v813_v26 = vsel %vm6129_vm12, %v4368_v16, %v798_v47 }
 0x186   :  { %3106 = vset.pattern.permute.xlu1 %v6213_v17  ;;  %v847_v37 = vmul.f32 %v6224_v33, %v831_v38  ;;  %v848_v56 = vmul.f32 %v6224_v33, %v832_v13  ;;  %v825_v17 = vsel %vm6077_vm15, %v813_v26, 0.0  ;;  %v4436_v23 = vadd.f32 %v865_v42, %v854_v57 }
 0x187   :  { %2565 = vperm.xlu1 %3106, %v3804_v9   ;;  %v841_v36 = vmul.f32 %v6232_v3, %v825_v17  ;;  %v899_v19 = vmul.f32 1.442695, %v887_v28 }
 0x188   :  { %v855_v39 = vadd.f32 %v847_v37, %v791_v32  ;;  %v856_v49 = vadd.f32 %v848_v56, %v792_v31  ;;  %v802_v62 = vpop.permute.xlu0 %801  ;;  %v888_v46 = vmin.f32 %v4436_v23, 0.0  ;;  %v6233_v32 = vld [vmem:[#allocation32_spill] sm:$0xff]  ;;  %vm880_vm15 = vcmp.gt.f32.partialorder %v4436_v23, 0.0 }
 0x189   :  { %v849_v50 = vadd.f32 %v841_v36, %v785_v6  ;;  %v811_v9 = vsel %vm6129_vm12, %v798_v47, %v802_v62  ;;  %3113 = vpow2.f32 %v899_v19 }
 0x18a   :  { %v826_v51 = vsel %vm4397_vm9, %v811_v9, 0.0  ;;  %v901_v35 = vmul.f32 1.442695, %v888_v46  ;;  %v4445_v34 = vadd.f32 %v865_v42, %v856_v49  ;;  %v4449_v11 = vadd.f32 %v865_v42, %v855_v39 }
 0x18b   :  { %3108 = vset.pattern.permute.xlu1 %v6198_v55  ;;  %v842_v54 = vmul.f32 %v6232_v3, %v826_v51  ;;  %v867_v15 = vadd.f32 %v6233_v32, %v849_v50 }
 0x18c   :  { %v806_v12 = vpop.permute.xlu0 %805  ;;  %v890_v6 = vmin.f32 %v4445_v34, 0.0  ;;  %3115 = vpow2.f32 %v901_v35  ;;  %v889_v41 = vmin.f32 %v4449_v11, 0.0 }
 0x18d   :  { %v850_v1 = vadd.f32 %v842_v54, %v4339_v4  ;;  %v809_v31 = vsel %vm6129_vm12, %v802_v62, %v806_v12  ;;  %v815_v24 = vsel %vm6129_vm12, %v806_v12, %v4368_v16  ;;  %v883_v33 = vmin.f32 %v867_v15, 0.0 }
 0x18e   :  { %v827_v27 = vsel %vm6075_vm14, %v809_v31, 0.0  ;;  %v828_v40 = vsel %vm4412_vm11, %v815_v24, 0.0  ;;  %v905_v59 = vmul.f32 1.442695, %v890_v6  ;;  %v903_v48 = vmul.f32 1.442695, %v889_v41 }
 0x18f   :  { %v843_v25 = vmul.f32 %v6232_v3, %v827_v27  ;;  %v844_v4 = vmul.f32 %v6232_v3, %v828_v40  ;;  %v868_v0 = vadd.f32 %v6233_v32, %v850_v1  ;;  %v891_v21 = vmul.f32 1.442695, %v883_v33 }
 0x190   :  { %3117 = vpow2.f32 %v905_v59  ;;  %vm879_vm14 = vcmp.gt.f32.partialorder %v4416_v30, 0.0  ;;  %vm875_vm13 = vcmp.gt.f32.partialorder %v867_v15, 0.0 }
 0x191   :  { %v851_v16 = vadd.f32 %v843_v25, %v4372_v2  ;;  %v852_v42 = vadd.f32 %v844_v4, %v4383_v53  ;;  %v884_v29 = vmin.f32 %v868_v0, 0.0  ;;  %3119 = vpow2.f32 %v891_v21 }
 0x192   :  { %3121 = vpow2.f32 %v903_v48  ;;  %vm876_vm0 = vcmp.gt.f32.partialorder %v868_v0, 0.0 }
 0x193   :  { %v3114_v5 = vpop.eup %3113  ;;  %v893_v57 = vmul.f32 1.442695, %v884_v29  ;;  %v870_v7 = vadd.f32 %v6233_v32, %v852_v42  ;;  %v869_v22 = vadd.f32 %v6233_v32, %v851_v16 }
 0x194   :  { %v2967_v38 = vadd.f32 -1.0, %v3114_v5 }
 0x195   :  { %3123 = vpow2.f32 %v893_v57  ;;  %v886_v47 = vmin.f32 %v870_v7, 0.0  ;;  %v885_v13 = vmin.f32 %v869_v22, 0.0  ;;  %vm877_vm6 = vcmp.gt.f32.partialorder %v869_v22, 0.0 }
 0x196   :  { %v3116_v26 = vpop.eup %3115  ;;  %v919_v37 = vmul.f32 1.6732632, %v2967_v38 }
 0x197   :  { %v897_v28 = vmul.f32 1.442695, %v886_v47  ;;  %v895_v2 = vmul.f32 1.442695, %v885_v13  ;;  %v2968_v53 = vadd.f32 -1.0, %v3116_v26 }
 0x198   :  { %v927_v39 = vsel %vm879_vm14, %v4416_v30, %v919_v37  ;;  %vm882_vm14 = vcmp.gt.f32.partialorder %v4445_v34, 0.0 }
 0x199   :  { %3125 = vpow2.f32 %v897_v28  ;;  %v920_v19 = vmul.f32 1.6732632, %v2968_v53  ;;  %v935_v35 = vmul.f32 1.050701, %v927_v39 }
 0x19a   :  { %3127 = vpow2.f32 %v895_v2  ;;  %v3118_v56 = vpop.eup %3117 }
 0x19b   :  { %v3120_v17 = vpop.eup %3119  ;;  %v2970_v49 = vadd.f32 -1.0, %v3118_v56  ;;  %v928_v32 = vsel %vm880_vm15, %v4436_v23, %v920_v19  ;;  %vm878_vm15 = vcmp.gt.f32.partialorder %v870_v7, 0.0 }
 0x19c   :  { %v2963_v3 = vadd.f32 -1.0, %v3120_v17  ;;  %v3122_v36 = vpop.eup %3121  ;;  %v936_v59 = vmul.f32 1.050701, %v928_v32 }
 0x19d   :  { %v2969_v50 = vadd.f32 -1.0, %v3122_v36  ;;  %v922_v6 = vmul.f32 1.6732632, %v2970_v49 }
 0x19e   :  { %v915_v46 = vmul.f32 1.6732632, %v2963_v3 }
 0x19f   :  { %v3124_v62 = vpop.eup %3123  ;;  %v921_v31 = vmul.f32 1.6732632, %v2969_v50 }
 0x1a0   :  { %v2964_v9 = vadd.f32 -1.0, %v3124_v62  ;;  %v923_v51 = vsel %vm875_vm13, %v867_v15, %v915_v46  ;;  %v930_v15 = vsel %vm882_vm14, %v4445_v34, %v922_v6  ;;  %vm881_vm13 = vcmp.gt.f32.partialorder %v4449_v11, 0.0 }
 0x1a1   :  { %v931_v12 = vmul.f32 1.050701, %v923_v51  ;;  %v929_v21 = vsel %vm881_vm13, %v4449_v11, %v921_v31  ;;  %v938_v29 = vmul.f32 1.050701, %v930_v15  ;;  %v3024_v11 = vld [vmem:[%s6012_s7 + $0x18] sm:$0xff]  ;;  %s3300_s7 = smov 48  }
 0x1a2   :  { %v916_v54 = vmul.f32 1.6732632, %v2964_v9  ;;  %v937_v5 = vmul.f32 1.050701, %v929_v21  ;;  %2614 = vperm.xlu0 %3107, %v3024_v11  }
 0x1a3   :  { %v3126_v1 = vpop.eup %3125  ;;  %v941_v27 = vpack.c.bf16 %v935_v35, %v931_v12 }
 0x1a4   :  { %v3128_v24 = vpop.eup %3127  ;;  %v924_v30 = vsel %vm876_vm0, %v868_v0, %v916_v54  ;;  %v2966_v40 = vadd.f32 -1.0, %v3126_v1  ;;  %v939_v0 = vld [vmem:[%s6009_s4] sm:$0xf]  ;;  %vm950_vm0 = vcmask 130048   ;;  %s3299_s4 = smov 125  }
 0x1a5   :  { %v932_v33 = vmul.f32 1.050701, %v924_v30  ;;  %v2965_v25 = vadd.f32 -1.0, %v3128_v24 }
 0x1a6   :  { %v918_v4 = vmul.f32 1.6732632, %v2966_v40 }
 0x1a7   :  { %v942_v23 = vpack.c.bf16 %v936_v59, %v932_v33  ;;  %v917_v41 = vmul.f32 1.6732632, %v2965_v25 }
 0x1a8   :  { %v926_v16 = vsel %vm878_vm15, %v870_v7, %v918_v4  ;;  %v4486_v7 = vpop.permute.xlu1 %1369 }
 0x1a9   :  { %954 = vmatprep.subr.bf16.mxu0 %v942_v23  ;;  %v934_v42 = vmul.f32 1.050701, %v926_v16  ;;  %v925_v48 = vsel %vm877_vm6, %v869_v22, %v917_v41  ;;  %v948_v22 = vpop.permute.xlu0 %947 }
 0x1aa   :  { %955 = vmatpush1.bf16.msra.mxu0 %v941_v27  ;;  %v933_v34 = vmul.f32 1.050701, %v925_v48 }
 0x1ab   :  { %v944_v57 = vpack.c.bf16 %v938_v29, %v934_v42 }
 0x1ac   :  { %v943_v47 = vpack.c.bf16 %v937_v5, %v933_v34  ;;  %v4488_v13 = vpop.permute.xlu1 %1409 }
 0x1ad   :  { %2971 = vmatmul.mubr.msk.bf16.vlgmr.msra.gmra.mrb[0].mxu0 %vm950_vm0, %v939_v0  ;;  %995 = vmatprep.subr.bf16.mxu1 %v944_v57 }
 0x1ae   :  { %996 = vmatpush1.bf16.msra.mxu1 %v943_v47  ;;  %1214 = vmatprep.mubr.bf16.mxu0 %v6198_v55 }
 0x1b0   :  { %v1107_v50 = vpop.permute.xlu1 %1106 }
 0x1b1   :  { %2972 = vmatmul.mubr.msk.bf16.vlgmr.msra.gmra.mrb[0].mxu1 %vm950_vm0, %v939_v0 }
 0x1b2   :  { %1255 = vmatprep.mubr.bf16.mxu1 %v6198_v55 }
 0x1b4   :  { %v4490_v12 = vpop.permute.xlu1 %1493 }
 0x1b8   :  { %v4492_v24 = vpop.permute.xlu1 %1867 }
 0x1b9   :  { %6234 = vst [vmem:[#allocation15_spill] sm:$0xff] %v4492_v24 }
 0x1bc   :  { %v1116_v0 = vpop.permute.xlu1 %1115 }
 0x280   :  { %v988_v38 = vpop.f32.mrb[0].mxu0 }
 0x281   :  { %v989_v26 = vadd.f32 %v988_v38, %v948_v22  ;;  %v990_v28 = vpop.f32.mrb[1].mxu0 }
 0x282   :  { %v991_v2 = vadd.f32 %v990_v28, %v948_v22  ;;  %v992_v53 = vpop.f32.mrb[2].mxu0 }
 0x283   :  { %v1040_v37 = vmin.f32 %v989_v26, 0.0  ;;  %v993_v56 = vpop.f32.mrb[3].mxu0  ;;  %vm1036_vm6 = vcmp.gt.f32.partialorder %v989_v26, 0.0 }
 0x284   :  { %v1041_v17 = vmin.f32 %v991_v2, 0.0  ;;  %v1029_v3 = vpop.f32.mrb[0].mxu1  ;;  %vm1037_vm14 = vcmp.gt.f32.partialorder %v991_v2, 0.0 }
 0x285   :  { %v1044_v36 = vmul.f32 1.442695, %v1040_v37  ;;  %v1030_v19 = vadd.f32 %v1029_v3, %v948_v22  ;;  %v1031_v39 = vpop.f32.mrb[1].mxu1 }
 0x286   :  { %v1046_v49 = vmul.f32 1.442695, %v1041_v17  ;;  %v1032_v62 = vadd.f32 %v1031_v39, %v948_v22  ;;  %v1033_v46 = vpop.f32.mrb[2].mxu1 }
 0x287   :  { %3129 = vpow2.f32 %v1044_v36  ;;  %v1042_v9 = vmin.f32 %v1030_v19, 0.0  ;;  %v1034_v51 = vpop.f32.mrb[3].mxu1  ;;  %vm1038_vm13 = vcmp.gt.f32.partialorder %v1030_v19, 0.0 }
 0x288   :  { %3131 = vpow2.f32 %v1046_v49  ;;  %v1043_v35 = vmin.f32 %v1032_v62, 0.0  ;;  %vm1039_vm15 = vcmp.gt.f32.partialorder %v1032_v62, 0.0 }
 0x289   :  { %v1048_v54 = vmul.f32 1.442695, %v1042_v9 }
 0x28a   :  { %v1050_v32 = vmul.f32 1.442695, %v1043_v35 }
 0x28b   :  { %3133 = vpow2.f32 %v1048_v54 }
 0x28c   :  { %3135 = vpow2.f32 %v1050_v32 }
 0x291   :  { %v3130_v6 = vpop.eup %3129 }
 0x292   :  { %v3132_v1 = vpop.eup %3131  ;;  %v2973_v31 = vadd.f32 -1.0, %v3130_v6 }
 0x293   :  { %v2974_v30 = vadd.f32 -1.0, %v3132_v1 }
 0x294   :  { %v1056_v27 = vmul.f32 1.6732632, %v2973_v31 }
 0x295   :  { %v3134_v40 = vpop.eup %3133  ;;  %v1057_v33 = vmul.f32 1.6732632, %v2974_v30 }
 0x296   :  { %v3136_v59 = vpop.eup %3135  ;;  %v1060_v25 = vsel %vm1036_vm6, %v989_v26, %v1056_v27  ;;  %v2975_v4 = vadd.f32 -1.0, %v3134_v40 }
 0x297   :  { %v4494_v15 = vmul.f32 1.050701, %v1060_v25  ;;  %v1061_v23 = vsel %vm1037_vm14, %v991_v2, %v1057_v33  ;;  %v2976_v41 = vadd.f32 -1.0, %v3136_v59  ;;  %vm6111_vm14 = vcmask 1043456  }
 0x298   :  { %v4496_v21 = vmul.f32 1.050701, %v1061_v23  ;;  %v1058_v16 = vmul.f32 1.6732632, %v2975_v4 }
 0x299   :  { %6235 = vst [vmem:[#allocation33_spill] sm:$0xff] %v4494_v15  ;;  %v1059_v42 = vmul.f32 1.6732632, %v2976_v41  ;;  %v1109_v29 = vmul.f32 %v1107_v50, %v4494_v15  ;;  %1343 = vrot.lane.b32.xlu1 %v4494_v15, %s3291_s23 }
 0x29a   :  { %6236 = vst [vmem:[#allocation34_spill] sm:$0xff] %v4496_v21  ;;  %v1062_v48 = vsel %vm1038_vm13, %v1030_v19, %v1058_v16  ;;  %v1110_v34 = vmul.f32 %v1107_v50, %v4496_v21 }
 0x29b   :  { %v4502_v5 = vmul.f32 1.050701, %v1062_v48  ;;  %v1063_v57 = vsel %vm1039_vm15, %v1032_v62, %v1059_v42  ;;  %v1118_v47 = vadd.f32 %v1116_v0, %v1109_v29  ;;  %v1154_v29 = vld [vmem:[%s6013_s8] sm:$0x1] }
 0x29c   :  { %v4504_v11 = vmul.f32 1.050701, %v1063_v57  ;;  %v1119_v22 = vadd.f32 %v1116_v0, %v1110_v34  ;;  %v4554_v57 = vpop.permute.xlu0 %1465 }
 0x29d   :  { %6237 = vst [vmem:[#allocation35_spill] sm:$0xff] %v4502_v5  ;;  %v1111_v38 = vmul.f32 %v1107_v50, %v4502_v5  ;;  %v1126_v26 = vmin.f32 %v1118_v47, 0.0  ;;  %1480 = vrot.lane.b32.xlu0 %v4502_v5, %s3297_s16  ;;  %1347 = vrot.lane.b32.xlu1 %v4502_v5, %s3291_s23  ;;  %vm1122_vm0 = vcmp.gt.f32.partialorder %v1118_v47, 0.0 }
 0x29e   :  { %6238 = vst [vmem:[#allocation20_spill] sm:$0xff] %v4504_v11  ;;  %v1112_v28 = vmul.f32 %v1107_v50, %v4504_v11  ;;  %v1127_v2 = vmin.f32 %v1119_v22, 0.0  ;;  %vm1123_vm6 = vcmp.gt.f32.partialorder %v1119_v22, 0.0 }
 0x29f   :  { %v1120_v53 = vadd.f32 %v1116_v0, %v1111_v38  ;;  %v1130_v37 = vmul.f32 1.442695, %v1126_v26 }
 0x2a0   :  { %v1121_v56 = vadd.f32 %v1116_v0, %v1112_v28  ;;  %v1132_v17 = vmul.f32 1.442695, %v1127_v2 }
 0x2a1   :  { %v1128_v3 = vmin.f32 %v1120_v53, 0.0  ;;  %1979 = vrot.lane.b32.xlu0 %v4502_v5, %s3299_s4  ;;  %1806 = vrot.lane.b32.xlu1 %v4494_v15, %s3300_s7  ;;  %3137 = vpow2.f32 %v1130_v37  ;;  %vm1124_vm13 = vcmp.gt.f32.partialorder %v1120_v53, 0.0 }
 0x2a2   :  { %v1129_v36 = vmin.f32 %v1121_v56, 0.0  ;;  %3139 = vpow2.f32 %v1132_v17  ;;  %vm1125_vm15 = vcmp.gt.f32.partialorder %v1121_v56, 0.0 }
 0x2a3   :  { %v1134_v19 = vmul.f32 1.442695, %v1128_v3 }
 0x2a4   :  { %v1136_v39 = vmul.f32 1.442695, %v1129_v36 }
 0x2a5   :  { %2480 = vrot.lane.b32.xlu0 %v4494_v15, %s3301_s3  ;;  %1810 = vrot.lane.b32.xlu1 %v4502_v5, %s3300_s7  ;;  %3141 = vpow2.f32 %v1134_v19 }
 0x2a6   :  { %3143 = vpow2.f32 %v1136_v39 }
 0x2a9   :  { %2484 = vrot.lane.b32.xlu0 %v4502_v5, %s3301_s3  ;;  %1355 = vrot.lane.b32.xlu1 %v4494_v15, %s3292_s28 }
 0x2ab   :  { %v3138_v49 = vpop.eup %3137 }
 0x2ac   :  { %v3140_v62 = vpop.eup %3139  ;;  %v2977_v46 = vadd.f32 -1.0, %v3138_v49 }
 0x2ad   :  { %1345 = vrot.lane.b32.xlu0 %v4496_v21, %s3291_s23  ;;  %1359 = vrot.lane.b32.xlu1 %v4502_v5, %s3292_s28  ;;  %v2978_v50 = vadd.f32 -1.0, %v3140_v62 }
 0x2ae   :  { %v1142_v9 = vmul.f32 1.6732632, %v2977_v46 }
 0x2af   :  { %v3142_v51 = vpop.eup %3141  ;;  %v1143_v35 = vmul.f32 1.6732632, %v2978_v50 }
 0x2b0   :  { %v3144_v54 = vpop.eup %3143  ;;  %v1146_v32 = vsel %vm1122_vm0, %v1118_v47, %v1142_v9  ;;  %v2979_v6 = vadd.f32 -1.0, %v3142_v51  ;;  %vm6105_vm0 = vcmask 64512   ;;  %v4561_v47 = vpop.permute.xlu1 %1891 }
 0x2b1   :  { %1349 = vrot.lane.b32.xlu0 %v4504_v11, %s3291_s23  ;;  %1819 = vrot.lane.b32.xlu1 %v4494_v15, %s3302_s12  ;;  %v1147_v1 = vsel %vm1123_vm6, %v1119_v22, %v1143_v35  ;;  %v1150_v31 = vmul.f32 1.050701, %v1146_v32  ;;  %v2980_v30 = vadd.f32 -1.0, %v3144_v54  ;;  %v4563_v22 = vpop.permute.xlu0 %1834  ;;  %vm6259_vm6 = vcmp.lt.s32.totalorder %v3589_v58, 16 }
 0x2b2   :  { %v1151_v27 = vmul.f32 1.050701, %v1147_v1  ;;  %v1144_v40 = vmul.f32 1.6732632, %v2979_v6 }
 0x2b3   :  { %v1156_v33 = vpack.c.bf16 %v1150_v31, %v1150_v31  ;;  %v1145_v59 = vmul.f32 1.6732632, %v2980_v30 }
 0x2b4   :  { %v1157_v25 = vpack.c.bf16 %v1151_v27, %v1151_v27  ;;  %v1148_v4 = vsel %vm1124_vm13, %v1120_v53, %v1144_v40  ;;  %v4573_v38 = vpop.permute.xlu1 %1537  ;;  %vm6260_vm13 = vmmov %vm6259_vm6 }
 0x2b5   :  { %1808 = vrot.lane.b32.xlu0 %v4496_v21, %s3300_s7  ;;  %1823 = vrot.lane.b32.xlu1 %v4502_v5, %s3302_s12  ;;  %v1171_v23 = vsel %vm6111_vm14, %v1156_v33, 0  ;;  %v1149_v41 = vsel %vm1125_vm15, %v1121_v56, %v1145_v59  ;;  %v1152_v16 = vmul.f32 1.050701, %v1148_v4  ;;  %v4575_v26 = vpop.permute.xlu0 %2339  ;;  %vm6261_vm15 = vmmov %vm6259_vm6 }
 0x2b6   :  { %2981 = vmatprep.subr.msk.bf16.mxu0 %vm6111_vm14, %v1157_v25  ;;  %v1153_v0 = vmul.f32 1.050701, %v1149_v41 }
 0x2b7   :  { %1183 = vmatpush1.bf16.msra.mxu0 %v1171_v23  ;;  %v1158_v42 = vpack.c.bf16 %v1152_v16, %v1152_v16 }
 0x2b8   :  { %v1159_v48 = vpack.c.bf16 %v1153_v0, %v1153_v0  ;;  %v4583_v2 = vpop.permute.xlu1 %1964 }
 0x2b9   :  { %1812 = vrot.lane.b32.xlu0 %v4504_v11, %s3300_s7  ;;  %1448 = vrot.lane.b32.xlu1 %v4494_v15, %s3295_s1  ;;  %v1177_v34 = vsel %vm6111_vm14, %v1158_v42, 0  ;;  %v4581_v28 = vpop.permute.xlu0 %1521  ;;  %6240 = vst [vmem:[#allocation41_spill] sm:$0xff] %v4583_v2 }
 0x2ba   :  { %2983 = vmatprep.subr.msk.bf16.mxu1 %vm6111_vm14, %v1159_v48  ;;  %2982 = vmatmul.mubr.msk.bf16.vlgmr.msra.gmra.mrb[4].mxu0 %vm6105_vm0, %v1154_v29  ;;  %6239 = vst [vmem:[#allocation21_spill] sm:$0xff] %v4581_v28 }
 0x2bb   :  { %1224 = vmatpush1.bf16.msra.mxu1 %v1177_v34  ;;  %1677 = vmatprep.mubr.bf16.mxu0 %v6198_v55 }
 0x2bc   :  { %v4595_v37 = vpop.permute.xlu1 %2000 }
 0x2bd   :  { %1357 = vrot.lane.b32.xlu0 %v4496_v21, %s3292_s28  ;;  %1452 = vrot.lane.b32.xlu1 %v4502_v5, %s3295_s1  ;;  %v4593_v53 = vpop.permute.xlu0 %2036  ;;  %6242 = vst [vmem:[#allocation38_spill] sm:$0xff] %v4595_v37 }
 0x2be   :  { %2984 = vmatmul.mubr.msk.bf16.vlgmr.msra.gmra.mrb[4].mxu1 %vm6105_vm0, %v1154_v29  ;;  %6241 = vst [vmem:[#allocation31_spill] sm:$0xff] %v4593_v53  ;;  %vm6114_vm0 = vcmp.lt.s32.totalorder %v3589_v58, 125 }
 0x2bf   :  { %1718 = vmatprep.mubr.bf16.mxu1 %v6198_v55 }
 0x2c0   :  { %v4603_v17 = vpop.permute.xlu1 %2372 }
 0x2c1   :  { %1361 = vrot.lane.b32.xlu0 %v4504_v11, %s3292_s28  ;;  %1476 = vrot.lane.b32.xlu1 %v4494_v15, %s3297_s16  ;;  %s3304_s28 = smov 5   ;;  %v4601_v56 = vpop.permute.xlu0 %1437  ;;  %6243 = vst [vmem:[#allocation42_spill] sm:$0xff] %v4603_v17 }
 0x2c4   :  { %v4615_v36 = vpop.permute.xlu1 %1578 }
 0x2c5   :  { %1821 = vrot.lane.b32.xlu0 %v4496_v21, %s3302_s12  ;;  %1939 = vrot.lane.b32.xlu1 %v4494_v15, %s3303_s19  ;;  %v4613_v3 = vpop.permute.xlu0 %1928  ;;  %6245 = vst [vmem:[#allocation39_spill] sm:$0xff] %v4615_v36 }
 0x2c6   :  { %6244 = vst [vmem:[#allocation44_spill] sm:$0xff] %v4613_v3 }
 0x2c8   :  { %v4621_v39 = vpop.permute.xlu1 %2396 }
 0x2c9   :  { %1825 = vrot.lane.b32.xlu0 %v4504_v11, %s3302_s12  ;;  %1943 = vrot.lane.b32.xlu1 %v4502_v5, %s3303_s19  ;;  %v4619_v19 = vpop.permute.xlu0 %2433 }
 0x2ca   :  { %6246 = vst [vmem:[#allocation43_spill] sm:$0xff] %v4619_v19 }
 0x2cc   :  { %v4629_v62 = vpop.permute.xlu1 %2060 }
 0x2cd   :  { %1450 = vrot.lane.b32.xlu0 %v4496_v21, %s3295_s1  ;;  %1975 = vrot.lane.b32.xlu1 %v4494_v15, %s3299_s4  ;;  %v4627_v49 = vpop.permute.xlu0 %1565 }
 0x2ce   :  { %6247 = vst [vmem:[#allocation16_spill] sm:$0xff] %v4627_v49 }
 0x2d0   :  { %v4633_v50 = vpop.permute.xlu1 %2469 }
 0x2d1   :  { %1454 = vrot.lane.b32.xlu0 %v4504_v11, %s3295_s1  ;;  %2444 = vrot.lane.b32.xlu1 %v4494_v15, %s3304_s28  ;;  %v4631_v46 = vpop.permute.xlu0 %2096  ;;  %6249 = vst [vmem:[#allocation37_spill] sm:$0xff] %v4633_v50 }
 0x2d2   :  { %6248 = vst [vmem:[#allocation22_spill] sm:$0xff] %v4631_v46 }
 0x2d4   :  { %v4637_v51 = vpop.permute.xlu1 %2505 }
 0x2d5   :  { %1941 = vrot.lane.b32.xlu0 %v4496_v21, %s3303_s19  ;;  %2448 = vrot.lane.b32.xlu1 %v4502_v5, %s3304_s28  ;;  %v4635_v9 = vpop.permute.xlu0 %2601  ;;  %6251 = vst [vmem:[#allocation23_spill] sm:$0xff] %v4637_v51 }
 0x2d6   :  { %6250 = vst [vmem:[#allocation17_spill] sm:$0xff] %v4635_v9 }
 0x2d8   :  { %v4641_v54 = vpop.permute.xlu1 %2541 }
 0x2d9   :  { %1945 = vrot.lane.b32.xlu0 %v4504_v11, %s3303_s19  ;;  %1478 = vrot.lane.b32.xlu1 %v4496_v21, %s3297_s16  ;;  %v4639_v35 = vpop.permute.xlu0 %1393  ;;  %6252 = vst [vmem:[#allocation36_spill] sm:$0xff] %v4641_v54 }
 0x2dc   :  { %v4645_v6 = vpop.permute.xlu1 %2565 }
 0x2dd   :  { %2446 = vrot.lane.b32.xlu0 %v4496_v21, %s3304_s28  ;;  %1482 = vrot.lane.b32.xlu1 %v4504_v11, %s3297_s16  ;;  %v4643_v32 = vpop.permute.xlu0 %2109  ;;  %6254 = vst [vmem:[#allocation27_spill] sm:$0xff] %v4645_v6 }
 0x2de   :  { %6253 = vst [vmem:[#allocation26_spill] sm:$0xff] %v4643_v32 }
 0x2e1   :  { %2450 = vrot.lane.b32.xlu0 %v4504_v11, %s3304_s28  ;;  %1977 = vrot.lane.b32.xlu1 %v4496_v21, %s3299_s4  ;;  %v4647_v1 = vpop.permute.xlu0 %2614 }
 0x2e2   :  { %6255 = vst [vmem:[#allocation32_spill] sm:$0xff] %v4647_v1 }
 0x2e5   :  { %1981 = vrot.lane.b32.xlu1 %v4504_v11, %s3299_s4 }
 0x2e9   :  { %2482 = vrot.lane.b32.xlu1 %v4496_v21, %s3301_s3 }
 0x2ed   :  { %2486 = vrot.lane.b32.xlu1 %v4504_v11, %s3301_s3 }
 0x30b   :  { %v1344_v31 = vpop.permute.xlu1 %1343 }
 0x30f   :  { %v4649_v30 = vpop.permute.xlu0 %1480  ;;  %v1348_v27 = vpop.permute.xlu1 %1347 }
 0x313   :  { %v4651_v40 = vpop.permute.xlu0 %1979  ;;  %v1807_v33 = vpop.permute.xlu1 %1806 }
 0x314   :  { %6256 = vst [vmem:[#allocation45_spill] sm:$0xff] %v4651_v40 }
 0x317   :  { %v4653_v59 = vpop.permute.xlu0 %2480  ;;  %v1811_v25 = vpop.permute.xlu1 %1810 }
 0x318   :  { %6257 = vst [vmem:[#allocation46_spill] sm:$0xff] %v4653_v59 }
 0x31b   :  { %v4655_v4 = vpop.permute.xlu0 %2484  ;;  %v1356_v23 = vpop.permute.xlu1 %1355 }
 0x31c   :  { %6258 = vst [vmem:[#allocation47_spill] sm:$0xff] %v4655_v4 }
 0x31f   :  { %v1346_v41 = vpop.permute.xlu0 %1345  ;;  %v1360_v16 = vpop.permute.xlu1 %1359 }
 0x320   :  { %v4659_v0 = vsel %vm6259_vm6, %v1346_v41, %v1348_v27  ;;  %v4667_v48 = vsel %vm6260_vm13, %v1344_v31, %v1346_v41  ;;  %vm1814_vm13 = vcmp.lt.s32.totalorder %v3589_v58, 48 }
 0x321   :  { %1380 = vrot.lane.b32.xlu0 %v4659_v0, %s3295_s1 }
 0x323   :  { %v1350_v42 = vpop.permute.xlu0 %1349  ;;  %v4663_v29 = vpop.permute.xlu1 %1819 }
 0x324   :  { %v4671_v34 = vsel %vm6261_vm15, %v1350_v42, %v1344_v31  ;;  %v4681_v6 = vsel %vm6259_vm6, %v1348_v27, %v1350_v42  ;;  %vm6264_vm15 = vcmp.lt.s32.totalorder %v3589_v58, 112 }
 0x325   :  { %1376 = vrot.lane.b32.xlu1 %v4671_v34, %s3295_s1  ;;  %1422 = vrot.lane.b32.xlu0 %v4667_v48, %s3297_s16  ;;  %vm6266_vm6 = vmmov %vm6264_vm15 }
 0x327   :  { %v1809_v1 = vpop.permute.xlu0 %1808  ;;  %v4677_v9 = vpop.permute.xlu1 %1823 }
 0x328   :  { %v4702_v55 = vsel %vm1814_vm13, %v1809_v1, %v1811_v25  ;;  %v4720_v51 = vsel %vm1814_vm13, %v1807_v33, %v1809_v1 }
 0x329   :  { %1378 = vrot.lane.b32.xlu1 %v4667_v48, %s3295_s1  ;;  %1426 = vrot.lane.b32.xlu0 %v4681_v6, %s3297_s16  ;;  %6263 = vst [vmem:[#allocation49_spill] sm:$0xff] %v4702_v55  ;;  %6265 = vst [vmem:[#allocation50_spill] sm:$0xff] %v4720_v51 }
 0x32b   :  { %v1813_v31 = vpop.permute.xlu0 %1812  ;;  %v4688_v41 = vpop.permute.xlu1 %1448 }
 0x32c   :  { %v4692_v54 = vsel %vm1814_vm13, %v1813_v31, %v1807_v33  ;;  %v4732_v60 = vsel %vm1814_vm13, %v1811_v25, %v1813_v31  ;;  %vm6269_vm13 = vmmov %vm6266_vm6 }
 0x32d   :  { %6262 = vst [vmem:[#allocation48_spill] sm:$0xff] %v4692_v54  ;;  %1382 = vrot.lane.b32.xlu1 %v4681_v6, %s3295_s1  ;;  %1841 = vrot.lane.b32.xlu0 %v4692_v54, %s3303_s19  ;;  %6267 = vst [vmem:[#allocation51_spill] sm:$0xff] %v4732_v60 }
 0x32f   :  { %v1358_v27 = vpop.permute.xlu0 %1357  ;;  %v4698_v42 = vpop.permute.xlu1 %1452 }
 0x330   :  { %v4712_v19 = vsel %vm6264_vm15, %v1358_v27, %v1360_v16  ;;  %vm6268_vm15 = vmmov %vm6266_vm6 }
 0x331   :  { %1420 = vrot.lane.b32.xlu1 %v4671_v34, %s3297_s16  ;;  %1845 = vrot.lane.b32.xlu0 %v4702_v55, %s3303_s19  ;;  %v4742_v59 = vsel %vm6268_vm15, %v1356_v23, %v1358_v27  ;;  %vm1827_vm15 = vcmp.lt.s32.totalorder %v3589_v58, 80 }
 0x333   :  { %v1362_v32 = vpop.permute.xlu0 %1361  ;;  %v4708_v46 = vpop.permute.xlu1 %1476 }
 0x334   :  { %v4724_v4 = vsel %vm6266_vm6, %v1362_v32, %v1356_v23  ;;  %v4758_v61 = vsel %vm6269_vm13, %v1360_v16, %v1362_v32  ;;  %vm6116_vm6 = vcmp.lt.s32.totalorder %v3589_v58, 3  ;;  %vm6112_vm13 = vcmp.lt.s32.totalorder %v3589_v58, 5 }
 0x335   :  { %1424 = vrot.lane.b32.xlu1 %v4659_v0, %s3297_s16  ;;  %1506 = vrot.lane.b32.xlu0 %v4712_v19, %s3295_s1 }
 0x337   :  { %v1822_v53 = vpop.permute.xlu0 %1821  ;;  %v1940_v17 = vpop.permute.xlu1 %1939 }
 0x339   :  { %1843 = vrot.lane.b32.xlu1 %v4720_v51, %s3303_s19  ;;  %1510 = vrot.lane.b32.xlu0 %v4724_v4, %s3295_s1 }
 0x33b   :  { %v1826_v50 = vpop.permute.xlu0 %1825  ;;  %v1944_v36 = vpop.permute.xlu1 %1943 }
 0x33c   :  { %v4781_v32 = vsel %vm1827_vm15, %v1826_v50, %v4663_v29 }
 0x33d   :  { %1847 = vrot.lane.b32.xlu1 %v4732_v60, %s3303_s19  ;;  %1904 = vrot.lane.b32.xlu0 %v4720_v51, %s3299_s4 }
 0x33f   :  { %v4738_v1 = vpop.permute.xlu0 %1450  ;;  %v1976_v33 = vpop.permute.xlu1 %1975 }
 0x340   :  { %v4748_v49 = vsel %vm6127_vm8, %v4738_v1, %v4698_v42 }
 0x341   :  { %1504 = vrot.lane.b32.xlu1 %v4742_v59, %s3295_s1  ;;  %1908 = vrot.lane.b32.xlu0 %v4732_v60, %s3299_s4 }
 0x343   :  { %v4754_v25 = vpop.permute.xlu0 %1454  ;;  %v2445_v31 = vpop.permute.xlu1 %2444 }
 0x345   :  { %1550 = vrot.lane.b32.xlu0 %v4712_v19, %s3297_s16  ;;  %1508 = vrot.lane.b32.xlu1 %v4758_v61, %s3295_s1 }
 0x347   :  { %v1942_v23 = vpop.permute.xlu0 %1941  ;;  %v2449_v27 = vpop.permute.xlu1 %2448 }
 0x348   :  { %v4767_v37 = vsel %vm6116_vm6, %v1942_v23, %v1944_v36  ;;  %v4771_v3 = vsel %vm6116_vm6, %v1940_v17, %v1942_v23 }
 0x349   :  { %6270 = vst [vmem:[#allocation52_spill] sm:$0xff] %v4767_v37  ;;  %6271 = vst [vmem:[#allocation53_spill] sm:$0xff] %v4771_v3  ;;  %1554 = vrot.lane.b32.xlu0 %v4724_v4, %s3297_s16  ;;  %1902 = vrot.lane.b32.xlu1 %v4692_v54, %s3299_s4  ;;  %v6292_v37 = vld [vmem:[#allocation29_spill] sm:$0xff]  ;;  %v4988_v3 = vmul.f32 %v4563_v22, %v4502_v5 }
 0x34a   :  { %vm6131_vm14 = vcmp.ge.s32.totalorder %v6292_v37, 48 }
 0x34b   :  { %v1946_v16 = vpop.permute.xlu0 %1945  ;;  %v1479_v40 = vpop.permute.xlu1 %1478 }
 0x34c   :  { %v4785_v63 = vsel %vm6116_vm6, %v1944_v36, %v1946_v16  ;;  %v4789_v23 = vsel %vm6116_vm6, %v1946_v16, %v1940_v17  ;;  %v4794_v28 = vsel %vm6129_vm12, %v1479_v40, %v4649_v30  ;;  %v4799_v10 = vsel %vm6129_vm12, %v4708_v46, %v1479_v40 }
 0x34d   :  { %6272 = vst [vmem:[#allocation54_spill] sm:$0xff] %v4785_v63  ;;  %6273 = vst [vmem:[#allocation55_spill] sm:$0xff] %v4789_v23  ;;  %1906 = vrot.lane.b32.xlu1 %v4702_v55, %s3299_s4  ;;  %2346 = vrot.lane.b32.xlu0 %v4781_v32, %s3304_s28  ;;  %v4811_v16 = vsel %vm1827_vm15, %v1822_v53, %v4677_v9 }
 0x34f   :  { %v2447_v17 = vpop.permute.xlu0 %2446  ;;  %v4806_v36 = vpop.permute.xlu1 %1482 }
 0x350   :  { %v4815_v40 = vsel %vm6112_vm13, %v2447_v17, %v2449_v27  ;;  %v4819_v24 = vsel %vm6112_vm13, %v2445_v31, %v2447_v17  ;;  %v4825_v63 = vsel %vm6129_vm12, %v4649_v30, %v4806_v36 }
 0x351   :  { %6274 = vst [vmem:[#allocation56_spill] sm:$0xff] %v4815_v40  ;;  %6275 = vst [vmem:[#allocation57_spill] sm:$0xff] %v4819_v24  ;;  %1548 = vrot.lane.b32.xlu1 %v4742_v59, %s3297_s16  ;;  %2350 = vrot.lane.b32.xlu0 %v4811_v16, %s3304_s28 }
 0x353   :  { %v2451_v23 = vpop.permute.xlu0 %2450  ;;  %v4832_v40 = vpop.permute.xlu1 %1977 }
 0x354   :  { %6276 = vst [vmem:[#allocation58_spill] sm:$0xff] %v4832_v40  ;;  %v4836_v17 = vsel %vm6112_vm13, %v2449_v27, %v2451_v23  ;;  %v4840_v24 = vsel %vm6112_vm13, %v2451_v23, %v2445_v31  ;;  %v4845_v30 = vsel %vm6114_vm0, %v1976_v33, %v4832_v40  ;;  %v4856_v27 = vsel %vm1827_vm15, %v4663_v29, %v1822_v53  ;;  %v1155_v53 = vld [vmem:[%s6014_s9] sm:$0x3]  ;;  %v3005_v29 = vld [vmem:[%s6016_s11 + $0x2] sm:$0x3] }
 0x355   :  { %6277 = vst [vmem:[#allocation59_spill] sm:$0xff] %v4836_v17  ;;  %6278 = vst [vmem:[#allocation60_spill] sm:$0xff] %v4840_v24  ;;  %1552 = vrot.lane.b32.xlu1 %v4758_v61, %s3297_s16  ;;  %2013 = vrot.lane.b32.xlu0 %v4811_v16, %s3303_s19  ;;  %v4870_v23 = vsel %vm1827_vm15, %v4677_v9, %v1826_v50  ;;  %v3013_v50 = vld [vmem:[%s6014_s9 + $0x4] sm:$0x3]  ;;  %v1296_v9 = vld [vmem:[%s6016_s11] sm:$0x3] }
 0x356   :  { %6279 = vst [vmem:[#allocation61_spill] sm:$0xff] %v4845_v30 }
 0x357   :  { %v4851_v2 = vpop.permute.xlu1 %1981 }
 0x358   :  { %6280 = vst [vmem:[#allocation62_spill] sm:$0xff] %v4851_v2  ;;  %v4861_v31 = vsel %vm6114_vm0, %v4851_v2, %v1976_v33  ;;  %v3039_v33 = vld [vmem:[%s6016_s11 + $0x6] sm:$0x3]  ;;  %vm6295_vm0 = vcmp.ge.s32.totalorder %v6292_v37, 16 }
 0x359   :  { %6281 = vst [vmem:[#allocation63_spill] sm:$0xff] %v4861_v31  ;;  %2348 = vrot.lane.b32.xlu1 %v4856_v27, %s3304_s28  ;;  %2017 = vrot.lane.b32.xlu0 %v4781_v32, %s3303_s19 }
 0x35d   :  { %2407 = vrot.lane.b32.xlu0 %v4781_v32, %s3301_s3  ;;  %2352 = vrot.lane.b32.xlu1 %v4870_v23, %s3304_s28 }
 0x361   :  { %2411 = vrot.lane.b32.xlu0 %v4811_v16, %s3301_s3  ;;  %2011 = vrot.lane.b32.xlu1 %v4856_v27, %s3303_s19 }
 0x365   :  { %2073 = vrot.lane.b32.xlu0 %v4811_v16, %s3299_s4  ;;  %2015 = vrot.lane.b32.xlu1 %v4870_v23, %s3303_s19 }
 0x369   :  { %2077 = vrot.lane.b32.xlu0 %v4781_v32, %s3299_s4  ;;  %2409 = vrot.lane.b32.xlu1 %v4856_v27, %s3301_s3 }
 0x36d   :  { %2520 = vrot.lane.b32.xlu0 %v4732_v60, %s3304_s28  ;;  %2413 = vrot.lane.b32.xlu1 %v4870_v23, %s3301_s3 }
 0x371   :  { %2580 = vrot.lane.b32.xlu0 %v4732_v60, %s3301_s3  ;;  %2071 = vrot.lane.b32.xlu1 %v4856_v27, %s3299_s4 }
 0x375   :  { %1162 = vperm.xlu0 %3107, %v1155_v53   ;;  %2075 = vrot.lane.b32.xlu1 %v4870_v23, %s3299_s4  ;;  %v4923_v53 = vpop.permute.xlu1 %2482 }
 0x376   :  { %6282 = vst [vmem:[#allocation64_spill] sm:$0xff] %v4923_v53  ;;  %v3030_v53 = vld [vmem:[%s6014_s9 + $0x6] sm:$0x3] }
 0x379   :  { %2158 = vperm.xlu0 %3107, %v3013_v50   ;;  %2516 = vrot.lane.b32.xlu1 %v4720_v51, %s3304_s28  ;;  %v4936_v2 = vpop.permute.xlu1 %2486 }
 0x37a   :  { %6286 = vst [vmem:[#allocation68_spill] sm:$0xff] %v4936_v2  ;;  %v6291_v2 = vld [vmem:[#allocation30_spill] sm:$0xff] }
 0x37b   :  { %vm257_vm15 = vcmp.ge.s32.totalorder %v6291_v2, 48  ;;  %vm6294_vm13 = vcmp.ge.s32.totalorder %v6291_v2, 16  ;;  %vm6126_vm6 = vcmp.ge.s32.totalorder %v6291_v2, 80 }
 0x37d   :  { %1299 = vperm.xlu0 %3107, %v1296_v9   ;;  %2518 = vrot.lane.b32.xlu1 %v4702_v55, %s3304_s28  ;;  %v2996_v9 = vld [vmem:[%s6014_s9 + $0x2] sm:$0x3] }
 0x381   :  { %1763 = vperm.xlu0 %3107, %v3005_v29   ;;  %2522 = vrot.lane.b32.xlu1 %v4692_v54, %s3304_s28 }
 0x385   :  { %2799 = vperm.xlu0 %3107, %v3039_v33   ;;  %2576 = vrot.lane.b32.xlu1 %v4720_v51, %s3301_s3 }
 0x389   :  { %2578 = vrot.lane.b32.xlu1 %v4702_v55, %s3301_s3 }
 0x38d   :  { %2582 = vrot.lane.b32.xlu1 %v4692_v54, %s3301_s3  ;;  %v4927_v50 = vpop.f32.mrb[4].mxu0 }
 0x38e   :  { %6283 = vst [vmem:[#allocation65_spill] sm:$0xff] %v4927_v50  ;;  %v4932_v29 = vpop.f32.mrb[5].mxu0 }
 0x38f   :  { %6284 = vst [vmem:[#allocation66_spill] sm:$0xff] %v4932_v29  ;;  %v1220_v33 = vpop.f32.mrb[6].mxu0  ;;  %v4945_v29 = vmul.f32 %v4486_v7, %v4494_v15 }
 0x390   :  { %v1221_v17 = vpop.f32.mrb[7].mxu0  ;;  %v4956_v33 = vmul.f32 %v4563_v22, %v4496_v21 }
 0x391   :  { %1627 = vperm.xlu1 %3108, %v2996_v9   ;;  %v4934_v31 = vpop.f32.mrb[4].mxu1  ;;  %v1068_v17 = vld [vmem:[%s6015_s10] sm:$0xff]  ;;  %v4952_v9 = vmul.f32 %v4486_v7, %v4496_v21 }
 0x392   :  { %6285 = vst [vmem:[#allocation67_spill] sm:$0xff] %v4934_v31  ;;  %v4941_v30 = vpop.f32.mrb[5].mxu1  ;;  %6288 = vst [vmem:[#allocation70_spill] sm:$0xff] %v4956_v33  ;;  %v4970_v31 = vmul.f32 %v4486_v7, %v4502_v5  ;;  %v4976_v33 = vmul.f32 %v4575_v26, %v4494_v15 }
 0x393   :  { %6287 = vst [vmem:[#allocation69_spill] sm:$0xff] %v4941_v30  ;;  %v1381_v50 = vpop.permute.xlu0 %1380  ;;  %v1261_v24 = vpop.f32.mrb[6].mxu1 }
 0x394   :  { %v1262_v40 = vpop.f32.mrb[7].mxu1  ;;  %v4960_v24 = vmul.f32 %v4563_v22, %v4494_v15  ;;  %6293 = vst [vmem:[#allocation30_spill] sm:$0xff] %v4976_v33  ;;  %v4992_v15 = vmul.f32 %v4563_v22, %v4504_v11  ;;  %v1886_v22 = vsel %vm6131_vm14, %v4692_v54, 0.0 }
 0x395   :  { %2663 = vperm.xlu1 %3108, %v3030_v53   ;;  %v4964_v40 = vmul.f32 %v4575_v26, %v4496_v21  ;;  %v1406_v21 = vsel %vm6294_vm13, %v4659_v0, 0.0  ;;  %v4997_v0 = vmul.f32 %v4575_v26, %v4502_v5  ;;  %vm6298_vm13 = vcmp.lt.s32.totalorder %v6206_v45, 240 }
 0x396   :  { %6289 = vst [vmem:[#allocation71_spill] sm:$0xff] %v4960_v24  ;;  %v1375_v24 = vmul.f32 %v4486_v7, %v4504_v11  ;;  %v5005_v7 = vmul.f32 %v4488_v13, %v4667_v48  ;;  %v5015_v5 = vmul.f32 %v4488_v13, %v1406_v21  ;;  %v1533_v48 = vsel %vm228_vm5, %v4712_v19, 0.0 }
 0x397   :  { %6290 = vst [vmem:[#allocation72_spill] sm:$0xff] %v4964_v40  ;;  %v4966_v53 = vpop.permute.xlu0 %1422  ;;  %v1377_v30 = vpop.permute.xlu1 %1376  ;;  %v1404_v40 = vsel %vm6295_vm0, %v4671_v34, 0.0  ;;  %6296 = vst [vmem:[#allocation29_spill] sm:$0xff] %v4997_v0  ;;  %v5001_v34 = vmul.f32 %v4575_v26, %v4504_v11  ;;  %vm6125_vm0 = vcmp.lt.s32.totalorder %v3809_v43, 208  ;;  %v1415_v11 = vmul.f32 %v4488_v13, %v4681_v6 }
 0x398   :  { %v1412_v26 = vmul.f32 %v4488_v13, %v1404_v40  ;;  %v1535_v54 = vsel %vm6298_vm13, %v4724_v4, 0.0  ;;  %v5034_v13 = vmul.f32 %v4561_v47, %v4720_v51  ;;  %v5038_v19 = vmul.f32 %v4573_v38, %v4742_v59 }
 0x399   :  { %1071 = vperm.xlu1 %3108, %v1068_v17   ;;  %6297 = vst [vmem:[#allocation73_spill] sm:$0xff] %v5001_v34  ;;  %v1888_v17 = vsel %vm257_vm15, %v4702_v55, 0.0  ;;  %v5044_v33 = vmul.f32 %v4561_v47, %v1886_v22  ;;  %v5048_v4 = vmul.f32 %v4561_v47, %v4732_v60  ;;  %v5055_v51 = vmul.f32 %v4573_v38, %v4758_v61 }
 0x39a   :  { %6299 = vst [vmem:[#allocation74_spill] sm:$0xff] %v5034_v13  ;;  %v5041_v6 = vmul.f32 %v4561_v47, %v1888_v17  ;;  %vm6301_vm5 = vcmp.ge.s32.totalorder %v3821_v52, 1  ;;  %v5062_v22 = vmul.f32 %v4573_v38, %v1535_v54  ;;  %v1458_v47 = vsel %vm6127_vm8, %v4688_v41, %v4738_v1 }
 0x39b   :  { %v5023_v34 = vpop.permute.xlu0 %1426  ;;  %v1379_v55 = vpop.permute.xlu1 %1378  ;;  %v5073_v61 = vsel %vm6126_vm6, %v4811_v16, 0.0  ;;  %v5078_v0 = vsel %vm6125_vm0, %v4811_v16, 0.0  ;;  %v1459_v54 = vsel %vm6127_vm8, %v4754_v25, %v4688_v41  ;;  %vm6305_vm13 = vmmov %vm6301_vm5  ;;  %vm6134_vm0 = vcmp.ge.s32.totalorder %v3828_v44, 3 }
 0x39c   :  { %v1385_v21 = vsel %vm6127_vm8, %v1379_v55, %v1381_v50  ;;  %v1386_v40 = vsel %vm6127_vm8, %v1377_v30, %v1379_v55  ;;  %6300 = vst [vmem:[#allocation75_spill] sm:$0xff] %v5041_v6  ;;  %v5051_v55 = vmul.f32 %v4573_v38, %v1533_v48  ;;  %v1456_v38 = vsel %vm6127_vm8, %v4698_v42, %v4754_v25 }
 0x39d   :  { %v1389_v59 = vsel %vm6301_vm5, %v1386_v40, 0.0  ;;  %v1390_v17 = vsel %vm4058_vm2, %v1385_v21, 0.0  ;;  %vm6304_vm2 = vcmp.ge.s32.totalorder %v3834_v8, 1  ;;  %v1461_v13 = vsel %vm6305_vm13, %v1458_v47, 0.0 }
 0x39e   :  { %v1397_v40 = vmul.f32 %v4639_v35, %v1389_v59  ;;  %v1398_v16 = vmul.f32 %v4639_v35, %v1390_v17  ;;  %vm6306_vm5 = vcmp.ge.s32.totalorder %v3831_v14, 1  ;;  %vm6128_vm13 = vcmp.ge.s32.totalorder %v6292_v37, 80 }
 0x39f   :  { %v5068_v48 = vpop.permute.xlu0 %1841  ;;  %v1383_v60 = vpop.permute.xlu1 %1382  ;;  %vm6309_vm6 = vcmp.lt.s32.totalorder %v3828_v44, 15 }
 0x3a0   :  { %v1384_v1 = vsel %vm6127_vm8, %v1381_v50, %v1383_v60  ;;  %v1387_v21 = vsel %vm6127_vm8, %v1383_v60, %v1377_v30  ;;  %v5104_v60 = vmul.f32 %v4621_v39, %v4856_v27  ;;  %v1462_v30 = vsel %vm6306_vm5, %v4748_v49, 0.0 }
 0x3a1   :  { %v1388_v6 = vsel %vm4121_vm1, %v1387_v21, 0.0  ;;  %v1391_v42 = vsel %vm6304_vm2, %v1384_v1, 0.0  ;;  %vm6307_vm1 = vcmp.ge.s32.totalorder %v3828_v44, 1  ;;  %v1463_v50 = vsel %vm6304_vm2, %v1456_v38, 0.0 }
 0x3a2   :  { %v1396_v41 = vmul.f32 %v4639_v35, %v1388_v6  ;;  %v1399_v25 = vmul.f32 %v4639_v35, %v1391_v42  ;;  %v1460_v43 = vsel %vm6307_vm1, %v1459_v54, 0.0  ;;  %v1487_v6 = vsel %vm6129_vm12, %v4806_v36, %v4708_v46 }
 0x3a3   :  { %v5117_v35 = vpop.permute.xlu0 %1845  ;;  %v1421_v59 = vpop.permute.xlu1 %1420  ;;  %vm6130_vm5 = vcmp.lt.s32.totalorder %v6206_v45, 208  ;;  %vm264_vm1 = vcmp.ge.s32.totalorder %v3821_v52, 3  ;;  %v1401_v46 = vadd.f32 %v1397_v40, %v4952_v9  ;;  %v1402_v36 = vadd.f32 %v1398_v16, %v4970_v31 }
 0x3a4   :  { %v1400_v17 = vadd.f32 %v1396_v41, %v4945_v29  ;;  %v1403_v47 = vadd.f32 %v1399_v25, %v1375_v24  ;;  %v1430_v49 = vsel %vm6129_vm12, %v1421_v59, %v4966_v53  ;;  %v1431_v38 = vsel %vm6129_vm12, %v5023_v34, %v1421_v59 }
 0x3a5   :  { %v1432_v29 = vsel %vm4196_vm10, %v1430_v49, 0.0  ;;  %vm6308_vm2 = vcmp.lt.s32.totalorder %v3834_v8, 15  ;;  %v1468_v41 = vmul.f32 %v4554_v57, %v1460_v43  ;;  %v1471_v9 = vmul.f32 %v4554_v57, %v1463_v50 }
 0x3a6   :  { %v1435_v24 = vsel %vm6308_vm2, %v1431_v38, 0.0  ;;  %v1419_v54 = vadd.f32 %v1415_v11, %v1403_v47  ;;  %v1416_v1 = vadd.f32 %v1412_v26, %v1400_v17  ;;  %v1440_v21 = vmul.f32 %v4601_v56, %v1432_v29  ;;  %vm6310_vm10 = vmmov %vm6308_vm2 }
 0x3a7   :  { %v1443_v42 = vmul.f32 %v4601_v56, %v1435_v24  ;;  %v1488_v18 = vsel %vm6309_vm6, %v4799_v10, 0.0  ;;  %v1491_v31 = vsel %vm6310_vm10, %v1487_v6, 0.0  ;;  %v5145_v40 = vpop.permute.xlu0 %1506  ;;  %v1425_v16 = vpop.permute.xlu1 %1424  ;;  %vm6132_vm2 = vcmp.ge.s32.totalorder %v3831_v14, 3 }
 0x3a8   :  { %vm6133_vm8 = vcmp.ge.s32.totalorder %v3834_v8, 3  ;;  %v1444_v11 = vadd.f32 %v1440_v21, %v1416_v1  ;;  %v1428_v25 = vsel %vm6129_vm12, %v1425_v16, %v5023_v34  ;;  %v1429_v10 = vsel %vm6129_vm12, %v4966_v53, %v1425_v16 }
 0x3a9   :  { %v1447_v26 = vadd.f32 %v1443_v42, %v1419_v54  ;;  %v1417_v43 = vadd.f32 %v5005_v7, %v1401_v46  ;;  %v1418_v50 = vadd.f32 %v5015_v5, %v1402_v36  ;;  %vm6311_vm6 = vcmp.lt.s32.totalorder %v3821_v52, 15 }
 0x3aa   :  { %v1433_v6 = vsel %vm6311_vm6, %v1429_v10, 0.0  ;;  %v1434_v59 = vsel %vm4223_vm3, %v1428_v25, 0.0  ;;  %v1472_v17 = vadd.f32 %v1468_v41, %v1444_v11  ;;  %v1469_v38 = vmul.f32 %v4554_v57, %v1461_v13  ;;  %vm6312_vm3 = vmmov %vm6311_vm6  ;;  %v2838_v41 = vld [vmem:[#allocation2] sm:$0x1] }
 0x3ab   :  { %v1475_v47 = vadd.f32 %v1471_v9, %v1447_v26  ;;  %v1441_v49 = vmul.f32 %v4601_v56, %v1433_v6  ;;  %v1442_v34 = vmul.f32 %v4601_v56, %v1434_v59  ;;  %v1470_v53 = vmul.f32 %v4554_v57, %v1462_v30  ;;  %v5167_v46 = vpop.permute.xlu0 %1510  ;;  %v1844_v36 = vpop.permute.xlu1 %1843  ;;  %v3022_v57 = vld [vmem:[%s6016_s11 + $0x4] sm:$0x3] }
 0x3ac   :  { %v1496_v7 = vmul.f32 %v4490_v12, %v1488_v18  ;;  %v1499_v5 = vmul.f32 %v4490_v12, %v1491_v31  ;;  %v1489_v20 = vsel %vm6312_vm3, %v4794_v28, 0.0  ;;  %vm296_vm10 = vcmp.ge.s32.totalorder %v3821_v52, 5  ;;  %2294 = vperm.xlu1 %3108, %v3022_v57   ;;  %vm5204_vm3 = vmand %vm6131_vm14, %vm6134_vm0  ;;  %v6328_v57 = vld [vmem:[#allocation15_spill] sm:$0xff] }
 0x3ad   :  { %vm6313_vm6 = vcmp.lt.s32.totalorder %v3831_v14, 15  ;;  %v1445_v13 = vadd.f32 %v1441_v49, %v1417_v43  ;;  %v1446_v29 = vadd.f32 %v1442_v34, %v1418_v50  ;;  %v5183_v54 = vmul.f32 %v4621_v39, %v5073_v61  ;;  %vm5234_vm14 = vmand %vm257_vm15, %vm6132_vm2 }
 0x3ae   :  { %v1490_v56 = vsel %vm6313_vm6, %v4825_v63, 0.0  ;;  %v1500_v30 = vadd.f32 %v1496_v7, %v1472_v17  ;;  %v5179_v24 = vadd.f32 %v1499_v5, %v1475_v47  ;;  %v5187_v28 = vmul.f32 %v4629_v62, %v4856_v27  ;;  %v6325_v5 = vld [vmem:[#allocation54_spill] sm:$0xff] }
 0x3af   :  { %v1473_v1 = vadd.f32 %v1469_v38, %v1445_v13  ;;  %v1474_v63 = vadd.f32 %v1470_v53, %v1446_v29  ;;  %v2391_v21 = vsel %vm6128_vm13, %v4781_v32, 0.0  ;;  %v5194_v42 = vmul.f32 %v4629_v62, %v5078_v0  ;;  %v5198_v18 = vpop.permute.xlu0 %1904  ;;  %v1848_v31 = vpop.permute.xlu1 %1847  ;;  %v6324_v53 = vld [vmem:[#allocation55_spill] sm:$0xff] }
 0x3b0   :  { %v1497_v9 = vmul.f32 %v4490_v12, %v1489_v20  ;;  %v1498_v61 = vmul.f32 %v4490_v12, %v1490_v56  ;;  %v2058_v0 = vsel %vm6130_vm5, %v4781_v32, 0.0  ;;  %v5213_v16 = vmul.f32 %v4621_v39, %v4870_v23  ;;  %v6316_v12 = vld [vmem:[#allocation53_spill] sm:$0xff]  ;;  %2841 = vperm.xlu1 %3108, %v2838_v41  }
 0x3b1   :  { %v1960_v11 = vsel %vm264_vm1, %v6316_v12, 0.0  ;;  %vm297_vm6 = vcmp.ge.s32.totalorder %v3831_v14, 5  ;;  %vm6317_vm13 = vcmp.lt.s32.totalorder %v3589_v58, 3  ;;  %v5227_v32 = vmul.f32 %v4629_v62, %v4870_v23 }
 0x3b2   :  { %v1850_v26 = vsel %vm6317_vm13, %v5117_v35, %v1848_v31  ;;  %vm6318_vm12 = vmmov %vm6317_vm13  ;;  %vm6135_vm5 = vcmp.lt.s32.totalorder %v3828_v44, 13  ;;  %v1501_v23 = vadd.f32 %v1497_v9, %v1473_v1  ;;  %v1502_v6 = vadd.f32 %v1498_v61, %v1474_v63 }
 0x3b3   :  { %v1853_v25 = vsel %vm6318_vm12, %v1848_v31, %v5068_v48  ;;  %vm6321_vm13 = vmmov %vm6318_vm12  ;;  %v1852_v50 = vsel %vm6318_vm12, %v5068_v48, %v1844_v36  ;;  %v1865_v17 = vsel %vm6133_vm8, %v1850_v26, 0.0  ;;  %v5249_v47 = vmul.f32 %v4621_v39, %v2391_v21  ;;  %v6323_v48 = vld [vmem:[#allocation41_spill] sm:$0xff]  ;;  %v5266_v39 = vpop.permute.xlu0 %1908  ;;  %v1505_v20 = vpop.permute.xlu1 %1504 }
 0x3b4   :  { %v1851_v43 = vsel %vm6321_vm13, %v1844_v36, %v5117_v35  ;;  %v1862_v59 = vsel %vm5204_vm3, %v1853_v25, 0.0  ;;  %v5252_v49 = vmul.f32 %v4629_v62, %v2058_v0  ;;  %v6322_v35 = vld [vmem:[#allocation52_spill] sm:$0xff]  ;;  %v5258_v38 = vmul.f32 %v6323_v48, %v1960_v11  ;;  %v6331_v31 = vld [vmem:[#allocation21_spill] sm:$0xff] }
 0x3b5   :  { %v1961_v34 = vsel %vm6132_vm2, %v6322_v35, 0.0  ;;  %v1959_v7 = vsel %vm6134_vm0, %v6324_v53, 0.0  ;;  %v1962_v36 = vsel %vm6133_vm8, %v6325_v5, 0.0  ;;  %vm6137_vm3 = vcmp.ge.s32.totalorder %v3828_v44, 5  ;;  %v6332_v26 = vld [vmem:[#allocation57_spill] sm:$0xff]  ;;  %v6335_v53 = vld [vmem:[#allocation71_spill] sm:$0xff] }
 0x3b6   :  { %vm270_vm13 = vcmp.lt.s32.totalorder %v3834_v8, 13  ;;  %v1863_v62 = vsel %vm264_vm1, %v1852_v50, 0.0  ;;  %v1864_v56 = vsel %vm5234_vm14, %v1851_v43, 0.0  ;;  %vm6326_vm12 = vcmp.lt.s32.totalorder %v3589_v58, 1 }
 0x3b7   :  { %v1514_v13 = vsel %vm6326_vm12, %v1505_v20, %v5145_v40  ;;  %vm6327_vm2 = vmmov %vm6326_vm12  ;;  %vm6136_vm8 = vcmp.lt.s32.totalorder %v3831_v14, 13  ;;  %v1870_v1 = vmul.f32 %v6328_v57, %v1862_v59  ;;  %v1873_v63 = vmul.f32 %v6328_v57, %v1865_v17  ;;  %v5301_v50 = vpop.permute.xlu0 %1550  ;;  %v1509_v59 = vpop.permute.xlu1 %1508 }
 0x3b8   :  { %v1515_v29 = vsel %vm6327_vm2, %v5167_v46, %v1505_v20  ;;  %vm6329_vm0 = vcmp.ge.s32.totalorder %v3828_v44, 1  ;;  %v1517_v9 = vsel %vm4289_vm4, %v1514_v13, 0.0  ;;  %v5288_v61 = vmul.f32 %v6323_v48, %v1961_v34  ;;  %vm6333_vm14 = vmmov %vm6327_vm2 }
 0x3b9   :  { %v1516_v21 = vsel %vm6329_vm0, %v1515_v29, 0.0  ;;  %v1967_v27 = vmul.f32 %v6323_v48, %v1959_v7  ;;  %v1525_v12 = vmul.f32 %v6331_v31, %v1517_v9  ;;  %v1970_v11 = vmul.f32 %v6323_v48, %v1962_v36  ;;  %vm6334_vm0 = vmmov %vm6327_vm2  ;;  %v6342_v29 = vld [vmem:[#allocation45_spill] sm:$0xff] }
 0x3ba   :  { %v1524_v0 = vmul.f32 %v6331_v31, %v1516_v21  ;;  %v5297_v25 = vsel %vm296_vm10, %v6332_v26, 0.0  ;;  %v1871_v10 = vmul.f32 %v6328_v57, %v1863_v62  ;;  %v1872_v43 = vmul.f32 %v6328_v57, %v1864_v56  ;;  %v6341_v56 = vld [vmem:[#allocation56_spill] sm:$0xff]  ;;  %v6343_v57 = vld [vmem:[#allocation58_spill] sm:$0xff] }
 0x3bb   :  { %vm268_vm4 = vcmp.lt.s32.totalorder %v3821_v52, 13  ;;  %v1529_v35 = vadd.f32 %v1525_v12, %v1501_v23  ;;  %v1512_v34 = vsel %vm6333_vm14, %v1509_v59, %v5167_v46  ;;  %v1513_v48 = vsel %vm6334_vm0, %v5145_v40, %v1509_v59  ;;  %v5343_v9 = vpop.permute.xlu0 %1554 }
 0x3bc   :  { %v1528_v17 = vadd.f32 %v1524_v0, %v1500_v30  ;;  %v1874_v7 = vadd.f32 %v1870_v1, %v6335_v53  ;;  %v1877_v5 = vadd.f32 %v1873_v63, %v4992_v15  ;;  %vm6336_vm2 = vcmp.ge.s32.totalorder %v3831_v14, 1  ;;  %v6345_v63 = vld [vmem:[#allocation70_spill] sm:$0xff] }
 0x3bd   :  { %v1518_v36 = vsel %vm6336_vm2, %v1513_v48, 0.0  ;;  %v1519_v62 = vsel %vm4333_vm7, %v1512_v34, 0.0  ;;  %vm6338_vm12 = vcmp.ge.s32.totalorder %v6292_v37, 48  ;;  %v5330_v46 = vadd.f32 %v5051_v55, %v1529_v35  ;;  %v6350_v35 = vld [vmem:[#allocation60_spill] sm:$0xff]  ;;  %v6351_v48 = vld [vmem:[#allocation61_spill] sm:$0xff] }
 0x3be   :  { %v1526_v30 = vmul.f32 %v6331_v31, %v1518_v36  ;;  %v1527_v23 = vmul.f32 %v6331_v31, %v1519_v62  ;;  %vm5322_vm14 = vmand %vm6338_vm12, %vm6135_vm5  ;;  %v5327_v15 = vadd.f32 %v5038_v19, %v1528_v17  ;;  %v5335_v13 = vsel %vm297_vm6, %v6341_v56, 0.0  ;;  %v1903_v19 = vpop.permute.xlu1 %1902  ;;  %v6354_v36 = vld [vmem:[#allocation63_spill] sm:$0xff]  ;;  %v6356_v56 = vld [vmem:[#allocation74_spill] sm:$0xff] }
 0x3bf   :  { %vm6344_vm7 = vcmp.lt.s32.totalorder %v3589_v58, 125  ;;  %v1875_v21 = vadd.f32 %v1871_v10, %v6345_v63  ;;  %v1876_v41 = vadd.f32 %v1872_v43, %v4988_v3  ;;  %vm298_vm0 = vcmp.ge.s32.totalorder %v3834_v8, 5  ;;  %v6347_v43 = vld [vmem:[#allocation44_spill] sm:$0xff] }
 0x3c0   :  { %v1984_v1 = vsel %vm6344_vm7, %v6343_v57, %v6342_v29  ;;  %vm2415_vm2 = vcmp.lt.s32.totalorder %v3589_v58, 123  ;;  %v1530_v55 = vadd.f32 %v1526_v30, %v1502_v6  ;;  %v1531_v31 = vadd.f32 %v1527_v23, %v5179_v24  ;;  %vm6346_vm12 = vmmov %vm6344_vm7  ;;  %v6357_v57 = vld [vmem:[#allocation75_spill] sm:$0xff] }
 0x3c1   :  { %v1913_v0 = vsel %vm6346_vm12, %v1903_v19, %v5198_v18  ;;  %v1914_v12 = vsel %vm6344_vm7, %v5266_v39, %v1903_v19  ;;  %v1901_v3 = vadd.f32 %v5048_v4, %v1877_v5  ;;  %v1898_v26 = vadd.f32 %v5044_v33, %v1874_v7  ;;  %vm5366_vm12 = vmand %vm257_vm15, %vm6136_vm8  ;;  %v6352_v7 = vld [vmem:[#allocation62_spill] sm:$0xff] }
 0x3c2   :  { %v1923_v10 = vsel %vm5322_vm14, %v1913_v0, 0.0  ;;  %v1926_v6 = vsel %vm270_vm13, %v1914_v12, 0.0  ;;  %v1547_v33 = vadd.f32 %v5062_v22, %v1531_v31  ;;  %v5372_v4 = vadd.f32 %v5055_v51, %v1530_v55  ;;  %vm6353_vm15 = vmmov %vm6344_vm7  ;;  %v5389_v51 = vpop.permute.xlu0 %2346  ;;  %v1907_v20 = vpop.permute.xlu1 %1906 }
 0x3c3   :  { %v1931_v24 = vmul.f32 %v6347_v43, %v1923_v10  ;;  %v1934_v59 = vmul.f32 %v6347_v43, %v1926_v6  ;;  %v5377_v34 = vsel %vm6137_vm3, %v6350_v35, 0.0  ;;  %v1995_v53 = vsel %vm6135_vm5, %v6351_v48, 0.0  ;;  %vm6355_vm5 = vmmov %vm6344_vm7 }
 0x3c4   :  { %v1983_v5 = vsel %vm6353_vm15, %v6342_v29, %v6352_v7  ;;  %v1998_v22 = vsel %vm270_vm13, %v6354_v36, 0.0  ;;  %vm299_vm14 = vcmp.lt.s32.totalorder %v3828_v44, 11  ;;  %v1911_v23 = vsel %vm6344_vm7, %v1907_v20, %v5266_v39 }
 0x3c5   :  { %v1935_v62 = vadd.f32 %v1931_v24, %v1898_v26  ;;  %v1938_v30 = vadd.f32 %v1934_v59, %v1901_v3  ;;  %v1912_v40 = vsel %vm6355_vm5, %v5198_v18, %v1907_v20  ;;  %v1899_v29 = vadd.f32 %v6356_v56, %v1875_v21  ;;  %v6358_v18 = vld [vmem:[#allocation38_spill] sm:$0xff]  ;;  %v6364_v20 = vld [vmem:[#allocation59_spill] sm:$0xff] }
 0x3c6   :  { %v1900_v63 = vadd.f32 %v6357_v57, %v1876_v41  ;;  %v1924_v19 = vsel %vm268_vm4, %v1912_v40, 0.0  ;;  %v1925_v55 = vsel %vm5366_vm12, %v1911_v23, 0.0  ;;  %v1996_v3 = vsel %vm268_vm4, %v1984_v1, 0.0  ;;  %v5412_v10 = vpop.permute.xlu0 %2350  ;;  %v1549_v6 = vpop.permute.xlu1 %1548  ;;  %v6365_v40 = vld [vmem:[#allocation64_spill] sm:$0xff]  ;;  %v6366_v56 = vld [vmem:[#allocation46_spill] sm:$0xff] }
 0x3c7   :  { %v1971_v31 = vadd.f32 %v1967_v27, %v1935_v62  ;;  %v1974_v0 = vadd.f32 %v1970_v11, %v1938_v30  ;;  %v1932_v12 = vmul.f32 %v6347_v43, %v1924_v19  ;;  %v1933_v39 = vmul.f32 %v6347_v43, %v1925_v55 }
 0x3c8   :  { %v2003_v26 = vmul.f32 %v6358_v18, %v1995_v53  ;;  %v1997_v21 = vsel %vm6136_vm8, %v1983_v5, 0.0  ;;  %v2006_v41 = vmul.f32 %v6358_v18, %v1998_v22  ;;  %vm300_vm5 = vcmp.lt.s32.totalorder %v3821_v52, 11  ;;  %v6363_v5 = vld [vmem:[#allocation16_spill] sm:$0xff] }
 0x3c9   :  { %v1936_v27 = vadd.f32 %v1932_v12, %v1899_v29  ;;  %v1937_v11 = vadd.f32 %v1933_v39, %v1900_v63  ;;  %vm6359_vm12 = vcmp.lt.s32.totalorder %v3589_v58, 127  ;;  %vm6361_vm7 = vcmp.lt.s32.totalorder %v3828_v44, 15 }
 0x3ca   :  { %v1558_v43 = vsel %vm6359_vm12, %v1549_v6, %v5301_v50  ;;  %vm6360_vm15 = vmmov %vm6359_vm12  ;;  %v5425_v35 = vadd.f32 %v2003_v26, %v1971_v31  ;;  %v5427_v48 = vadd.f32 %v2006_v41, %v1974_v0  ;;  %v2467_v62 = vsel %vm298_vm0, %v6364_v20, 0.0  ;;  %v6371_v26 = vld [vmem:[#allocation37_spill] sm:$0xff] }
 0x3cb   :  { %v1559_v1 = vsel %vm6360_vm15, %v5343_v9, %v1549_v6  ;;  %v1560_v24 = vsel %vm6361_vm7, %v1558_v43, 0.0  ;;  %v1972_v53 = vadd.f32 %v5258_v38, %v1936_v27  ;;  %v1973_v7 = vadd.f32 %v5288_v61, %v1937_v11  ;;  %v5443_v38 = vpop.permute.xlu0 %2013  ;;  %v1553_v61 = vpop.permute.xlu1 %1552  ;;  %vm6367_vm15 = vmmov %vm6359_vm12  ;;  %v6372_v6 = vld [vmem:[#allocation47_spill] sm:$0xff] }
 0x3cc   :  { %v1563_v17 = vsel %vm4412_vm11, %v1559_v1, 0.0  ;;  %v1568_v36 = vmul.f32 %v6363_v5, %v1560_v24  ;;  %v2004_v30 = vmul.f32 %v6358_v18, %v1996_v3  ;;  %v2005_v23 = vmul.f32 %v6358_v18, %v1997_v21 }
 0x3cd   :  { %v1571_v22 = vmul.f32 %v6363_v5, %v1563_v17  ;;  %v2490_v29 = vsel %vm2415_vm2, %v6366_v56, %v6365_v40  ;;  %vm301_vm11 = vcmp.lt.s32.totalorder %v3831_v14, 11  ;;  %v1556_v19 = vsel %vm6359_vm12, %v1553_v61, %v5343_v9 }
 0x3ce   :  { %v1572_v57 = vadd.f32 %v1568_v36, %v5327_v15  ;;  %v1557_v55 = vsel %vm6367_vm15, %v5301_v50, %v1553_v61  ;;  %vm302_vm7 = vcmp.lt.s32.totalorder %v3834_v8, 11  ;;  %vm6369_vm8 = vcmp.lt.s32.totalorder %v3831_v14, 15 }
 0x3cf   :  { %v1575_v63 = vadd.f32 %v1571_v22, %v1547_v33  ;;  %v1561_v0 = vsel %vm4397_vm9, %v1557_v55, 0.0  ;;  %v1562_v12 = vsel %vm6369_vm8, %v1556_v19, 0.0  ;;  %v5457_v39 = vadd.f32 %v2004_v30, %v1972_v53  ;;  %v6370_v33 = vld [vmem:[#allocation39_spill] sm:$0xff]  ;;  %v2018_v43 = vpop.permute.xlu0 %2017  ;;  %v2349_v1 = vpop.permute.xlu1 %2348 }
 0x3d0   :  { %v5459_v15 = vadd.f32 %v2005_v23, %v1973_v7  ;;  %v5462_v3 = vadd.f32 %v6370_v33, %v1572_v57  ;;  %v1569_v50 = vmul.f32 %v6363_v5, %v1561_v0  ;;  %v1570_v18 = vmul.f32 %v6363_v5, %v1562_v12  ;;  %v6379_v23 = vld [vmem:[#allocation68_spill] sm:$0xff] }
 0x3d1   :  { %v5465_v9 = vadd.f32 %v6370_v33, %v1575_v63  ;;  %v5471_v21 = vmul.f32 %v6371_v26, %v5297_v25  ;;  %v5475_v41 = vmul.f32 %v6371_v26, %v5335_v13  ;;  %v2489_v27 = vsel %vm2415_vm2, %v6365_v40, %v6372_v6 }
 0x3d2   :  { %v2500_v11 = vsel %vm299_vm14, %v2490_v29, 0.0  ;;  %v1589_v24 = vmin.f32 %v5462_v3, 0.0  ;;  %v1573_v25 = vadd.f32 %v1569_v50, %v5330_v46  ;;  %v1574_v17 = vadd.f32 %v1570_v18, %v5372_v4 }
 0x3d3   :  { %v1592_v59 = vmin.f32 %v5465_v9, 0.0  ;;  %v5489_v13 = vmul.f32 %v6371_v26, %v5377_v34  ;;  %v5492_v53 = vmul.f32 %v6371_v26, %v2467_v62  ;;  %vm6373_vm8 = vcmp.ge.s32.totalorder %v6291_v2, 80  ;;  %v6378_v62 = vld [vmem:[#allocation23_spill] sm:$0xff]  ;;  %v2353_v57 = vpop.permute.xlu1 %2352  ;;  %v5541_v0 = vpop.permute.xlu0 %2407 }
 0x3d4   :  { %vm5498_vm9 = vmand %vm6373_vm8, %vm297_vm6  ;;  %vm6376_vm12 = vcmp.lt.s32.totalorder %v3589_v58, 5  ;;  %v1593_v34 = vmul.f32 1.442695, %v1589_v24  ;;  %v5509_v36 = vadd.f32 %v6370_v33, %v1573_v25  ;;  %v5512_v22 = vadd.f32 %v6370_v33, %v1574_v17 }
 0x3d5   :  { %v2356_v46 = vsel %vm6376_vm12, %v2349_v1, %v5412_v10  ;;  %vm6377_vm15 = vmmov %vm6376_vm12  ;;  %v1599_v5 = vmul.f32 1.442695, %v1592_v59  ;;  %v2501_v20 = vsel %vm300_vm5, %v2489_v27, 0.0  ;;  %v5517_v30 = vmul.f32 %v6378_v62, %v2500_v11 }
 0x3d6   :  { %v2357_v4 = vsel %vm6377_vm15, %v5389_v51, %v2349_v1  ;;  %v2488_v40 = vsel %vm2415_vm2, %v6372_v6, %v6379_v23  ;;  %vm6380_vm8 = vcmp.ge.s32.totalorder %v6292_v37, 80  ;;  %3145 = vpow2.f32 %v1593_v34 }
 0x3d7   :  { %v2368_v29 = vsel %vm296_vm10, %v2357_v4, 0.0  ;;  %vm5529_vm12 = vmand %vm6380_vm8, %vm6137_vm3  ;;  %v1590_v63 = vmin.f32 %v5509_v36, 0.0  ;;  %v1591_v19 = vmin.f32 %v5512_v22, 0.0  ;;  %v2369_v55 = vsel %vm5498_vm9, %v2356_v46, 0.0  ;;  %v2012_v59 = vpop.permute.xlu1 %2011 }
 0x3d8   :  { %v2491_v31 = vsel %vm2415_vm2, %v6379_v23, %v6366_v56  ;;  %3147 = vpow2.f32 %v1599_v5  ;;  %v2355_v12 = vsel %vm6377_vm15, %v5412_v10, %v2353_v57  ;;  %vm6383_vm8 = vmmov %vm6377_vm15  ;;  %v2502_v50 = vsel %vm301_vm11, %v2488_v40, 0.0  ;;  %v6384_v56 = vld [vmem:[#allocation28_spill] sm:$0xff]  ;;  %v6388_v10 = vld [vmem:[#allocation42_spill] sm:$0xff] }
 0x3d9   :  { %v2358_v33 = vsel %vm6383_vm8, %v2353_v57, %v5389_v51  ;;  %v1595_v18 = vmul.f32 1.442695, %v1590_v63  ;;  %v1597_v26 = vmul.f32 1.442695, %v1591_v19  ;;  %vm6385_vm9 = vcmp.lt.s32.totalorder %v6384_v56, 208  ;;  %v6392_v40 = vld [vmem:[#allocation31_spill] sm:$0xff] }
 0x3da   :  { %v2367_v6 = vsel %vm5529_vm12, %v2358_v33, 0.0  ;;  %vm5557_vm3 = vmand %vm6385_vm9, %vm264_vm1  ;;  %v2376_v11 = vmul.f32 %v6388_v10, %v2368_v29  ;;  %v2377_v51 = vmul.f32 %v6388_v10, %v2369_v55  ;;  %v2370_v1 = vsel %vm298_vm0, %v2355_v12, 0.0  ;;  %v6397_v63 = vld [vmem:[#allocation72_spill] sm:$0xff]  ;;  %v6398_v55 = vld [vmem:[#allocation29_spill] sm:$0xff] }
 0x3db   :  { %v2375_v24 = vmul.f32 %v6388_v10, %v2367_v6  ;;  %v2503_v25 = vsel %vm302_vm7, %v2491_v31, 0.0  ;;  %3149 = vpow2.f32 %v1595_v18  ;;  %vm6389_vm1 = vcmp.lt.s32.totalorder %v3589_v58, 3  ;;  %v6399_v12 = vld [vmem:[#allocation30_spill] sm:$0xff]  ;;  %v2016_v18 = vpop.permute.xlu1 %2015 }
 0x3dc   :  { %v2021_v17 = vsel %vm6389_vm1, %v2012_v59, %v5443_v38  ;;  %vm6390_vm12 = vmmov %vm6389_vm1  ;;  %v5574_v46 = vmul.f32 %v6378_v62, %v2501_v20  ;;  %v2378_v4 = vmul.f32 %v6388_v10, %v2370_v1  ;;  %vm6391_vm15 = vcmp.ge.s32.totalorder %v3828_v44, 3  ;;  %v6402_v10 = vld [vmem:[#allocation73_spill] sm:$0xff] }
 0x3dd   :  { %v2022_v7 = vsel %vm6390_vm12, %v2018_v43, %v2012_v59  ;;  %v2032_v5 = vsel %vm5557_vm3, %v2021_v17, 0.0  ;;  %v5582_v23 = vmul.f32 %v6378_v62, %v2502_v50  ;;  %3151 = vpow2.f32 %v1597_v26  ;;  %v2412_v50 = vpop.permute.xlu0 %2411  ;;  %vm6400_vm3 = vmmov %vm6390_vm12 }
 0x3de   :  { %v2031_v34 = vsel %vm6391_vm15, %v2022_v7, 0.0  ;;  %v2040_v61 = vmul.f32 %v6392_v40, %v2032_v5  ;;  %vm6393_vm8 = vcmp.ge.s32.totalorder %v3834_v8, 3  ;;  %vm6394_vm9 = vcmp.lt.s32.totalorder %v6206_v45, 208  ;;  %vm6401_vm12 = vmmov %vm6400_vm3 }
 0x3df   :  { %v2039_v29 = vmul.f32 %v6392_v40, %v2031_v34  ;;  %vm5590_vm1 = vmand %vm6394_vm9, %vm6393_vm8  ;;  %v5595_v57 = vmul.f32 %v6378_v62, %v2503_v25  ;;  %v2380_v19 = vadd.f32 %v2376_v11, %v6397_v63  ;;  %v2381_v31 = vadd.f32 %v2377_v51, %v6398_v55  ;;  %v2410_v7 = vpop.permute.xlu1 %2409 }
 0x3e0   :  { %v2379_v33 = vadd.f32 %v2375_v24, %v6399_v12  ;;  %v2044_v6 = vadd.f32 %v2040_v61, %v5457_v39  ;;  %v2019_v27 = vsel %vm6400_vm3, %v2016_v18, %v2018_v43  ;;  %v2020_v62 = vsel %vm6401_vm12, %v5443_v38, %v2016_v18 }
 0x3e1   :  { %v2043_v26 = vadd.f32 %v2039_v29, %v5425_v35  ;;  %vm1588_vm15 = vcmp.gt.f32.partialorder %v5465_v9, 0.0  ;;  %v2382_v11 = vadd.f32 %v2378_v4, %v6402_v10  ;;  %vm6403_vm8 = vcmp.ge.s32.totalorder %v3831_v14, 3  ;;  %v3146_v35 = vpop.eup %3145  ;;  %v2074_v29 = vpop.permute.xlu0 %2073 }
 0x3e2   :  { %v2033_v51 = vsel %vm6403_vm8, %v2020_v62, 0.0  ;;  %v2034_v1 = vsel %vm5590_vm1, %v2019_v27, 0.0  ;;  %vm1585_vm9 = vcmp.gt.f32.partialorder %v5462_v3, 0.0  ;;  %vm6404_vm3 = vcmp.ge.s32.totalorder %v6292_v37, 80  ;;  %v3148_v25 = vpop.eup %3147 }
 0x3e3   :  { %v2041_v39 = vmul.f32 %v6392_v40, %v2033_v51  ;;  %v2042_v43 = vmul.f32 %v6392_v40, %v2034_v1  ;;  %vm5620_vm12 = vmand %vm6404_vm3, %vm299_vm14  ;;  %v5625_v24 = vadd.f32 %v5187_v28, %v2043_v26  ;;  %v5628_v59 = vadd.f32 %v5194_v42, %v2044_v6 }
 0x3e4   :  { %vm1586_vm1 = vcmp.gt.f32.partialorder %v5509_v36, 0.0  ;;  %v2404_v17 = vadd.f32 %v5104_v60, %v2380_v19  ;;  %v2403_v4 = vadd.f32 %v5249_v47, %v2379_v33  ;;  %v2405_v37 = vadd.f32 %v5183_v54, %v2381_v31  ;;  %v2414_v33 = vpop.permute.xlu1 %2413 }
 0x3e5   :  { %v2991_v34 = vadd.f32 -1.0, %v3146_v35  ;;  %v2045_v5 = vadd.f32 %v2041_v39, %v5459_v15  ;;  %v2046_v40 = vadd.f32 %v2042_v43, %v5427_v48  ;;  %v2417_v28 = vsel %vm2415_vm2, %v2410_v7, %v2412_v50  ;;  %v3150_v20 = vpop.eup %3149  ;;  %v6407_v15 = vld [vmem:[#allocation43_spill] sm:$0xff]  ;;  %v2078_v39 = vpop.permute.xlu0 %2077 }
 0x3e6   :  { %v2418_v42 = vsel %vm2415_vm2, %v5541_v0, %v2410_v7  ;;  %v2429_v47 = vsel %vm300_vm5, %v2417_v28, 0.0  ;;  %v2994_v54 = vadd.f32 -1.0, %v3148_v25  ;;  %vm6408_vm8 = vcmp.ge.s32.totalorder %v6291_v2, 80 }
 0x3e7   :  { %v2428_v60 = vsel %vm5620_vm12, %v2418_v42, 0.0  ;;  %v1605_v61 = vmul.f32 1.6732632, %v2991_v34  ;;  %v2437_v48 = vmul.f32 %v6407_v15, %v2429_v47  ;;  %vm5651_vm3 = vmand %vm6408_vm8, %vm301_vm11  ;;  %v2070_v55 = vadd.f32 %v5252_v49, %v2046_v40  ;;  %v3152_v27 = vpop.eup %3151 }
 0x3e8   :  { %v2436_v63 = vmul.f32 %v6407_v15, %v2428_v60  ;;  %v5657_v31 = vadd.f32 %v5227_v32, %v2045_v5  ;;  %v2406_v12 = vadd.f32 %v5213_v16, %v2382_v11  ;;  %v1608_v18 = vmul.f32 1.6732632, %v2994_v54  ;;  %v2072_v43 = vpop.permute.xlu1 %2071 }
 0x3e9   :  { %v2992_v26 = vadd.f32 -1.0, %v3150_v20  ;;  %v1609_v6 = vsel %vm1585_vm9, %v5462_v3, %v1605_v61  ;;  %v2441_v62 = vadd.f32 %v2437_v48, %v2404_v17  ;;  %v2416_v10 = vsel %vm2415_vm2, %v2412_v50, %v2414_v33 }
 0x3ea   :  { %v2440_v2 = vadd.f32 %v2436_v63, %v2403_v4  ;;  %v2419_v32 = vsel %vm2415_vm2, %v2414_v33, %v5541_v0  ;;  %vm1587_vm12 = vcmp.gt.f32.partialorder %v5512_v22, 0.0  ;;  %v2430_v16 = vsel %vm5651_vm3, %v2416_v10, 0.0 }
 0x3eb   :  { %v2431_v49 = vsel %vm302_vm7, %v2419_v32, 0.0  ;;  %v1612_v3 = vsel %vm1588_vm15, %v5465_v9, %v1608_v18  ;;  %v1606_v11 = vmul.f32 1.6732632, %v2992_v26  ;;  %v2477_v50 = vadd.f32 %v5471_v21, %v2441_v62 }
 0x3ec   :  { %v2476_v51 = vadd.f32 %v5489_v13, %v2440_v2  ;;  %v2438_v1 = vmul.f32 %v6407_v15, %v2430_v16  ;;  %v2439_v0 = vmul.f32 %v6407_v15, %v2431_v49  ;;  %vm6411_vm9 = vcmp.lt.s32.totalorder %v6206_v45, 208  ;;  %v2076_v61 = vpop.permute.xlu1 %2075  ;;  %v2995_v2 = vld [vmem:[%s6013_s8 + $0x1] sm:$0x1] }
 0x3ed   :  { %vm5684_vm8 = vmand %vm6411_vm9, %vm270_vm13  ;;  %v1616_v9 = vmul.f32 1.050701, %v1612_v3  ;;  %v1610_v13 = vsel %vm1586_vm1, %v5509_v36, %v1606_v11  ;;  %v1613_v21 = vmul.f32 1.050701, %v1609_v6  ;;  %v2993_v38 = vadd.f32 -1.0, %v3152_v27 }
 0x3ee   :  { %v2442_v25 = vadd.f32 %v2438_v1, %v2405_v37  ;;  %v2443_v17 = vadd.f32 %v2439_v0, %v2406_v12  ;;  %vm6414_vm15 = vcmp.lt.s32.totalorder %v3589_v58, 125  ;;  %vm6416_vm13 = vcmp.lt.s32.totalorder %v3828_v44, 13  ;;  %v6417_v37 = vld [vmem:[#allocation22_spill] sm:$0xff] }
 0x3ef   :  { %v2081_v7 = vsel %vm6414_vm15, %v2072_v43, %v2074_v29  ;;  %vm6415_vm3 = vmmov %vm6414_vm15  ;;  %v1624_v40 = vpack.c.bf16 %v1616_v9, %v1616_v9  ;;  %v1614_v28 = vmul.f32 1.050701, %v1610_v13  ;;  %vm6418_vm1 = vcmp.lt.s32.totalorder %v6384_v56, 208 }
 0x3f0   :  { %v2082_v4 = vsel %vm6415_vm3, %v2078_v39, %v2072_v43  ;;  %v2091_v34 = vsel %vm6416_vm13, %v2081_v7, 0.0  ;;  %v2478_v36 = vadd.f32 %v5475_v41, %v2442_v25  ;;  %v2479_v42 = vadd.f32 %v5492_v53, %v2443_v17  ;;  %vm5707_vm9 = vmand %vm6418_vm1, %vm268_vm4  ;;  %v2517_v10 = vpop.permute.xlu1 %2516 }
 0x3f1   :  { %v2094_v5 = vsel %vm5684_vm8, %v2082_v4, 0.0  ;;  %v2099_v60 = vmul.f32 %v6417_v37, %v2091_v34  ;;  %vm6421_vm15 = vcmask 1043456   ;;  %v1622_v20 = vpack.c.bf16 %v1614_v28, %v1614_v28  ;;  %vm6422_vm8 = vmmov %vm6415_vm3  ;;  %v6440_v28 = vld [vmem:[#allocation36_spill] sm:$0xff] }
 0x3f2   :  { %v2102_v47 = vmul.f32 %v6417_v37, %v2094_v5  ;;  %2999 = vmatprep.subr.msk.bf16.mxu1 %vm6421_vm15, %v1624_v40  ;;  %v1621_v15 = vpack.c.bf16 %v1613_v21, %v1613_v21  ;;  %v1607_v41 = vmul.f32 1.6732632, %v2993_v38  ;;  %v5713_v53 = vadd.f32 %v5574_v46, %v2477_v50  ;;  %vm6423_vm4 = vmmov %vm6415_vm3 }
 0x3f3   :  { %v2103_v63 = vadd.f32 %v2099_v60, %v5625_v24  ;;  %v2079_v19 = vsel %vm6422_vm8, %v2076_v61, %v2078_v39  ;;  %v2080_v12 = vsel %vm6423_vm4, %v2074_v29, %v2076_v61  ;;  %vm6424_vm3 = vcmp.lt.s32.totalorder %v3831_v14, 13  ;;  %vm6425_vm13 = vmmov %vm6421_vm15  ;;  %v2521_v39 = vpop.permute.xlu0 %2520 }
 0x3f4   :  { %v2106_v48 = vadd.f32 %v2102_v47, %v2070_v55  ;;  %v2092_v33 = vsel %vm5707_vm9, %v2080_v12, 0.0  ;;  %v2093_v18 = vsel %vm6424_vm3, %v2079_v19, 0.0  ;;  %2997 = vmatprep.subr.msk.bf16.mxu0 %vm6425_vm13, %v1622_v20  ;;  %vm6426_vm1 = vmmov %vm6425_vm13  ;;  %v1611_v24 = vsel %vm1587_vm12, %v5512_v22, %v1607_v41  ;;  %v6427_v55 = vld [vmem:[#allocation26_spill] sm:$0xff]  ;;  %v6442_v47 = vld [vmem:[#allocation49_spill] sm:$0xff] }
 0x3f5   :  { %v1634_v46 = vsel %vm6426_vm1, %v1621_v15, 0  ;;  %v5730_v26 = vadd.f32 %v6427_v55, %v2103_v63  ;;  %v2100_v29 = vmul.f32 %v6417_v37, %v2092_v33  ;;  %v2101_v27 = vmul.f32 %v6417_v37, %v2093_v18  ;;  %vm6430_vm15 = vmmov %vm6426_vm1  ;;  %v6443_v20 = vld [vmem:[#allocation48_spill] sm:$0xff]  ;;  %v6444_v19 = vld [vmem:[#allocation50_spill] sm:$0xff] }
 0x3f6   :  { %v5733_v6 = vadd.f32 %v6427_v55, %v2106_v48  ;;  %1646 = vmatpush1.bf16.msra.mxu0 %v1634_v46  ;;  %v1615_v62 = vmul.f32 1.050701, %v1611_v24  ;;  %v2514_v32 = vadd.f32 %v5582_v23, %v2478_v36  ;;  %v2515_v22 = vadd.f32 %v5595_v57, %v2479_v42  ;;  %v6445_v12 = vld [vmem:[#allocation27_spill] sm:$0xff] }
 0x3f7   :  { %v2512_v16 = vadd.f32 %v5517_v30, %v2476_v51  ;;  %v2120_v49 = vmin.f32 %v5730_v26, 0.0  ;;  %v2104_v11 = vadd.f32 %v2100_v29, %v5628_v59  ;;  %v2105_v50 = vadd.f32 %v2101_v27, %v5657_v31  ;;  %v2519_v31 = vpop.permute.xlu1 %2518  ;;  %v6448_v27 = vld [vmem:[#allocation51_spill] sm:$0xff] }
 0x3f8   :  { %v2123_v3 = vmin.f32 %v5733_v6, 0.0  ;;  %v1623_v1 = vpack.c.bf16 %v1615_v62, %v1615_v62  ;;  %vm6428_vm12 = vcmask 64512   ;;  %vm292_vm9 = vcmp.lt.s32.totalorder %v6384_v56, 176  ;;  %v2581_v62 = vpop.permute.xlu0 %2580 }
 0x3f9   :  { %2998 = vmatmul.mubr.msk.bf16.vlgmr.msra.gmra.mrb[8].mxu0 %vm6428_vm12, %v2995_v2  ;;  %v2124_v0 = vmul.f32 1.442695, %v2120_v49  ;;  %v5750_v23 = vadd.f32 %v6427_v55, %v2104_v11  ;;  %v5753_v30 = vadd.f32 %v6427_v55, %v2105_v50  ;;  %v6429_v57 = vmov 0   ;;  %vm5761_vm8 = vmand %vm292_vm9, %vm296_vm10 }
 0x3fa   :  { %v2130_v35 = vmul.f32 1.442695, %v2123_v3  ;;  %2208 = vmatprep.mubr.bf16.mxu0 %v6429_v57  ;;  %v1640_v51 = vsel %vm6430_vm15, %v1623_v1, 0  ;;  %vm6433_vm4 = vcmp.lt.s32.totalorder %v3589_v58, 5  ;;  %vm294_vm10 = vcmp.lt.s32.totalorder %v6206_v45, 176  ;;  %vm6437_vm1 = vmmov %vm6428_vm12 }
 0x3fb   :  { %3153 = vpow2.f32 %v2124_v0  ;;  %v2121_v43 = vmin.f32 %v5750_v23, 0.0  ;;  %v2122_v9 = vmin.f32 %v5753_v30, 0.0  ;;  %1687 = vmatpush1.bf16.msra.mxu1 %v1640_v51  ;;  %v2525_v13 = vsel %vm6433_vm4, %v2519_v31, %v2521_v39  ;;  %vm6434_vm3 = vmmov %vm6433_vm4  ;;  %v2523_v4 = vpop.permute.xlu1 %2522 }
 0x3fc   :  { %3155 = vpow2.f32 %v2130_v35  ;;  %v2526_v21 = vsel %vm6434_vm3, %v2517_v10, %v2519_v31  ;;  %vm5778_vm13 = vmand %vm294_vm10, %vm298_vm0  ;;  %v2538_v34 = vsel %vm297_vm6, %v2525_v13, 0.0  ;;  %vm6441_vm0 = vcmp.ge.s32.totalorder %v3828_v44, 5  ;;  %v6449_v35 = vld [vmem:[#allocation17_spill] sm:$0xff] }
 0x3fd   :  { %v2126_v38 = vmul.f32 1.442695, %v2121_v43  ;;  %v2128_v25 = vmul.f32 1.442695, %v2122_v9  ;;  %v2537_v17 = vsel %vm5761_vm8, %v2526_v21, 0.0  ;;  %vm6438_vm12 = vmmov %vm6434_vm3  ;;  %v2561_v54 = vsel %vm292_vm9, %v6442_v47, 0.0 }
 0x3fe   :  { %3000 = vmatmul.mubr.msk.bf16.vlgmr.msra.gmra.mrb[8].mxu1 %vm6437_vm1, %v2995_v2  ;;  %v2524_v5 = vsel %vm6438_vm12, %v2521_v39, %v2523_v4  ;;  %vm6439_vm15 = vmmov %vm6434_vm3  ;;  %v2545_v36 = vmul.f32 %v6440_v28, %v2537_v17  ;;  %v2546_v61 = vmul.f32 %v6440_v28, %v2538_v34  ;;  %v2563_v15 = vsel %vm294_vm10, %v6443_v20, 0.0 }
 0x3ff   :  { %3157 = vpow2.f32 %v2126_v38  ;;  %v2527_v40 = vsel %vm6439_vm15, %v2523_v4, %v2517_v10  ;;  %2249 = vmatprep.mubr.bf16.mxu1 %v6429_v57  ;;  %v2539_v37 = vsel %vm5778_vm13, %v2524_v5, 0.0  ;;  %v2577_v63 = vpop.permute.xlu1 %2576  ;;  %v2568_v33 = vmul.f32 %v6445_v12, %v6444_v19  ;;  %vm5813_vm6 = vmand %vm292_vm9, %vm300_vm5 }
 0x400   :  { %v2536_v42 = vsel %vm6441_vm0, %v2527_v40, 0.0  ;;  %3159 = vpow2.f32 %v2128_v25  ;;  %v2547_v41 = vmul.f32 %v6440_v28, %v2539_v37  ;;  %v2549_v48 = vadd.f32 %v2545_v36, %v5713_v53  ;;  %vm5836_vm9 = vmand %vm294_vm10, %vm302_vm7  ;;  %v6452_v40 = vld [vmem:[#allocation32_spill] sm:$0xff] }
 0x401   :  { %v2544_v60 = vmul.f32 %v6440_v28, %v2536_v42  ;;  %v2569_v46 = vmul.f32 %v6445_v12, %v2561_v54  ;;  %v2571_v24 = vmul.f32 %v6445_v12, %v2563_v15  ;;  %v2570_v53 = vmul.f32 %v6445_v12, %v6448_v27  ;;  %v3012_v27 = vld [vmem:[%s6013_s8 + $0x2] sm:$0x1]  ;;  %vm6456_vm3 = vmmov %vm6437_vm1 }
 0x402   :  { %v2550_v10 = vadd.f32 %v2546_v61, %v2514_v32  ;;  %v2551_v49 = vadd.f32 %v2547_v41, %v2515_v22  ;;  %vm2119_vm8 = vcmp.gt.f32.partialorder %v5733_v6, 0.0  ;;  %vm2116_vm4 = vcmp.gt.f32.partialorder %v5730_v26, 0.0  ;;  %vm6458_vm13 = vmmov %vm6437_vm1 }
 0x403   :  { %v2548_v55 = vadd.f32 %v2544_v60, %v2512_v16  ;;  %v2579_v3 = vpop.permute.xlu1 %2578  ;;  %vm2117_vm5 = vcmp.gt.f32.partialorder %v5750_v23, 0.0  ;;  %v2573_v11 = vadd.f32 %v2569_v46, %v2549_v48 }
 0x404   :  { %v2585_v52 = vsel %vm2415_vm2, %v2579_v3, %v2581_v62  ;;  %v2586_v56 = vsel %vm2415_vm2, %v2577_v63, %v2579_v3  ;;  %v2574_v39 = vadd.f32 %v2570_v53, %v2550_v10  ;;  %v2575_v43 = vadd.f32 %v2571_v24, %v2551_v49 }
 0x405   :  { %v3154_v18 = vpop.eup %3153  ;;  %v2596_v50 = vsel %vm299_vm14, %v2586_v56, 0.0  ;;  %v2597_v32 = vsel %vm5813_vm6, %v2585_v52, 0.0  ;;  %v2572_v0 = vadd.f32 %v2568_v33, %v2548_v55  ;;  %vm2118_vm14 = vcmp.gt.f32.partialorder %v5753_v30, 0.0 }
 0x406   :  { %v3156_v2 = vpop.eup %3155  ;;  %v3008_v22 = vadd.f32 -1.0, %v3154_v18  ;;  %v2604_v51 = vmul.f32 %v6449_v35, %v2596_v50  ;;  %v2605_v59 = vmul.f32 %v6449_v35, %v2597_v32 }
 0x407   :  { %v3011_v16 = vadd.f32 -1.0, %v3156_v2  ;;  %v2583_v9 = vpop.permute.xlu1 %2582 }
 0x408   :  { %v2136_v21 = vmul.f32 1.6732632, %v3008_v22  ;;  %v2608_v25 = vadd.f32 %v2604_v51, %v2572_v0  ;;  %v2609_v17 = vadd.f32 %v2605_v59, %v2573_v11  ;;  %v2584_v7 = vsel %vm2415_vm2, %v2581_v62, %v2583_v9 }
 0x409   :  { %v3158_v1 = vpop.eup %3157  ;;  %v2139_v44 = vmul.f32 1.6732632, %v3011_v16  ;;  %v2587_v8 = vsel %vm2415_vm2, %v2583_v9, %v2577_v63  ;;  %v2598_v45 = vsel %vm301_vm11, %v2584_v7, 0.0  ;;  %vm6453_vm2 = vcmask 1043456   ;;  %v3029_v9 = vld [vmem:[%s6013_s8 + $0x3] sm:$0x1] }
 0x40a   :  { %v3009_v13 = vadd.f32 -1.0, %v3158_v1  ;;  %v3160_v38 = vpop.eup %3159  ;;  %v2599_v4 = vsel %vm5836_vm9, %v2587_v8, 0.0  ;;  %v2617_v28 = vadd.f32 %v6452_v40, %v2608_v25  ;;  %v2618_v36 = vadd.f32 %v6452_v40, %v2609_v17  ;;  %vm6454_vm11 = vmmov %vm6453_vm2  ;;  %s3306_s8 = smov [#allocation8]  }
 0x40b   :  { %v2143_v34 = vsel %vm2119_vm8, %v5733_v6, %v2139_v44  ;;  %v2606_v42 = vmul.f32 %v6449_v35, %v2598_v45  ;;  %v2607_v58 = vmul.f32 %v6449_v35, %v2599_v4  ;;  %v2140_v60 = vsel %vm2116_vm4, %v5730_v26, %v2136_v21  ;;  %vm6455_vm7 = vmmov %vm6453_vm2  ;;  %v1163_v45 = vpop.permute.xlu0 %1162  ;;  %v6465_v4 = vld [vmem:[#allocation65_spill] sm:$0xff]  ;;  %s2953_s12 = sshll.u32 %s3306_s8, 4  ;;  %s2954_s12 = int_to_ptr.vmem [resolvable:$true] %s2953_s12 }
 0x40c   :  { %v2137_v5 = vmul.f32 1.6732632, %v3009_v13  ;;  %v2147_v37 = vmul.f32 1.050701, %v2143_v34  ;;  %v3010_v47 = vadd.f32 -1.0, %v3160_v38  ;;  %v2625_v6 = vmin.f32 %v2617_v28, 0.0  ;;  %vm6457_vm10 = vmmov %vm6453_vm2  ;;  %p3259_p3 = scmp.lt.s32.totalorder %s2954_s12, %s2954_s12 }
 0x40d   :  { %v2626_v54 = vmin.f32 %v2618_v36, 0.0  ;;  %v2610_v61 = vadd.f32 %v2606_v42, %v2574_v39  ;;  %v2611_v20 = vadd.f32 %v2607_v58, %v2575_v43  ;;  %v2144_v63 = vmul.f32 1.050701, %v2140_v60  ;;  %vm6459_vm15 = vmmov %vm6453_vm2  ;;  %v6468_v58 = vld [vmem:[#allocation66_spill] sm:$0xff]  ;;  %s3254_s23 = scalar_lea.vmem %s2954_s12, 64 }
 0x40e   :  { %v2141_v14 = vsel %vm2117_vm5, %v5750_v23, %v2137_v5  ;;  %v2155_v15 = vpack.c.bf16 %v2147_v37, %v2147_v37  ;;  %v2138_v48 = vmul.f32 1.6732632, %v3010_v47  ;;  %v2629_v19 = vmul.f32 1.442695, %v2625_v6  ;;  %vm6460_vm0 = vmmov %vm6453_vm2  ;;  %v6466_v5 = vld [vmem:[#allocation67_spill] sm:$0xff]  ;;  %p3255_p2 = scmp.ne.s32.totalorder %s2954_s12, %s3254_s23  ;;  %p3260_p4 = scmp.lt.s32.totalorder %s3254_s23, %s3254_s23 }
 0x40f   :  { %v2145_v41 = vmul.f32 1.050701, %v2141_v14  ;;  %v2631_v12 = vmul.f32 1.442695, %v2626_v54  ;;  %v2619_v33 = vadd.f32 %v6452_v40, %v2610_v61  ;;  %v2620_v18 = vadd.f32 %v6452_v40, %v2611_v20  ;;  %vm6461_vm4 = vmmov %vm6456_vm3 }
 0x410   :  { %3016 = vmatprep.subr.msk.bf16.mxu1 %vm6453_vm2, %v2155_v15  ;;  %v2152_v46 = vpack.c.bf16 %v2144_v63, %v2144_v63  ;;  %3161 = vpow2.f32 %v2629_v19  ;;  %v2142_v24 = vsel %vm2118_vm14, %v5753_v30, %v2138_v48  ;;  %vm2621_vm1 = vcmp.gt.f32.partialorder %v2617_v28, 0.0  ;;  %vm6462_vm5 = vmmov %vm6460_vm0  ;;  %p3261_p5 = por %p3260_p4, %p3259_p3 }
 0x411   :  { %v2153_v23 = vpack.c.bf16 %v2145_v41, %v2145_v41  ;;  %v2627_v26 = vmin.f32 %v2619_v33, 0.0  ;;  %3163 = vpow2.f32 %v2631_v12  ;;  %v2628_v29 = vmin.f32 %v2620_v18, 0.0  ;;  %vm6463_vm9 = vmmov %vm6460_vm0 }
 0x412   :  { %v2165_v55 = vsel %vm6455_vm7, %v2152_v46, 0  ;;  %v2146_v2 = vmul.f32 1.050701, %v2142_v24  ;;  %vm2622_vm12 = vcmp.gt.f32.partialorder %v2618_v36, 0.0  ;;  %vm2623_vm6 = vcmp.gt.f32.partialorder %v2619_v33, 0.0  ;;  %vm6464_vm2 = vmmov %vm6456_vm3  ;;  %v5889_v24 = vpop.permute.xlu0 %2158  ;;  %p3262_p6 = pnand %p3261_p5, %p3255_p2 }
 0x413   :  { %3014 = vmatprep.subr.msk.bf16.mxu0 %vm6454_vm11, %v2153_v23  ;;  %v2633_v53 = vmul.f32 1.442695, %v2627_v26  ;;  %v2635_v10 = vmul.f32 1.442695, %v2628_v29  ;;  %vm2624_vm8 = vcmp.gt.f32.partialorder %v2620_v18, 0.0  ;;  %v1217_v34 = vadd.f32 %v6465_v4, %v1163_v45  ;;  %v6469_v4 = vld [vmem:[#allocation33_spill] sm:$0xff] }
 0x414   :  { %2177 = vmatpush1.bf16.msra.mxu0 %v2165_v55  ;;  %v2154_v62 = vpack.c.bf16 %v2146_v2, %v2146_v2  ;;  %v1258_v40 = vadd.f32 %v6466_v5, %v1163_v45  ;;  %v1219_v37 = vadd.f32 %v6468_v58, %v1163_v45 }
 0x415   :  { %3165 = vpow2.f32 %v2633_v53  ;;  %v1268_v42 = vmin.f32 %v1217_v34, 0.0  ;;  %vm1264_vm14 = vcmp.gt.f32.partialorder %v1217_v34, 0.0 }
 0x416   :  { %v2171_v30 = vsel %vm6457_vm10, %v2154_v62, 0  ;;  %3167 = vpow2.f32 %v2635_v10  ;;  %v1270_v14 = vmin.f32 %v1258_v40, 0.0  ;;  %v1269_v6 = vmin.f32 %v1219_v37, 0.0 }
 0x417   :  { %3015 = vmatmul.mubr.msk.bf16.vlgmr.msra.gmra.mrb[12].mxu0 %vm6456_vm3, %v3012_v27  ;;  %2218 = vmatpush1.bf16.msra.mxu1 %v2171_v30  ;;  %v1272_v47 = vmul.f32 1.442695, %v1268_v42  ;;  %vm1266_vm11 = vcmp.gt.f32.partialorder %v1258_v40, 0.0  ;;  %vm1265_vm7 = vcmp.gt.f32.partialorder %v1219_v37, 0.0  ;;  %vm1306_vm10 = vcmask 1041408  }
 0x418   :  { %2713 = vmatprep.mubr.bf16.mxu0 %v6429_v57  ;;  %v1276_v54 = vmul.f32 1.442695, %v1270_v14  ;;  %v1274_v20 = vmul.f32 1.442695, %v1269_v6  ;;  %v6471_v6 = vld [vmem:[#allocation35_spill] sm:$0xff] }
 0x419   :  { %3169 = vpow2.f32 %v1272_v47 }
 0x41a   :  { %v3162_v49 = vpop.eup %3161  ;;  %3017 = vmatmul.mubr.msk.bf16.vlgmr.msra.gmra.mrb[12].mxu1 %vm6458_vm13, %v3012_v27  ;;  %3171 = vpow2.f32 %v1276_v54  ;;  %v1628_v27 = vpop.permute.xlu1 %1627 }
 0x41b   :  { %v3164_v3 = vpop.eup %3163  ;;  %v3025_v52 = vadd.f32 -1.0, %v3162_v49  ;;  %2754 = vmatprep.mubr.bf16.mxu1 %v6429_v57  ;;  %v1300_v49 = vpop.permute.xlu0 %1299 }
 0x41c   :  { %v3026_v56 = vadd.f32 -1.0, %v3164_v3 }
 0x41d   :  { %v2641_v16 = vmul.f32 1.6732632, %v3025_v52 }
 0x41e   :  { %v2642_v11 = vmul.f32 1.6732632, %v3026_v56 }
 0x41f   :  { %v2645_v50 = vsel %vm2621_vm1, %v2617_v28, %v2641_v16  ;;  %v3166_v32 = vpop.eup %3165  ;;  %v6467_v28 = vld [vmem:[#allocation69_spill] sm:$0xff]  ;;  %v5891_v16 = vpop.permute.xlu1 %2663 }
 0x420   :  { %v2646_v22 = vsel %vm2622_vm12, %v2618_v36, %v2642_v11  ;;  %v2649_v1 = vmul.f32 1.050701, %v2645_v50  ;;  %v3168_v0 = vpop.eup %3167  ;;  %v3027_v35 = vadd.f32 -1.0, %v3166_v32  ;;  %v1260_v36 = vadd.f32 %v6467_v28, %v1163_v45  ;;  %v6470_v28 = vld [vmem:[#allocation34_spill] sm:$0xff] }
 0x421   :  { %v2650_v51 = vmul.f32 1.050701, %v2646_v22  ;;  %v3028_v44 = vadd.f32 -1.0, %v3168_v0 }
 0x422   :  { %v2657_v59 = vpack.c.bf16 %v2649_v1, %v2649_v1  ;;  %v2643_v43 = vmul.f32 1.6732632, %v3027_v35  ;;  %v1271_v60 = vmin.f32 %v1260_v36, 0.0  ;;  %vm1267_vm3 = vcmp.gt.f32.partialorder %v1260_v36, 0.0 }
 0x423   :  { %v2658_v31 = vpack.c.bf16 %v2650_v51, %v2650_v51  ;;  %v2644_v57 = vmul.f32 1.6732632, %v3028_v44  ;;  %v3170_v15 = vpop.eup %3169 }
 0x424   :  { %v2670_v39 = vsel %vm6459_vm15, %v2657_v59, 0  ;;  %v2647_v13 = vsel %vm2623_vm6, %v2619_v33, %v2643_v43  ;;  %v1278_v61 = vmul.f32 1.442695, %v1271_v60  ;;  %v3172_v41 = vpop.eup %3171  ;;  %v2985_v48 = vadd.f32 -1.0, %v3170_v15 }
 0x425   :  { %3031 = vmatprep.subr.msk.bf16.mxu0 %vm6460_vm0, %v2658_v31  ;;  %v2648_v21 = vsel %vm2624_vm8, %v2620_v18, %v2644_v57  ;;  %v2651_v38 = vmul.f32 1.050701, %v2647_v13  ;;  %v2987_v12 = vadd.f32 -1.0, %v3172_v41  ;;  %v1072_v57 = vpop.permute.xlu1 %1071 }
 0x426   :  { %2682 = vmatpush1.bf16.msra.mxu0 %v2670_v39  ;;  %v2652_v25 = vmul.f32 1.050701, %v2648_v21  ;;  %3173 = vpow2.f32 %v1278_v61  ;;  %v1284_v23 = vmul.f32 1.6732632, %v2985_v48  ;;  %v1076_v54 = vmul.f32 %v1072_v57, %v6471_v6 }
 0x427   :  { %v2659_v17 = vpack.c.bf16 %v2651_v38, %v2651_v38  ;;  %3175 = vpow2.f32 %v1274_v20  ;;  %v1286_v46 = vmul.f32 1.6732632, %v2987_v12 }
 0x428   :  { %v2660_v7 = vpack.c.bf16 %v2652_v25, %v2652_v25  ;;  %v1288_v29 = vsel %vm1264_vm14, %v1217_v34, %v1284_v23  ;;  %v1074_v34 = vmul.f32 %v1072_v57, %v6469_v4  ;;  %v1090_v23 = vrot.slane %v1076_v54, 4 }
 0x429   :  { %3032 = vmatmul.mubr.msk.bf16.vlgmr.msra.gmra.mrb[16].mxu0 %vm6461_vm4, %v3029_v9  ;;  %v2676_v8 = vsel %vm6462_vm5, %v2659_v17, 0  ;;  %v1290_v53 = vsel %vm1266_vm11, %v1258_v40, %v1286_v46  ;;  %v1292_v2 = vmul.f32 1.050701, %v1288_v29 }
 0x42a   :  { %3033 = vmatprep.subr.msk.bf16.mxu1 %vm6463_vm9, %v2660_v7  ;;  %v1294_v30 = vmul.f32 1.050701, %v1290_v53  ;;  %v1078_v15 = vrot.slane %v1074_v34, 4 }
 0x42b   :  { %2723 = vmatpush1.bf16.msra.mxu1 %v2676_v8  ;;  %v1302_v56 = vmul.f32 %v1300_v49, %v1292_v2 }
 0x42c   :  { %v1304_v50 = vmul.f32 %v1300_v49, %v1294_v30  ;;  %v1091_v30 = vadd.f32 %v1090_v23, %v1076_v54 }
 0x42d   :  { %v1307_v59 = vsel %vm1306_vm10, %v1302_v56, 0.0 }
 0x42e   :  { %3034 = vmatmul.mubr.msk.bf16.vlgmr.msra.gmra.mrb[16].mxu1 %vm6464_vm2, %v3029_v9  ;;  %v1321_v43 = vsel %vm1306_vm10, %v1304_v50, 0.0  ;;  %v1308_v13 = vrot.slane %v1307_v59, 4 }
 0x42f   :  { %v1322_v45 = vrot.slane %v1321_v43, 4 }
 0x430   :  { %v3174_v63 = vpop.eup %3173 }
 0x431   :  { %v3176_v19 = vpop.eup %3175  ;;  %v2988_v18 = vadd.f32 -1.0, %v3174_v63  ;;  %v1323_v20 = vadd.f32 %v1322_v45, %v1321_v43 }
 0x432   :  { %v2986_v33 = vadd.f32 -1.0, %v3176_v19 }
 0x433   :  { %v1287_v55 = vmul.f32 1.6732632, %v2988_v18  ;;  %v1324_v46 = vrot.slane %v1323_v20, 2 }
 0x434   :  { %v1285_v26 = vmul.f32 1.6732632, %v2986_v33  ;;  %v6472_v33 = vld [vmem:[#allocation20_spill] sm:$0xff] }
 0x435   :  { %v1291_v10 = vsel %vm1267_vm3, %v1260_v36, %v1287_v55  ;;  %v1075_v36 = vmul.f32 %v1072_v57, %v6470_v28  ;;  %v1077_v18 = vmul.f32 %v1072_v57, %v6472_v33 }
 0x436   :  { %v1289_v62 = vsel %vm1265_vm7, %v1219_v37, %v1285_v26  ;;  %v1295_v52 = vmul.f32 1.050701, %v1291_v10  ;;  %v1309_v37 = vadd.f32 %v1308_v13, %v1307_v59  ;;  %v1079_v26 = vadd.f32 %v1078_v15, %v1074_v34 }
 0x437   :  { %v1293_v3 = vmul.f32 1.050701, %v1289_v62  ;;  %v1084_v63 = vrot.slane %v1075_v36, 4 }
 0x438   :  { %v1305_v51 = vmul.f32 %v1300_v49, %v1295_v52  ;;  %v1310_v48 = vrot.slane %v1309_v37, 2  ;;  %v5914_v52 = vadd.f32 %v1324_v46, %v1323_v20  ;;  %v1080_v56 = vrot.slane %v1079_v26, 2 }
 0x439   :  { %v1303_v35 = vmul.f32 %v1300_v49, %v1293_v3  ;;  %v1085_v29 = vadd.f32 %v1084_v63, %v1075_v36  ;;  %v1096_v49 = vrot.slane %v1077_v18, 4 }
 0x43a   :  { %v1328_v17 = vsel %vm1306_vm10, %v1305_v51, 0.0  ;;  %v1311_v53 = vadd.f32 %v1310_v48, %v1309_v37  ;;  %v1326_v13 = vrot.slane %v5914_v52, 1 }
 0x43b   :  { %v1314_v25 = vsel %vm1306_vm10, %v1303_v35, 0.0  ;;  %v1329_v60 = vrot.slane %v1328_v17, 4  ;;  %v1086_v50 = vrot.slane %v1085_v29, 2 }
 0x43c   :  { %v1315_v14 = vrot.slane %v1314_v25, 4 }
 0x43d   :  { %v1330_v12 = vadd.f32 %v1329_v60, %v1328_v17 }
 0x43e   :  { %v1316_v19 = vadd.f32 %v1315_v14, %v1314_v25 }
 0x43f   :  { %v1331_v62 = vrot.slane %v1330_v12, 2 }
 0x440   :  { %v1317_v2 = vrot.slane %v1316_v19, 2 }
 0x441   :  { %v5917_v51 = vadd.f32 %v1331_v62, %v1330_v12 }
 0x442   :  { %v1318_v35 = vadd.f32 %v1317_v2, %v1316_v19 }
 0x443   :  { %v1333_v15 = vrot.slane %v5917_v51, 1 }
 0x444   :  { %v1319_v34 = vrot.slane %v1318_v35, 1 }
 0x446   :  { %v1320_v48 = vadd.f32 %v1319_v34, %v1318_v35 }
 0x4cc   :  { %v1679_v11 = vpop.f32.mrb[8].mxu0 }
 0x4cd   :  { %v5893_v32 = vadd.f32 %v1679_v11, %v1628_v27  ;;  %v1681_v22 = vpop.f32.mrb[9].mxu0 }
 0x4ce   :  { %v5895_v1 = vadd.f32 %v1681_v22, %v1628_v27  ;;  %v1683_v0 = vpop.f32.mrb[10].mxu0 }
 0x4cf   :  { %v1731_v31 = vmin.f32 %v5893_v32, 0.0  ;;  %v1684_v44 = vpop.f32.mrb[11].mxu0  ;;  %vm1727_vm13 = vcmp.gt.f32.partialorder %v5893_v32, 0.0  ;;  %v1312_v0 = vrot.slane %v1311_v53, 1 }
 0x4d0   :  { %v1732_v39 = vmin.f32 %v5895_v1, 0.0  ;;  %vm1728_vm1 = vcmp.gt.f32.partialorder %v5895_v1, 0.0  ;;  %v1092_v44 = vrot.slane %v1091_v30, 2 }
 0x4d1   :  { %v1735_v9 = vmul.f32 1.442695, %v1731_v31  ;;  %v1720_v21 = vpop.f32.mrb[8].mxu1  ;;  %v1313_v20 = vadd.f32 %v1312_v0, %v1311_v53 }
 0x4d2   :  { %v1737_v38 = vmul.f32 1.442695, %v1732_v39  ;;  %v5903_v7 = vadd.f32 %v1720_v21, %v1628_v27  ;;  %v1722_v8 = vpop.f32.mrb[9].mxu1  ;;  %v1097_v39 = vadd.f32 %v1096_v49, %v1077_v18  ;;  %v1764_v21 = vpop.permute.xlu0 %1763  ;;  %v1093_v28 = vadd.f32 %v1092_v44, %v1091_v30 }
 0x4d3   :  { %3177 = vpow2.f32 %v1735_v9  ;;  %v5906_v5 = vadd.f32 %v1722_v8, %v1628_v27  ;;  %v1724_v40 = vpop.f32.mrb[10].mxu1  ;;  %v1087_v8 = vadd.f32 %v1086_v50, %v1085_v29 }
 0x4d4   :  { %3179 = vpow2.f32 %v1737_v38  ;;  %v1733_v42 = vmin.f32 %v5903_v7, 0.0  ;;  %v1725_v58 = vpop.f32.mrb[11].mxu1  ;;  %v1081_v38 = vadd.f32 %v1080_v56, %v1079_v26  ;;  %vm1729_vm12 = vcmp.gt.f32.partialorder %v5903_v7, 0.0 }
 0x4d5   :  { %v1734_v47 = vmin.f32 %v5906_v5, 0.0  ;;  %vm1730_vm15 = vcmp.gt.f32.partialorder %v5906_v5, 0.0  ;;  %v1098_v36 = vrot.slane %v1097_v39, 2  ;;  %v1094_v23 = vrot.slane %v1093_v28, 1 }
 0x4d6   :  { %v1739_v61 = vmul.f32 1.442695, %v1733_v42  ;;  %v1082_v58 = vrot.slane %v1081_v38, 1 }
 0x4d7   :  { %v1741_v41 = vmul.f32 1.442695, %v1734_v47  ;;  %v1088_v47 = vrot.slane %v1087_v8, 1  ;;  %v1099_v19 = vadd.f32 %v1098_v36, %v1097_v39  ;;  %v1095_v0 = vadd.f32 %v1094_v23, %v1093_v28 }
 0x4d8   :  { %3181 = vpow2.f32 %v1739_v61  ;;  %v1083_v18 = vadd.f32 %v1082_v58, %v1081_v38 }
 0x4d9   :  { %3183 = vpow2.f32 %v1741_v41 }
 0x4da   :  { %v1335_v44 = vadd.f32 %v1313_v20, %v1083_v18 }
 0x4dd   :  { %v3178_v55 = vpop.eup %3177 }
 0x4de   :  { %v3180_v27 = vpop.eup %3179  ;;  %v3001_v10 = vadd.f32 -1.0, %v3178_v55  ;;  %v1089_v55 = vadd.f32 %v1088_v47, %v1087_v8 }
 0x4df   :  { %v3002_v3 = vadd.f32 -1.0, %v3180_v27 }
 0x4e0   :  { %v1747_v11 = vmul.f32 1.6732632, %v3001_v10 }
 0x4e1   :  { %v1748_v22 = vmul.f32 1.6732632, %v3002_v3  ;;  %v1100_v3 = vrot.slane %v1099_v19, 1 }
 0x4e2   :  { %v1751_v59 = vsel %vm1727_vm13, %v5893_v32, %v1747_v11  ;;  %v3182_v31 = vpop.eup %3181 }
 0x4e3   :  { %v1755_v43 = vmul.f32 1.050701, %v1751_v59  ;;  %v1752_v57 = vsel %vm1728_vm1, %v5895_v1, %v1748_v22  ;;  %v3184_v9 = vpop.eup %3183  ;;  %v3003_v25 = vadd.f32 -1.0, %v3182_v31 }
 0x4e4   :  { %v1756_v17 = vmul.f32 1.050701, %v1752_v57  ;;  %v3004_v4 = vadd.f32 -1.0, %v3184_v9  ;;  %v1336_v9 = vadd.f32 %v1320_v48, %v1089_v55 }
 0x4e5   :  { %v1766_v45 = vmul.f32 %v1764_v21, %v1755_v43  ;;  %v1749_v32 = vmul.f32 1.6732632, %v3003_v25 }
 0x4e6   :  { %v1767_v40 = vmul.f32 %v1764_v21, %v1756_v17  ;;  %v1750_v42 = vmul.f32 1.6732632, %v3004_v4 }
 0x4e7   :  { %v1770_v1 = vsel %vm1306_vm10, %v1766_v45, 0.0  ;;  %v1753_v14 = vsel %vm1729_vm12, %v5903_v7, %v1749_v32 }
 0x4e8   :  { %v1771_v37 = vrot.slane %v1770_v1, 4  ;;  %v1777_v60 = vsel %vm1306_vm10, %v1767_v40, 0.0  ;;  %v1757_v6 = vmul.f32 1.050701, %v1753_v14  ;;  %v1754_v61 = vsel %vm1730_vm15, %v5906_v5, %v1750_v42 }
 0x4e9   :  { %v1778_v54 = vrot.slane %v1777_v60, 4  ;;  %v1758_v63 = vmul.f32 1.050701, %v1754_v61 }
 0x4ea   :  { %v1772_v41 = vadd.f32 %v1771_v37, %v1770_v1  ;;  %v1768_v12 = vmul.f32 %v1764_v21, %v1757_v6  ;;  %v2210_v26 = vpop.f32.mrb[12].mxu0  ;;  %v1101_v1 = vadd.f32 %v1100_v3, %v1099_v19 }
 0x4eb   :  { %v1779_v33 = vadd.f32 %v1778_v54, %v1777_v60  ;;  %v1769_v7 = vmul.f32 %v1764_v21, %v1758_v63  ;;  %v5931_v5 = vadd.f32 %v2210_v26, %v5889_v24  ;;  %v2212_v53 = vpop.f32.mrb[13].mxu0  ;;  %v1327_v60 = vadd.f32 %v1326_v13, %v5914_v52 }
 0x4ec   :  { %v1773_v46 = vrot.slane %v1772_v41, 2  ;;  %v1784_v29 = vsel %vm1306_vm10, %v1768_v12, 0.0  ;;  %v2213_v30 = vadd.f32 %v2212_v53, %v5889_v24  ;;  %v2214_v49 = vpop.f32.mrb[14].mxu0  ;;  %v1334_v54 = vadd.f32 %v1333_v15, %v5917_v51 }
 0x4ed   :  { %v1780_v27 = vrot.slane %v1779_v33, 2  ;;  %v1785_v62 = vrot.slane %v1784_v29, 4  ;;  %v1791_v10 = vsel %vm1306_vm10, %v1769_v7, 0.0  ;;  %v2262_v50 = vmin.f32 %v5931_v5, 0.0  ;;  %v2215_v22 = vpop.f32.mrb[15].mxu0  ;;  %v2251_v25 = vpop.f32.mrb[12].mxu1 }
 0x4ee   :  { %v1774_v2 = vadd.f32 %v1773_v46, %v1772_v41  ;;  %v1792_v11 = vrot.slane %v1791_v10, 4  ;;  %v2263_v31 = vmin.f32 %v2213_v30, 0.0  ;;  %v2252_v4 = vadd.f32 %v2251_v25, %v5889_v24  ;;  %v2253_v34 = vpop.f32.mrb[13].mxu1 }
 0x4ef   :  { %v1781_v56 = vadd.f32 %v1780_v27, %v1779_v33  ;;  %v1786_v59 = vadd.f32 %v1785_v62, %v1784_v29  ;;  %v2266_v57 = vmul.f32 1.442695, %v2262_v50  ;;  %v2254_v40 = vadd.f32 %v2253_v34, %v5889_v24  ;;  %v2255_v28 = vpop.f32.mrb[14].mxu1  ;;  %v2295_v62 = vpop.permute.xlu1 %2294 }
 0x4f0   :  { %v1775_v35 = vrot.slane %v1774_v2, 1  ;;  %v1793_v43 = vadd.f32 %v1792_v11, %v1791_v10  ;;  %v2268_v17 = vmul.f32 1.442695, %v2263_v31  ;;  %v2264_v58 = vmin.f32 %v2252_v4, 0.0  ;;  %v2256_v37 = vpop.f32.mrb[15].mxu1 }
 0x4f1   :  { %v1782_v39 = vrot.slane %v1781_v56, 1  ;;  %v1787_v38 = vrot.slane %v1786_v59, 2  ;;  %3185 = vpow2.f32 %v2266_v57  ;;  %v2265_v6 = vmin.f32 %v2254_v40, 0.0 }
 0x4f2   :  { %v1776_v21 = vadd.f32 %v1775_v35, %v1774_v2  ;;  %v1794_v45 = vrot.slane %v1793_v43, 2  ;;  %3187 = vpow2.f32 %v2268_v17  ;;  %v2270_v20 = vmul.f32 1.442695, %v2264_v58 }
 0x4f3   :  { %v1783_v8 = vadd.f32 %v1782_v39, %v1781_v56  ;;  %v1788_v32 = vadd.f32 %v1787_v38, %v1786_v59  ;;  %v1337_v24 = vadd.f32 %v1327_v60, %v1095_v0  ;;  %v2272_v63 = vmul.f32 1.442695, %v2265_v6 }
 0x4f4   :  { %v5938_v36 = vadd.f32 %v1776_v21, %v1335_v44  ;;  %v1795_v42 = vadd.f32 %v1794_v45, %v1793_v43  ;;  %v1338_v48 = vadd.f32 %v1334_v54, %v1101_v1  ;;  %3189 = vpow2.f32 %v2270_v20 }
 0x4f5   :  { %v5940_v14 = vadd.f32 %v1783_v8, %v1336_v9  ;;  %v1789_v47 = vrot.slane %v1788_v32, 1  ;;  %3191 = vpow2.f32 %v2272_v63  ;;  %vm2258_vm0 = vcmp.gt.f32.partialorder %v5931_v5, 0.0 }
 0x4f6   :  { %v1796_v61 = vrot.slane %v1795_v42, 1  ;;  %vm2259_vm6 = vcmp.gt.f32.partialorder %v2213_v30, 0.0  ;;  %vm2260_vm8 = vcmp.gt.f32.partialorder %v2252_v4, 0.0  ;;  %vm2261_vm4 = vcmp.gt.f32.partialorder %v2254_v40, 0.0 }
 0x4f7   :  { %v1790_v41 = vadd.f32 %v1789_v47, %v1788_v32 }
 0x4f8   :  { %v1797_v19 = vadd.f32 %v1796_v61, %v1795_v42 }
 0x4f9   :  { %v5946_v12 = vadd.f32 %v1790_v41, %v1337_v24 }
 0x4fa   :  { %v5948_v33 = vadd.f32 %v1797_v19, %v1338_v48 }
 0x4fb   :  { %v3186_v18 = vpop.eup %3185 }
 0x4fc   :  { %v3188_v23 = vpop.eup %3187  ;;  %v3018_v52 = vadd.f32 -1.0, %v3186_v18  ;;  %v2715_v2 = vpop.f32.mrb[16].mxu0 }
 0x4fd   :  { %v3019_v13 = vadd.f32 -1.0, %v3188_v23  ;;  %v5953_v49 = vadd.f32 %v2715_v2, %v5891_v16  ;;  %v2717_v3 = vpop.f32.mrb[17].mxu0 }
 0x4fe   :  { %v2278_v46 = vmul.f32 1.6732632, %v3018_v52  ;;  %v3190_v7 = vpop.eup %3189  ;;  %v5956_v50 = vadd.f32 %v2717_v3, %v5891_v16  ;;  %v2719_v22 = vpop.f32.mrb[18].mxu0 }
 0x4ff   :  { %v2279_v51 = vmul.f32 1.6732632, %v3019_v13  ;;  %v3192_v29 = vpop.eup %3191  ;;  %v3020_v27 = vadd.f32 -1.0, %v3190_v7  ;;  %v2720_v59 = vpop.f32.mrb[19].mxu0  ;;  %vm2763_vm5 = vcmp.gt.f32.partialorder %v5953_v49, 0.0 }
 0x500   :  { %v2282_v15 = vsel %vm2258_vm0, %v5931_v5, %v2278_v46  ;;  %v3021_v10 = vadd.f32 -1.0, %v3192_v29  ;;  %v2768_v44 = vmin.f32 %v5956_v50, 0.0  ;;  %vm2764_vm9 = vcmp.gt.f32.partialorder %v5956_v50, 0.0 }
 0x501   :  { %v2286_v26 = vmul.f32 1.050701, %v2282_v15  ;;  %v2283_v55 = vsel %vm2259_vm6, %v2213_v30, %v2279_v51  ;;  %v2280_v11 = vmul.f32 1.6732632, %v3020_v27  ;;  %v2767_v30 = vmin.f32 %v5953_v49, 0.0  ;;  %v2756_v34 = vpop.f32.mrb[16].mxu1 }
 0x502   :  { %v2287_v53 = vmul.f32 1.050701, %v2283_v55  ;;  %v2281_v0 = vmul.f32 1.6732632, %v3021_v10  ;;  %v2773_v25 = vmul.f32 1.442695, %v2768_v44  ;;  %v2757_v58 = vadd.f32 %v2756_v34, %v5891_v16 }
 0x503   :  { %v2297_v56 = vmul.f32 %v2295_v62, %v2286_v26  ;;  %v2284_v31 = vsel %vm2260_vm8, %v2252_v4, %v2280_v11  ;;  %v2771_v9 = vmul.f32 1.442695, %v2767_v30  ;;  %v2758_v1 = vpop.f32.mrb[17].mxu1 }
 0x504   :  { %v2298_v5 = vmul.f32 %v2295_v62, %v2287_v53  ;;  %v2288_v43 = vmul.f32 1.050701, %v2284_v31  ;;  %v2285_v57 = vsel %vm2261_vm4, %v2254_v40, %v2281_v0  ;;  %v5965_v40 = vadd.f32 %v2758_v1, %v5891_v16  ;;  %v2760_v37 = vpop.f32.mrb[18].mxu1 }
 0x505   :  { %v2301_v35 = vsel %vm1306_vm10, %v2297_v56, 0.0  ;;  %v2289_v38 = vmul.f32 1.050701, %v2285_v57  ;;  %3193 = vpow2.f32 %v2771_v9  ;;  %v2761_v61 = vpop.f32.mrb[19].mxu1  ;;  %v2769_v24 = vmin.f32 %v2757_v58, 0.0 }
 0x506   :  { %v2302_v39 = vrot.slane %v2301_v35, 4  ;;  %v2308_v21 = vsel %vm1306_vm10, %v2298_v5, 0.0  ;;  %v2299_v45 = vmul.f32 %v2295_v62, %v2288_v43  ;;  %3195 = vpow2.f32 %v2773_v25 }
 0x507   :  { %v2309_v8 = vrot.slane %v2308_v21, 4  ;;  %v2300_v32 = vmul.f32 %v2295_v62, %v2289_v38  ;;  %v2770_v19 = vmin.f32 %v5965_v40, 0.0  ;;  %v2775_v23 = vmul.f32 1.442695, %v2769_v24 }
 0x508   :  { %v2303_v17 = vadd.f32 %v2302_v39, %v2301_v35  ;;  %v2315_v42 = vsel %vm1306_vm10, %v2299_v45, 0.0  ;;  %vm2765_vm2 = vcmp.gt.f32.partialorder %v2757_v58, 0.0  ;;  %vm2766_vm14 = vcmp.gt.f32.partialorder %v5965_v40, 0.0 }
 0x509   :  { %v2310_v4 = vadd.f32 %v2309_v8, %v2308_v21  ;;  %v2316_v6 = vrot.slane %v2315_v42, 4  ;;  %v2322_v54 = vsel %vm1306_vm10, %v2300_v32, 0.0  ;;  %v2777_v46 = vmul.f32 1.442695, %v2770_v19 }
 0x50a   :  { %v2304_v28 = vrot.slane %v2303_v17, 2  ;;  %v2323_v20 = vrot.slane %v2322_v54, 4  ;;  %3197 = vpow2.f32 %v2775_v23 }
 0x50b   :  { %v2311_v47 = vrot.slane %v2310_v4, 2  ;;  %v2317_v48 = vadd.f32 %v2316_v6, %v2315_v42  ;;  %3199 = vpow2.f32 %v2777_v46 }
 0x50c   :  { %v2305_v60 = vadd.f32 %v2304_v28, %v2303_v17  ;;  %v2324_v18 = vadd.f32 %v2323_v20, %v2322_v54 }
 0x50d   :  { %v2312_v63 = vadd.f32 %v2311_v47, %v2310_v4  ;;  %v2318_v16 = vrot.slane %v2317_v48, 2 }
 0x50e   :  { %v2306_v41 = vrot.slane %v2305_v60, 1  ;;  %v2325_v51 = vrot.slane %v2324_v18, 2 }
 0x50f   :  { %v2313_v13 = vrot.slane %v2312_v63, 1  ;;  %v2319_v7 = vadd.f32 %v2318_v16, %v2317_v48  ;;  %v3194_v55 = vpop.eup %3193 }
 0x510   :  { %v2307_v52 = vadd.f32 %v2306_v41, %v2305_v60  ;;  %v2326_v29 = vadd.f32 %v2325_v51, %v2324_v18  ;;  %v3196_v27 = vpop.eup %3195  ;;  %v3035_v53 = vadd.f32 -1.0, %v3194_v55  ;;  %v2842_v41 = vpop.permute.xlu1 %2841 }
 0x511   :  { %v2314_v15 = vadd.f32 %v2313_v13, %v2312_v63  ;;  %v2320_v2 = vrot.slane %v2319_v7, 1  ;;  %v3036_v10 = vadd.f32 -1.0, %v3196_v27 }
 0x512   :  { %v2329_v26 = vadd.f32 %v2307_v52, %v5938_v36  ;;  %v2327_v3 = vrot.slane %v2326_v29, 1  ;;  %v2783_v56 = vmul.f32 1.6732632, %v3035_v53  ;;  %v6473_v52 = vld [vmem:[#allocation13_spill] sm:$0xff] }
 0x513   :  { %v2330_v62 = vadd.f32 %v2314_v15, %v5940_v14  ;;  %v2321_v11 = vadd.f32 %v2320_v2, %v2319_v7  ;;  %v2784_v5 = vmul.f32 1.6732632, %v3036_v10  ;;  %v2800_v14 = vpop.permute.xlu0 %2799  ;;  %v2847_v13 = vrot.slane %v2842_v41, %v6473_v52 }
 0x514   :  { %v2328_v22 = vadd.f32 %v2327_v3, %v2326_v29  ;;  %v2787_v0 = vsel %vm2763_vm5, %v5953_v49, %v2783_v56  ;;  %v3198_v44 = vpop.eup %3197 }
 0x515   :  { %v2331_v36 = vadd.f32 %v2321_v11, %v5946_v12  ;;  %v2791_v30 = vmul.f32 1.050701, %v2787_v0  ;;  %v2788_v35 = vsel %vm2764_vm9, %v5956_v50, %v2784_v5  ;;  %v3200_v43 = vpop.eup %3199  ;;  %v3037_v9 = vadd.f32 -1.0, %v3198_v44 }
 0x516   :  { %v2332_v59 = vadd.f32 %v2328_v22, %v5948_v33  ;;  %v2792_v31 = vmul.f32 1.050701, %v2788_v35  ;;  %v3038_v38 = vadd.f32 -1.0, %v3200_v43 }
 0x517   :  { %v2802_v39 = vmul.f32 %v2800_v14, %v2791_v30  ;;  %v2785_v17 = vmul.f32 1.6732632, %v3037_v9 }
 0x518   :  { %v2803_v57 = vmul.f32 %v2800_v14, %v2792_v31  ;;  %v2786_v8 = vmul.f32 1.6732632, %v3038_v38  ;;  %v3209_v38 = vld [vmem:[#allocation3] sm:$0xf] }
 0x519   :  { %v2806_v21 = vsel %vm1306_vm10, %v2802_v39, 0.0  ;;  %v2789_v45 = vsel %vm2765_vm2, %v2757_v58, %v2785_v17  ;;  %v6474_v17 = vld [vmem:[#allocation12_spill] sm:$0xff] }
 0x51a   :  { %v2807_v49 = vrot.slane %v2806_v21, 4  ;;  %v2813_v25 = vsel %vm1306_vm10, %v2803_v57, 0.0  ;;  %v2793_v34 = vmul.f32 1.050701, %v2789_v45  ;;  %v2790_v32 = vsel %vm2766_vm14, %v5965_v40, %v2786_v8 }
 0x51b   :  { %v2814_v12 = vrot.slane %v2813_v25, 4  ;;  %v2794_v4 = vmul.f32 1.050701, %v2790_v32 }
 0x51c   :  { %v2808_v50 = vadd.f32 %v2807_v49, %v2806_v21  ;;  %v2804_v42 = vmul.f32 %v2800_v14, %v2793_v34  ;;  %v2892_v49 = vrot.slane %v3209_v38, %v6473_v52 }
 0x51d   :  { %v2815_v33 = vadd.f32 %v2814_v12, %v2813_v25  ;;  %v2805_v60 = vmul.f32 %v2800_v14, %v2794_v4  ;;  %v6475_v12 = vsub.s32 1, %v6474_v17 }
 0x51e   :  { %v2809_v28 = vrot.slane %v2808_v50, 2  ;;  %v2820_v6 = vsel %vm1306_vm10, %v2804_v42, 0.0 }
 0x51f   :  { %v2816_v1 = vrot.slane %v2815_v33, 2  ;;  %v2821_v61 = vrot.slane %v2820_v6, 4  ;;  %v2827_v20 = vsel %vm1306_vm10, %v2805_v60, 0.0  ;;  %v2896_v8 = vrot.slane %v3209_v38, %v6475_v12 }
 0x520   :  { %v2810_v37 = vadd.f32 %v2809_v28, %v2808_v50  ;;  %v2828_v24 = vrot.slane %v2827_v20, 4 }
 0x521   :  { %v2817_v47 = vadd.f32 %v2816_v1, %v2815_v33  ;;  %v2822_v63 = vadd.f32 %v2821_v61, %v2820_v6 }
 0x522   :  { %v2811_v54 = vrot.slane %v2810_v37, 1  ;;  %v2829_v19 = vadd.f32 %v2828_v24, %v2827_v20 }
 0x523   :  { %v2818_v58 = vrot.slane %v2817_v47, 1  ;;  %v2823_v18 = vrot.slane %v2822_v63, 2 }
 0x524   :  { %v2812_v48 = vadd.f32 %v2811_v54, %v2810_v37  ;;  %v2830_v16 = vrot.slane %v2829_v19, 2  ;;  %v3305_v37 = vmov 1966171168  }
 0x525   :  { %v2819_v40 = vadd.f32 %v2818_v58, %v2817_v47  ;;  %v2824_v51 = vadd.f32 %v2823_v18, %v2822_v63  ;;  %v2920_v60 = vunpack.c.l.s4 %v3305_v37  ;;  %v6476_v58 = vsub.s32 2, %v6474_v17 }
 0x526   :  { %v2834_v23 = vadd.f32 %v2812_v48, %v2329_v26  ;;  %v2831_v7 = vadd.f32 %v2830_v16, %v2829_v19  ;;  %v6477_v63 = vsub.s32 3, %v6474_v17 }
 0x527   :  { %v2835_v46 = vadd.f32 %v2819_v40, %v2330_v62  ;;  %v2825_v29 = vrot.slane %v2824_v51, 1  ;;  %v2900_v24 = vrot.slane %v3209_v38, %v6476_v58  ;;  %v2921_v19 = vunpack.c.0.s8 %v2920_v60 }
 0x528   :  { %v2848_v15 = vadd.f32 %v2847_v13, %v2834_v23  ;;  %v2832_v53 = vrot.slane %v2831_v7, 1  ;;  %v2904_v48 = vrot.slane %v3209_v38, %v6477_v63 }
 0x529   :  { %v2849_v55 = vadd.f32 %v2847_v13, %v2835_v46  ;;  %v2826_v10 = vadd.f32 %v2825_v29, %v2824_v51 }
 0x52a   :  { %v2856_v27 = vmin.f32 %v2848_v15, 0.0  ;;  %v2833_v56 = vadd.f32 %v2832_v53, %v2831_v7  ;;  %vm2852_vm11 = vcmp.gt.f32.partialorder %v2848_v15, 0.0  ;;  %v6478_v7 = vlaneseq }
 0x52b   :  { %v2857_v2 = vmin.f32 %v2849_v55, 0.0  ;;  %v2836_v5 = vadd.f32 %v2826_v10, %v2331_v36  ;;  %vm2853_vm7 = vcmp.gt.f32.partialorder %v2849_v55, 0.0 }
 0x52c   :  { %v2860_v3 = vmul.f32 1.442695, %v2856_v27  ;;  %v2837_v22 = vadd.f32 %v2833_v56, %v2332_v59  ;;  %vm2944_vm13 = vcmp.lt.s32.totalorder %v6478_v7, 512 }
 0x52d   :  { %v2862_v11 = vmul.f32 1.442695, %v2857_v2  ;;  %v2850_v26 = vadd.f32 %v2847_v13, %v2836_v5 }
 0x52e   :  { %3201 = vpow2.f32 %v2860_v3  ;;  %v2851_v0 = vadd.f32 %v2847_v13, %v2837_v22  ;;  %v2924_v13 = vsub.s32 %v2921_v19, %v6474_v17 }
 0x52f   :  { %3203 = vpow2.f32 %v2862_v11  ;;  %v2858_v30 = vmin.f32 %v2850_v26, 0.0  ;;  %vm2854_vm3 = vcmp.gt.f32.partialorder %v2850_v26, 0.0 }
 0x530   :  { %v2859_v62 = vmin.f32 %v2851_v0, 0.0  ;;  %vm2855_vm10 = vcmp.gt.f32.partialorder %v2851_v0, 0.0 }
 0x531   :  { %v2864_v35 = vmul.f32 1.442695, %v2858_v30 }
 0x532   :  { %v2866_v14 = vmul.f32 1.442695, %v2859_v62 }
 0x533   :  { %3205 = vpow2.f32 %v2864_v35 }
 0x534   :  { %3207 = vpow2.f32 %v2866_v14 }
 0x538   :  { %v3202_v31 = vpop.eup %3201 }
 0x539   :  { %v3204_v44 = vpop.eup %3203  ;;  %v3040_v39 = vadd.f32 -1.0, %v3202_v31 }
 0x53a   :  { %v3041_v43 = vadd.f32 -1.0, %v3204_v44 }
 0x53b   :  { %v2872_v57 = vmul.f32 1.6732632, %v3040_v39 }
 0x53c   :  { %v2873_v9 = vmul.f32 1.6732632, %v3041_v43 }
 0x53d   :  { %v2876_v36 = vsel %vm2852_vm11, %v2848_v15, %v2872_v57  ;;  %v3206_v50 = vpop.eup %3205 }
 0x53e   :  { %v2877_v21 = vsel %vm2853_vm7, %v2849_v55, %v2873_v9  ;;  %v2880_v59 = vmul.f32 1.050701, %v2876_v36  ;;  %v3208_v33 = vpop.eup %3207  ;;  %v3042_v34 = vadd.f32 -1.0, %v3206_v50 }
 0x53f   :  { %v2881_v25 = vmul.f32 1.050701, %v2877_v21  ;;  %v3043_v28 = vadd.f32 -1.0, %v3208_v33 }
 0x540   :  { %v2884_v45 = vmax.f32 %v2880_v59, 0.0  ;;  %v2874_v1 = vmul.f32 1.6732632, %v3042_v34 }
 0x541   :  { %v2885_v32 = vmax.f32 %v2881_v25, 0.0  ;;  %v2875_v47 = vmul.f32 1.6732632, %v3043_v28 }
 0x542   :  { %v2909_v4 = vadd.f32 %v2892_v49, %v2884_v45  ;;  %v2878_v6 = vsel %vm2854_vm3, %v2850_v26, %v2874_v1 }
 0x543   :  { %v2910_v42 = vadd.f32 %v2896_v8, %v2885_v32  ;;  %v2879_v61 = vsel %vm2855_vm10, %v2851_v0, %v2875_v47  ;;  %v2882_v20 = vmul.f32 1.050701, %v2878_v6 }
 0x544   :  { %v2883_v41 = vmul.f32 1.050701, %v2879_v61 }
 0x545   :  { %v2917_v54 = vcombine.low %v2909_v4, %v2910_v42  ;;  %v2886_v40 = vmax.f32 %v2882_v20, 0.0 }
 0x546   :  { %v2887_v18 = vmax.f32 %v2883_v41, 0.0 }
 0x547   :  { %v2911_v23 = vadd.f32 %v2900_v24, %v2886_v40  ;;  %v2925_v46 = vrot.slane %v2917_v54, %v2924_v13 }
 0x548   :  { %v2912_v52 = vadd.f32 %v2904_v48, %v2887_v18 }
 0x54a   :  { %v2918_v16 = vcombine.low %v2911_v23, %v2912_v52 }
 0x54c   :  { %v2932_v51 = vrot.slane %v2918_v16, %v2924_v13 }
 0x54e   :  { %v2933_v15 = vcombine.low %v2925_v46, %v2932_v51 }
 0x550   :  { %v2940_v55 = vrot.slane %v2933_v15, %v2924_v13 }
 0x552   :  { %2946 = vst.msk [vmem:[#allocation8] sm:$0xf] %vm2944_vm13, %v2940_v55 }
 0x553   :  { %3265 = shalt.err (!%p3262_p6)
}
 0x554   :  { %s3266_s28 = scalar_lea.hbm %s6018_s13, 64 }
 0x555   :  { %p3267_p7 = scmp.ne.s32.totalorder %s6018_s13, %s3266_s28  ;;  %p3270_p8 = scmp.lt.u32.totalorder %s3266_s28, %s6018_s13 }
 0x557   :  { %p3272_p9 = pnand %p3270_p8, %p3267_p7 }
 0x559   :  { %3275 = shalt.err (!%p3272_p9)
}
 0x55a   :  { %2956 = dma.vmem_to_hbm [thread:$0]  %s2954_s12, 64, %s6018_s13, [#allocation5]  }
 0x55b   :  { %3280 = dma.done.wait [#allocation5], 64  }
 0x55c   :  { %3281 = vsyncadd [#allocation5], 4294967232 }
 0x55d   :  { %2960 = vsyncpa [#allocation4], 1 }
 0x55e   :  { %2961 = vsyncpa [#allocation7], 1 }
 0x55f   :  { %2962 = vsyncpa [#allocation5], 1 }

</bundles_post_ra>
